<compile_context>
chip_gen: v7x
topology: tpu7x:2x2x1
jax: 0.10.0
libtpu: 0.0.40
codegen_flags: <defaults>
</compile_context>

<pallas_src>
import jax
import jax.numpy as jnp
from jax import lax
from jax.experimental import pallas as pl
from jax.experimental.pallas import tpu as pltpu


# ---------------------------------------------------------------------------
# Pallas kernels
# ---------------------------------------------------------------------------
def _matmul_bias_kernel(x_ref, w_ref, b_ref, o_ref):
    acc = jnp.dot(x_ref[...], w_ref[...], preferred_element_type=jnp.float32)
    o_ref[...] = (acc + b_ref[...]).astype(o_ref.dtype)


def matmul_bias(x, w, b, *, out_dtype=jnp.float32, tile_m=1024):
    """out = x @ w + b.  x:(M,K) bf16, w:(K,N) bf16, b:(1,N) f32."""
    M, K = x.shape
    N = w.shape[1]
    if M <= tile_m:
        tm, steps = M, 1          # single block: shapes equal full array dims
    else:
        tm, steps = tile_m, pl.cdiv(M, tile_m)   # shard rows (v7x: 2 TCs)
    return pl.pallas_call(
        _matmul_bias_kernel,
        out_shape=jax.ShapeDtypeStruct((M, N), out_dtype),
        grid=(steps,),
        in_specs=[
            pl.BlockSpec((tm, K), lambda i: (i, 0)),
            pl.BlockSpec((K, N), lambda i: (0, 0)),
            pl.BlockSpec((1, N), lambda i: (0, 0)),
        ],
        out_specs=pl.BlockSpec((tm, N), lambda i: (i, 0)),
        compiler_params=pltpu.CompilerParams(
            dimension_semantics=("parallel",)),
    )(x, w, b)


def _tail_kernel(x_ref, wc_ref, bc_ref, w1_ref, b1_ref, w2_ref, b2_ref, o_ref):
    # s  = encoder output (conv3 composed with fc -- both linear, no act between)
    s = (jnp.dot(x_ref[...], wc_ref[...], preferred_element_type=jnp.float32)
         + bc_ref[...])
    # h1 = [ value(relu(s)) | action(relu(s)) ]   (concatenated weights)
    h = jnp.maximum(s, 0.0).astype(jnp.bfloat16)
    h1 = (jnp.dot(h, w1_ref[...], preferred_element_type=jnp.float32)
          + b1_ref[...])
    # out = [ value_layer(relu(statev)) | action_layer(relu(actionv)) ]
    r = jnp.maximum(h1, 0.0).astype(jnp.bfloat16)
    o_ref[...] = (jnp.dot(r, w2_ref[...], preferred_element_type=jnp.float32)
                  + b2_ref[...])


def fused_tail(x, wc, bc, wh1, bh1, wh2, bh2, *, tile_b=512):
    """x:(B, 16*576) bf16 -> (B, 1+O) f32 = [state_value | action_value]."""
    B, K = x.shape
    H = wh1.shape[0]
    NO = wh2.shape[1]
    if B <= tile_b:
        tb, steps = B, 1
    else:
        tb, steps = tile_b, pl.cdiv(B, tile_b)
    return pl.pallas_call(
        _tail_kernel,
        out_shape=jax.ShapeDtypeStruct((B, NO), jnp.float32),
        grid=(steps,),
        in_specs=[
            pl.BlockSpec((tb, K), lambda i: (i, 0)),
            pl.BlockSpec((K, H), lambda i: (0, 0)),
            pl.BlockSpec((1, H), lambda i: (0, 0)),
            pl.BlockSpec((H, 2 * H), lambda i: (0, 0)),
            pl.BlockSpec((1, 2 * H), lambda i: (0, 0)),
            pl.BlockSpec((2 * H, NO), lambda i: (0, 0)),
            pl.BlockSpec((1, NO), lambda i: (0, 0)),
        ],
        out_specs=pl.BlockSpec((tb, NO), lambda i: (i, 0)),
        compiler_params=pltpu.CompilerParams(
            dimension_semantics=("parallel",)),
    )(x, wc, bc, wh1, bh1, wh2, bh2)


# ---------------------------------------------------------------------------
# im2col glue (plain JAX slicing/reshapes; activations kept NHWC / bf16)
# ---------------------------------------------------------------------------
def _conv1_patches(x):
    """x:(B,1,80,80) f32 -> (B*19*19, 64) bf16. kernel 8, stride 4 ->
    space-to-depth into 4x4 blocks, each patch = 2x2 neighbouring blocks."""
    B = x.shape[0]
    xb = x.reshape(B, 80, 80).astype(jnp.bfloat16)
    s2d = (xb.reshape(B, 20, 4, 20, 4)
             .transpose(0, 1, 3, 2, 4)        # (B, blk_r, blk_c, sub_r, sub_c)
             .reshape(B, 20, 20, 16))
    blocks = jnp.stack(                        # block order (bi, bj)
        [s2d[:, :19, :19], s2d[:, :19, 1:],
         s2d[:, 1:, :19], s2d[:, 1:, 1:]], axis=3)   # (B, 19, 19, 4, 16)
    return blocks.reshape(B * 19 * 19, 64)     # feature = blk*16 + sr*4 + sc


def _conv2_patches(y1, B):
    """y1:(B*361, 32) bf16 (NHWC conv1 out) -> (B*36, 512). k=4, s=3."""
    y = y1.reshape(B, 19, 19, 32)
    cols = [y[:, kh:kh + 16:3, kw:kw + 16:3, :]
            for kh in range(4) for kw in range(4)]
    p = jnp.stack(cols, axis=3)                # (B, 6, 6, 16, 32)
    return p.reshape(B * 36, 512)              # feature = (kh*4+kw)*32 + c


def _conv3_patches(y2, B):
    """y2:(B*36, 64) bf16 (NHWC conv2 out) -> (B, 16*576). k=3, s=1.
    Each batch row holds all 16 output positions' patches, position-major."""
    y = y2.reshape(B, 6, 6, 64)
    cols = [y[:, kh:kh + 4, kw:kw + 4, :]
            for kh in range(3) for kw in range(3)]
    p = jnp.stack(cols, axis=3)                # (B, 4, 4, 9, 64)
    return p.reshape(B, 16 * 576)              # (oh*4+ow)*576 + (kh*3+kw)*64 + c


# ---------------------------------------------------------------------------
# Parameters: torch-layout init + one-time prep into kernel-ready matrices
# ---------------------------------------------------------------------------
def init_params(key, hidden_dim, output_dim):
    """torch-like U(-1/sqrt(fan_in), 1/sqrt(fan_in)); linears stored (in, out)."""
    def unif(k, shape, fan_in):
        bound = 1.0 / jnp.sqrt(float(fan_in))
        return jax.random.uniform(k, shape, jnp.float32, -bound, bound)

    ks = jax.random.split(key, 16)
    p = {}
    p["c1_w"] = unif(ks[0], (32, 1, 8, 8), 1 * 8 * 8)
    p["c1_b"] = unif(ks[1], (32,), 1 * 8 * 8)
    p["c2_w"] = unif(ks[2], (64, 32, 4, 4), 32 * 4 * 4)
    p["c2_b"] = unif(ks[3], (64,), 32 * 4 * 4)
    p["c3_w"] = unif(ks[4], (64, 64, 3, 3), 64 * 3 * 3)
    p["c3_b"] = unif(ks[5], (64,), 64 * 3 * 3)
    p["fc_w"] = unif(ks[6], (1024, hidden_dim), 1024)
    p["fc_b"] = unif(ks[7], (hidden_dim,), 1024)
    p["val_w"] = unif(ks[8], (hidden_dim, hidden_dim), hidden_dim)
    p["val_b"] = unif(ks[9], (hidden_dim,), hidden_dim)
    p["vall_w"] = unif(ks[10], (hidden_dim, 1), hidden_dim)
    p["vall_b"] = unif(ks[11], (1,), hidden_dim)
    p["act_w"] = unif(ks[12], (hidden_dim, hidden_dim), hidden_dim)
    p["act_b"] = unif(ks[13], (hidden_dim,), hidden_dim)
    p["actl_w"] = unif(ks[14], (hidden_dim, output_dim), hidden_dim)
    p["actl_b"] = unif(ks[15], (output_dim,), hidden_dim)
    return p


def prepare_params(p):
    """One-time transform of torch-layout params into kernel-ready matrices."""
    H = p["fc_w"].shape[1]
    O = p["actl_w"].shape[1]
    f32, bf16 = jnp.float32, jnp.bfloat16

    # conv1: columns permuted into the space-to-depth patch order
    #        (block, sub_kh, sub_kw) with kh = 4*bi + sub_kh, kw = 4*bj + sub_kw.
    w1 = (p["c1_w"].reshape(32, 2, 4, 2, 4)       # (oc, bi, skh, bj, skw)
          .transpose(0, 1, 3, 2, 4)               # (oc, bi, bj, skh, skw)
          .reshape(32, 64).T)                     # (64, 32)
    # conv2: patch feature order (kh, kw, ic).
    w2 = p["c2_w"].transpose(2, 3, 1, 0).reshape(512, 64)
    # conv3 composed with fc (both linear; torch Flatten is NCHW order, which
    # is folded into the fc weight here).
    w3 = p["c3_w"].transpose(2, 3, 1, 0).reshape(576, 64)          # (kh*kw*ic, oc)
    fcp = (p["fc_w"].reshape(64, 4, 4, H)          # rows were c*16 + h*4 + w
           .transpose(1, 2, 0, 3)                  # -> (h, w, c, H)
           .reshape(16, 64, H))                    # per output position p
    wc = jnp.einsum("kc,pch->pkh", w3, fcp).reshape(16 * 576, H)
    bc = p["c3_b"] @ fcp.sum(0) + p["fc_b"]
    # heads: concat the two first-layer weights; block-diag the second layer.
    wh1 = jnp.concatenate([p["val_w"], p["act_w"]], axis=1)        # (H, 2H)
    bh1 = jnp.concatenate([p["val_b"], p["act_b"]])
    wh2 = jnp.zeros((2 * H, 1 + O), f32)
    wh2 = wh2.at[:H, :1].set(p["vall_w"]).at[H:, 1:].set(p["actl_w"])
    bh2 = jnp.concatenate([p["vall_b"], p["actl_b"]])

    return {
        "w1": w1.astype(bf16), "b1": p["c1_b"].reshape(1, 32).astype(f32),
        "w2": w2.astype(bf16), "b2": p["c2_b"].reshape(1, 64).astype(f32),
        "wc": wc.astype(bf16), "bc": bc.reshape(1, H).astype(f32),
        "wh1": wh1.astype(bf16), "bh1": bh1.reshape(1, 2 * H).astype(f32),
        "wh2": wh2.astype(bf16), "bh2": bh2.reshape(1, 1 + O).astype(f32),
    }


# ---------------------------------------------------------------------------
# Forward pass (3 pallas_calls)
# ---------------------------------------------------------------------------
@jax.jit
def actor_critic_forward(prep, state):
    B = state.shape[0]
    # conv1: Conv2d(1, 32, k=8, s=4)
    p1 = _conv1_patches(state)                                    # (B*361, 64)
    y1 = matmul_bias(p1, prep["w1"], prep["b1"], out_dtype=jnp.bfloat16)
    # conv2: Conv2d(32, 64, k=4, s=3)
    p2 = _conv2_patches(y1, B)                                    # (B*36, 512)
    y2 = matmul_bias(p2, prep["w2"], prep["b2"], out_dtype=jnp.bfloat16)
    # conv3 + Flatten + Linear(1024, H) + both heads, in one fused kernel.
    x3 = _conv3_patches(y2, B)                                    # (B, 9216)
    out = fused_tail(x3, prep["wc"], prep["bc"], prep["wh1"], prep["bh1"],
                     prep["wh2"], prep["bh2"])                    # (B, 1+O)
    return out[:, :1], out[:, 1:]


# ---------------------------------------------------------------------------
# Plain-JAX reference (f32, NCHW, straight from the torch definition)
# ---------------------------------------------------------------------------
@jax.jit
def reference_forward(p, state):
    dn = ("NCHW", "OIHW", "NCHW")
    x = lax.conv_general_dilated(state, p["c1_w"], (4, 4), "VALID",
                                 dimension_numbers=dn) + p["c1_b"].reshape(1, -1, 1, 1)
    x = lax.conv_general_dilated(x, p["c2_w"], (3, 3), "VALID",
                                 dimension_numbers=dn) + p["c2_b"].reshape(1, -1, 1, 1)
    x = lax.conv_general_dilated(x, p["c3_w"], (1, 1), "VALID",
                                 dimension_numbers=dn) + p["c3_b"].reshape(1, -1, 1, 1)
    s = x.reshape(x.shape[0], -1) @ p["fc_w"] + p["fc_b"]
    statev = jnp.maximum(s, 0.0) @ p["val_w"] + p["val_b"]
    state_value = jnp.maximum(statev, 0.0) @ p["vall_w"] + p["vall_b"]
    actionv = jnp.maximum(s, 0.0) @ p["act_w"] + p["act_b"]
    action_value = jnp.maximum(actionv, 0.0) @ p["actl_w"] + p["actl_b"]
    return state_value, action_value


if __name__ == "__main__":
    # Linear(1024, hidden) after the conv stack implies an 80x80 single-channel
    # input (80 -> 19 -> 6 -> 4 spatial, 64*4*4 = 1024).
    batch, hidden_dim, output_dim = 2, 64, 6
    key = jax.random.PRNGKey(0)
    pkey, xkey = jax.random.split(key)
    params = init_params(pkey, hidden_dim, output_dim)
    prep = prepare_params(params)
    state = jax.random.normal(xkey, (batch, 1, 80, 80), dtype=jnp.float32)

    state_value, action_value = actor_critic_forward(prep, state)
    jax.block_until_ready((state_value, action_value))

    assert state_value.shape == (batch, 1)
    assert action_value.shape == (batch, output_dim)

    # Correctness check against a straightforward f32 reference (bf16 MXU
    # operands in the Pallas path -> loose-ish tolerances).
    sv_ref, av_ref = reference_forward(params, state)
    assert bool(jnp.allclose(state_value, sv_ref, rtol=5e-2, atol=1e-2)), (
        state_value, sv_ref)
    assert bool(jnp.allclose(action_value, av_ref, rtol=5e-2, atol=1e-2)), (
        action_value, av_ref)

    print("KERNEL_OK")
</pallas_src>

<mosaic_0001>
module attributes {stable_mosaic.version = 11 : i64} {
  func.func @_matmul_bias_kernel(%arg0: i32, %arg1: memref<722x64xbf16, #tpu.memory_space<vmem>>, %arg2: memref<64x32xbf16, #tpu.memory_space<vmem>>, %arg3: memref<1x32xf32, #tpu.memory_space<vmem>>, %arg4: memref<722x32xbf16, #tpu.memory_space<vmem>>) attributes {dimension_semantics = [#tpu.dimension_semantics<parallel>], iteration_bounds = array<i64: 1>, scalar_prefetch = 0 : i64, scratch_operands = 0 : i64, tpu.core_type = #tpu.core_type<tc>, window_params = [{transform_indices = @transform_0, window_bounds = array<i64: 722, 64>}, {pipeline_mode = #tpu.pipeline_mode<synchronous>, transform_indices = @transform_1, window_bounds = array<i64: 64, 32>}, {pipeline_mode = #tpu.pipeline_mode<synchronous>, transform_indices = @transform_2, window_bounds = array<i64: 1, 32>}, {transform_indices = @transform_3, window_bounds = array<i64: 722, 32>}]} {
    %c0 = arith.constant 0 : index
    %c0_0 = arith.constant 0 : index
    %0 = vector.load %arg1[%c0, %c0_0] : memref<722x64xbf16, #tpu.memory_space<vmem>>, vector<722x64xbf16>
    %c0_1 = arith.constant 0 : index
    %c0_2 = arith.constant 0 : index
    %1 = vector.load %arg2[%c0_1, %c0_2] : memref<64x32xbf16, #tpu.memory_space<vmem>>, vector<64x32xbf16>
    %cst = arith.constant dense<0.000000e+00> : vector<722x32xf32>
    %2 = tpu.matmul %0, %1, %cst {dimension_numbers = #tpu.dot_dimension_numbers<[1], [0], [0], [1], [0, 0, 1, 1], [], []>} : vector<722x64xbf16>, vector<64x32xbf16>, vector<722x32xf32> -> vector<722x32xf32>
    %c0_3 = arith.constant 0 : index
    %c0_4 = arith.constant 0 : index
    %3 = vector.load %arg3[%c0_3, %c0_4] : memref<1x32xf32, #tpu.memory_space<vmem>>, vector<1x32xf32>
    %4 = vector.broadcast %3 : vector<1x32xf32> to vector<722x32xf32>
    %5 = arith.addf %2, %4 : vector<722x32xf32>
    %6 = arith.truncf %5 : vector<722x32xf32> to vector<722x32xbf16>
    %c0_5 = arith.constant 0 : index
    %c0_6 = arith.constant 0 : index
    %7 = vector.load %arg4[%c0_5, %c0_6] : memref<722x32xbf16, #tpu.memory_space<vmem>>, vector<722x32xbf16>
    tpu.vector_store %arg4[%c0_5, %c0_6], %6 {strides = array<i32>} : memref<722x32xbf16, #tpu.memory_space<vmem>>, vector<722x32xbf16>,
    return
  }
  func.func @transform_0(%arg0: i32) -> (i32, i32) {
    %c0_i32 = arith.constant 0 : i32
    %c0_i32_0 = arith.constant 0 : i32
    return %arg0, %c0_i32 : i32, i32
  }
  func.func @transform_1(%arg0: i32) -> (i32, i32) {
    %c0_i32 = arith.constant 0 : i32
    %c0_i32_0 = arith.constant 0 : i32
    %c0_i32_1 = arith.constant 0 : i32
    return %c0_i32, %c0_i32_0 : i32, i32
  }
  func.func @transform_2(%arg0: i32) -> (i32, i32) {
    %c0_i32 = arith.constant 0 : i32
    %c0_i32_0 = arith.constant 0 : i32
    %c0_i32_1 = arith.constant 0 : i32
    return %c0_i32, %c0_i32_0 : i32, i32
  }
  func.func @transform_3(%arg0: i32) -> (i32, i32) {
    %c0_i32 = arith.constant 0 : i32
    %c0_i32_0 = arith.constant 0 : i32
    return %arg0, %c0_i32 : i32, i32
  }
}

module attributes {stable_mosaic.version = 11 : i64} {
  func.func @_matmul_bias_kernel(%arg0: i32, %arg1: memref<72x512xbf16, #tpu.memory_space<vmem>>, %arg2: memref<512x64xbf16, #tpu.memory_space<vmem>>, %arg3: memref<1x64xf32, #tpu.memory_space<vmem>>, %arg4: memref<72x64xbf16, #tpu.memory_space<vmem>>) attributes {dimension_semantics = [#tpu.dimension_semantics<parallel>], iteration_bounds = array<i64: 1>, scalar_prefetch = 0 : i64, scratch_operands = 0 : i64, tpu.core_type = #tpu.core_type<tc>, window_params = [{transform_indices = @transform_0, window_bounds = array<i64: 72, 512>}, {pipeline_mode = #tpu.pipeline_mode<synchronous>, transform_indices = @transform_1, window_bounds = array<i64: 512, 64>}, {pipeline_mode = #tpu.pipeline_mode<synchronous>, transform_indices = @transform_2, window_bounds = array<i64: 1, 64>}, {transform_indices = @transform_3, window_bounds = array<i64: 72, 64>}]} {
    %c0 = arith.constant 0 : index
    %c0_0 = arith.constant 0 : index
    %0 = vector.load %arg1[%c0, %c0_0] : memref<72x512xbf16, #tpu.memory_space<vmem>>, vector<72x512xbf16>
    %c0_1 = arith.constant 0 : index
    %c0_2 = arith.constant 0 : index
    %1 = vector.load %arg2[%c0_1, %c0_2] : memref<512x64xbf16, #tpu.memory_space<vmem>>, vector<512x64xbf16>
    %cst = arith.constant dense<0.000000e+00> : vector<72x64xf32>
    %2 = tpu.matmul %0, %1, %cst {dimension_numbers = #tpu.dot_dimension_numbers<[1], [0], [0], [1], [0, 0, 1, 1], [], []>} : vector<72x512xbf16>, vector<512x64xbf16>, vector<72x64xf32> -> vector<72x64xf32>
    %c0_3 = arith.constant 0 : index
    %c0_4 = arith.constant 0 : index
    %3 = vector.load %arg3[%c0_3, %c0_4] : memref<1x64xf32, #tpu.memory_space<vmem>>, vector<1x64xf32>
    %4 = vector.broadcast %3 : vector<1x64xf32> to vector<72x64xf32>
    %5 = arith.addf %2, %4 : vector<72x64xf32>
    %6 = arith.truncf %5 : vector<72x64xf32> to vector<72x64xbf16>
    %c0_5 = arith.constant 0 : index
    %c0_6 = arith.constant 0 : index
    %7 = vector.load %arg4[%c0_5, %c0_6] : memref<72x64xbf16, #tpu.memory_space<vmem>>, vector<72x64xbf16>
    tpu.vector_store %arg4[%c0_5, %c0_6], %6 {strides = array<i32>} : memref<72x64xbf16, #tpu.memory_space<vmem>>, vector<72x64xbf16>,
    return
  }
  func.func @transform_0(%arg0: i32) -> (i32, i32) {
    %c0_i32 = arith.constant 0 : i32
    %c0_i32_0 = arith.constant 0 : i32
    return %arg0, %c0_i32 : i32, i32
  }
  func.func @transform_1(%arg0: i32) -> (i32, i32) {
    %c0_i32 = arith.constant 0 : i32
    %c0_i32_0 = arith.constant 0 : i32
    %c0_i32_1 = arith.constant 0 : i32
    return %c0_i32, %c0_i32_0 : i32, i32
  }
  func.func @transform_2(%arg0: i32) -> (i32, i32) {
    %c0_i32 = arith.constant 0 : i32
    %c0_i32_0 = arith.constant 0 : i32
    %c0_i32_1 = arith.constant 0 : i32
    return %c0_i32, %c0_i32_0 : i32, i32
  }
  func.func @transform_3(%arg0: i32) -> (i32, i32) {
    %c0_i32 = arith.constant 0 : i32
    %c0_i32_0 = arith.constant 0 : i32
    return %arg0, %c0_i32 : i32, i32
  }
}

module attributes {stable_mosaic.version = 11 : i64} {
  func.func @_tail_kernel(%arg0: i32, %arg1: memref<2x9216xbf16, #tpu.memory_space<vmem>>, %arg2: memref<9216x64xbf16, #tpu.memory_space<vmem>>, %arg3: memref<1x64xf32, #tpu.memory_space<vmem>>, %arg4: memref<64x128xbf16, #tpu.memory_space<vmem>>, %arg5: memref<1x128xf32, #tpu.memory_space<vmem>>, %arg6: memref<128x7xbf16, #tpu.memory_space<vmem>>, %arg7: memref<1x7xf32, #tpu.memory_space<vmem>>, %arg8: memref<2x7xf32, #tpu.memory_space<vmem>>) attributes {dimension_semantics = [#tpu.dimension_semantics<parallel>], iteration_bounds = array<i64: 1>, scalar_prefetch = 0 : i64, scratch_operands = 0 : i64, tpu.core_type = #tpu.core_type<tc>, window_params = [{transform_indices = @transform_0, window_bounds = array<i64: 2, 9216>}, {pipeline_mode = #tpu.pipeline_mode<synchronous>, transform_indices = @transform_1, window_bounds = array<i64: 9216, 64>}, {pipeline_mode = #tpu.pipeline_mode<synchronous>, transform_indices = @transform_2, window_bounds = array<i64: 1, 64>}, {pipeline_mode = #tpu.pipeline_mode<synchronous>, transform_indices = @transform_3, window_bounds = array<i64: 64, 128>}, {pipeline_mode = #tpu.pipeline_mode<synchronous>, transform_indices = @transform_4, window_bounds = array<i64: 1, 128>}, {pipeline_mode = #tpu.pipeline_mode<synchronous>, transform_indices = @transform_5, window_bounds = array<i64: 128, 7>}, {pipeline_mode = #tpu.pipeline_mode<synchronous>, transform_indices = @transform_6, window_bounds = array<i64: 1, 7>}, {transform_indices = @transform_7, window_bounds = array<i64: 2, 7>}]} {
    %c0 = arith.constant 0 : index
    %c0_0 = arith.constant 0 : index
    %0 = vector.load %arg1[%c0, %c0_0] : memref<2x9216xbf16, #tpu.memory_space<vmem>>, vector<2x9216xbf16>
    %c0_1 = arith.constant 0 : index
    %c0_2 = arith.constant 0 : index
    %1 = vector.load %arg2[%c0_1, %c0_2] : memref<9216x64xbf16, #tpu.memory_space<vmem>>, vector<9216x64xbf16>
    %cst = arith.constant dense<0.000000e+00> : vector<2x64xf32>
    %2 = tpu.matmul %0, %1, %cst {dimension_numbers = #tpu.dot_dimension_numbers<[1], [0], [0], [1], [0, 0, 1, 1], [], []>} : vector<2x9216xbf16>, vector<9216x64xbf16>, vector<2x64xf32> -> vector<2x64xf32>
    %c0_3 = arith.constant 0 : index
    %c0_4 = arith.constant 0 : index
    %3 = vector.load %arg3[%c0_3, %c0_4] : memref<1x64xf32, #tpu.memory_space<vmem>>, vector<1x64xf32>
    %4 = vector.broadcast %3 : vector<1x64xf32> to vector<2x64xf32>
    %5 = arith.addf %2, %4 : vector<2x64xf32>
    %cst_5 = arith.constant 0.000000e+00 : f32
    %6 = vector.broadcast %cst_5 : f32 to vector<2x64xf32>
    %7 = arith.maximumf %5, %6 : vector<2x64xf32>
    %8 = arith.truncf %7 : vector<2x64xf32> to vector<2x64xbf16>
    %c0_6 = arith.constant 0 : index
    %c0_7 = arith.constant 0 : index
    %9 = vector.load %arg4[%c0_6, %c0_7] : memref<64x128xbf16, #tpu.memory_space<vmem>>, vector<64x128xbf16>
    %cst_8 = arith.constant dense<0.000000e+00> : vector<2x128xf32>
    %10 = tpu.matmul %8, %9, %cst_8 {dimension_numbers = #tpu.dot_dimension_numbers<[1], [0], [0], [1], [0, 0, 1, 1], [], []>} : vector<2x64xbf16>, vector<64x128xbf16>, vector<2x128xf32> -> vector<2x128xf32>
    %c0_9 = arith.constant 0 : index
    %c0_10 = arith.constant 0 : index
    %11 = vector.load %arg5[%c0_9, %c0_10] : memref<1x128xf32, #tpu.memory_space<vmem>>, vector<1x128xf32>
    %12 = vector.broadcast %11 : vector<1x128xf32> to vector<2x128xf32>
    %13 = arith.addf %10, %12 : vector<2x128xf32>
    %cst_11 = arith.constant 0.000000e+00 : f32
    %14 = vector.broadcast %cst_11 : f32 to vector<2x128xf32>
    %15 = arith.maximumf %13, %14 : vector<2x128xf32>
    %16 = arith.truncf %15 : vector<2x128xf32> to vector<2x128xbf16>
    %c0_12 = arith.constant 0 : index
    %c0_13 = arith.constant 0 : index
    %17 = vector.load %arg6[%c0_12, %c0_13] : memref<128x7xbf16, #tpu.memory_space<vmem>>, vector<128x7xbf16>
    %cst_14 = arith.constant dense<0.000000e+00> : vector<2x7xf32>
    %18 = tpu.matmul %16, %17, %cst_14 {dimension_numbers = #tpu.dot_dimension_numbers<[1], [0], [0], [1], [0, 0, 1, 1], [], []>} : vector<2x128xbf16>, vector<128x7xbf16>, vector<2x7xf32> -> vector<2x7xf32>
    %c0_15 = arith.constant 0 : index
    %c0_16 = arith.constant 0 : index
    %19 = vector.load %arg7[%c0_15, %c0_16] : memref<1x7xf32, #tpu.memory_space<vmem>>, vector<1x7xf32>
    %20 = vector.broadcast %19 : vector<1x7xf32> to vector<2x7xf32>
    %21 = arith.addf %18, %20 : vector<2x7xf32>
    %c0_17 = arith.constant 0 : index
    %c0_18 = arith.constant 0 : index
    %22 = vector.load %arg8[%c0_17, %c0_18] : memref<2x7xf32, #tpu.memory_space<vmem>>, vector<2x7xf32>
    tpu.vector_store %arg8[%c0_17, %c0_18], %21 {strides = array<i32>} : memref<2x7xf32, #tpu.memory_space<vmem>>, vector<2x7xf32>,
    return
  }
  func.func @transform_0(%arg0: i32) -> (i32, i32) {
    %c0_i32 = arith.constant 0 : i32
    %c0_i32_0 = arith.constant 0 : i32
    return %arg0, %c0_i32 : i32, i32
  }
  func.func @transform_1(%arg0: i32) -> (i32, i32) {
    %c0_i32 = arith.constant 0 : i32
    %c0_i32_0 = arith.constant 0 : i32
    %c0_i32_1 = arith.constant 0 : i32
    return %c0_i32, %c0_i32_0 : i32, i32
  }
  func.func @transform_2(%arg0: i32) -> (i32, i32) {
    %c0_i32 = arith.constant 0 : i32
    %c0_i32_0 = arith.constant 0 : i32
    %c0_i32_1 = arith.constant 0 : i32
    return %c0_i32, %c0_i32_0 : i32, i32
  }
  func.func @transform_3(%arg0: i32) -> (i32, i32) {
    %c0_i32 = arith.constant 0 : i32
    %c0_i32_0 = arith.constant 0 : i32
    %c0_i32_1 = arith.constant 0 : i32
    return %c0_i32, %c0_i32_0 : i32, i32
  }
  func.func @transform_4(%arg0: i32) -> (i32, i32) {
    %c0_i32 = arith.constant 0 : i32
    %c0_i32_0 = arith.constant 0 : i32
    %c0_i32_1 = arith.constant 0 : i32
    return %c0_i32, %c0_i32_0 : i32, i32
  }
  func.func @transform_5(%arg0: i32) -> (i32, i32) {
    %c0_i32 = arith.constant 0 : i32
    %c0_i32_0 = arith.constant 0 : i32
    %c0_i32_1 = arith.constant 0 : i32
    return %c0_i32, %c0_i32_0 : i32, i32
  }
  func.func @transform_6(%arg0: i32) -> (i32, i32) {
    %c0_i32 = arith.constant 0 : i32
    %c0_i32_0 = arith.constant 0 : i32
    %c0_i32_1 = arith.constant 0 : i32
    return %c0_i32, %c0_i32_0 : i32, i32
  }
  func.func @transform_7(%arg0: i32) -> (i32, i32) {
    %c0_i32 = arith.constant 0 : i32
    %c0_i32_0 = arith.constant 0 : i32
    return %arg0, %c0_i32 : i32, i32
  }
}

</mosaic_0001>

<bundles_post_ra>
// kernel: actor_critic_forward.3
= control target key start
LH: loop header
LB: loop body
LE: loop exit
PB: predicated region body
PF: predicated region fallthrough
CT: control target
= control target key end

     0   :  { %vm373_vm0 = vcmask 523264   ;;  %vm1277_vm1 = vcmask 257024   ;;  %vm1368_vm2 = vcmask 253952   ;;  %s2536_s1 = inlined_call_operand.vmem [shape: bf16[64,32], index: 1, kind: input, shape index: {}]   ;;  %s2537_s0 = inlined_call_operand.vmem [shape: bf16[722,64], index: 0, kind: input, shape index: {}]   ;;  %s2538_s2 = inlined_call_operand.vmem [shape: f32[1,32], index: 2, kind: input, shape index: {}]   ;;  %s2539_s3 = inlined_call_operand.vmem [shape: bf16[722,32], index: 3, kind: output, shape index: {}]  }
   0x1   :  { %v1811_v0 = vld [vmem:[%s2536_s1] sm:$0xff]   ;;  %v1812_v1 = vld [vmem:[%s2536_s1 + $0x8] sm:$0xff]   ;;  %v1813_v2 = vld [vmem:[%s2536_s1 + $0x10] sm:$0xff]  }
   0x2   :  { %1703 = vmatprep.subr.bf16.mxu0 %v1811_v0  ;;  %1803 = vmatprep.subr.bf16.mxu1 %v1811_v0  ;;  %v1815_v3 = vld [vmem:[%s2537_s0] sm:$0xff]   ;;  %v1814_v5 = vld [vmem:[%s2536_s1 + $0x18] sm:$0xff]   ;;  %v1816_v6 = vld [vmem:[%s2537_s0 + $0x8] sm:$0xff]  }
   0x3   :  { %1704 = vmatpush3.bf16.msra.mxu0 %v1811_v0  ;;  %1807 = vmatpush3.bf16.msra.mxu1 %v1811_v0  ;;  %v1817_v4 = vld [vmem:[%s2537_s0 + $0xc0] sm:$0xff]   ;;  %v1818_v7 = vld [vmem:[%s2537_s0 + $0xc8] sm:$0xff]   ;;  %v1819_v8 = vld [vmem:[%s2537_s0 + $0x10] sm:$0xff]  }
   0x4   :  { %1705 = vmatprep.subr.bf16.mxu0 %v1812_v1  ;;  %1804 = vmatprep.subr.bf16.mxu1 %v1812_v1  ;;  %v1821_v9 = vld [vmem:[%s2537_s0 + $0xd0] sm:$0xff]   ;;  %v1820_v10 = vld [vmem:[%s2537_s0 + $0x18] sm:$0xff]   ;;  %v1823_v12 = vld [vmem:[%s2537_s0 + $0x20] sm:$0xff]  }
   0x5   :  { %1711 = vmatprep.mubr.msk.bf16.mxu0 %vm373_vm0, %v1815_v3  ;;  %1759 = vmatprep.mubr.msk.bf16.mxu1 %vm373_vm0, %v1817_v4  ;;  %v1822_v11 = vld [vmem:[%s2537_s0 + $0xd8] sm:$0xff]   ;;  %v1825_v13 = vld [vmem:[%s2537_s0 + $0xe0] sm:$0xff]   ;;  %v1824_v14 = vld [vmem:[%s2537_s0 + $0x28] sm:$0xff]  }
   0x6   :  { %v1826_v15 = vld [vmem:[%s2537_s0 + $0xe8] sm:$0xff]   ;;  %v1827_v16 = vld [vmem:[%s2537_s0 + $0x30] sm:$0xff]   ;;  %v1828_v18 = vld [vmem:[%s2537_s0 + $0x38] sm:$0xff]  }
   0x7   :  { %1706 = vmatpush3.bf16.msra.mxu0 %v1812_v1  ;;  %1808 = vmatpush3.bf16.msra.mxu1 %v1812_v1  ;;  %v1829_v17 = vld [vmem:[%s2537_s0 + $0xf0] sm:$0xff]   ;;  %v1830_v19 = vld [vmem:[%s2537_s0 + $0xf8] sm:$0xff]   ;;  %v1831_v20 = vld [vmem:[%s2537_s0 + $0x40] sm:$0xff]  }
   0x8   :  { %1707 = vmatprep.subr.bf16.mxu0 %v1813_v2  ;;  %1805 = vmatprep.subr.bf16.mxu1 %v1813_v2  ;;  %v1833_v21 = vld [vmem:[%s2537_s0 + $0x100] sm:$0xff]   ;;  %v1832_v22 = vld [vmem:[%s2537_s0 + $0x48] sm:$0xff]   ;;  %v1835_v24 = vld [vmem:[%s2537_s0 + $0x50] sm:$0xff]  }
   0x9   :  { %v1834_v23 = vld [vmem:[%s2537_s0 + $0x108] sm:$0xff]   ;;  %v1837_v25 = vld [vmem:[%s2537_s0 + $0x110] sm:$0xff]   ;;  %v1836_v26 = vld [vmem:[%s2537_s0 + $0x58] sm:$0xff]  }
   0xa   :  { %v1838_v27 = vld [vmem:[%s2537_s0 + $0x118] sm:$0xff]   ;;  %v1839_v28 = vld [vmem:[%s2537_s0 + $0x60] sm:$0xff]   ;;  %v1840_v30 = vld [vmem:[%s2537_s0 + $0x68] sm:$0xff]  }
   0xb   :  { %1708 = vmatpush3.bf16.msra.mxu0 %v1813_v2  ;;  %1809 = vmatpush3.bf16.msra.mxu1 %v1813_v2  ;;  %v1841_v29 = vld [vmem:[%s2537_s0 + $0x120] sm:$0xff]   ;;  %v1842_v31 = vld [vmem:[%s2537_s0 + $0x128] sm:$0xff]   ;;  %v1843_v32 = vld [vmem:[%s2537_s0 + $0x70] sm:$0xff]  }
   0xc   :  { %1709 = vmatprep.subr.bf16.mxu0 %v1814_v5  ;;  %1806 = vmatprep.subr.bf16.mxu1 %v1814_v5  ;;  %v1845_v33 = vld [vmem:[%s2537_s0 + $0x130] sm:$0xff]   ;;  %v1844_v34 = vld [vmem:[%s2537_s0 + $0x78] sm:$0xff]   ;;  %v1847_v36 = vld [vmem:[%s2537_s0 + $0x80] sm:$0xff]  }
   0xd   :  { %v1846_v35 = vld [vmem:[%s2537_s0 + $0x138] sm:$0xff]   ;;  %v1849_v37 = vld [vmem:[%s2537_s0 + $0x140] sm:$0xff]   ;;  %v1848_v38 = vld [vmem:[%s2537_s0 + $0x88] sm:$0xff]  }
   0xe   :  { %v1850_v39 = vld [vmem:[%s2537_s0 + $0x148] sm:$0xff]   ;;  %v1851_v40 = vld [vmem:[%s2537_s0 + $0x90] sm:$0xff]   ;;  %v1852_v42 = vld [vmem:[%s2537_s0 + $0x98] sm:$0xff]  }
   0xf   :  { %1710 = vmatpush3.bf16.msra.mxu0 %v1814_v5  ;;  %1810 = vmatpush3.bf16.msra.mxu1 %v1814_v5  ;;  %v1853_v41 = vld [vmem:[%s2537_s0 + $0x150] sm:$0xff]   ;;  %v1854_v43 = vld [vmem:[%s2537_s0 + $0x158] sm:$0xff]   ;;  %v1855_v44 = vld [vmem:[%s2537_s0 + $0xa0] sm:$0xff]  }
  0x10   :  { %v1857_v45 = vld [vmem:[%s2537_s0 + $0x160] sm:$0xff]   ;;  %v1856_v46 = vld [vmem:[%s2537_s0 + $0xa8] sm:$0xff]   ;;  %v1859_v48 = vld [vmem:[%s2537_s0 + $0xb0] sm:$0xff]  }
  0x11   :  { %v1858_v47 = vld [vmem:[%s2537_s0 + $0x168] ss:$0 sps:$4 sm:$0x11]   ;;  %v1860_v49 = vld [vmem:[%s2537_s0 + $0xb8] sm:$0xff]   ;;  %v2080_v50 = vld [vmem:[%s2538_s2] ss:$0 sm:$0xff] }
  0x12   :  { %1712 = vmatmul.mubr.msk.bf16.vlgmr.msra.gmra.mrb[0].mxu0 %vm373_vm0, %v1816_v6  ;;  %1760 = vmatmul.mubr.msk.bf16.vlgmr.msra.gmra.mrb[0].mxu1 %vm373_vm0, %v1818_v7 }
  0x13   :  { %1715 = vmatprep.mubr.msk.bf16.mxu0 %vm373_vm0, %v1819_v8  ;;  %1763 = vmatprep.mubr.msk.bf16.mxu1 %vm373_vm0, %v1821_v9 }
  0x1a   :  { %1716 = vmatmul.mubr.msk.bf16.gmra.mrb[4].mxu0 %vm373_vm0, %v1820_v10  ;;  %1764 = vmatmul.mubr.msk.bf16.gmra.mrb[4].mxu1 %vm373_vm0, %v1822_v11 }
  0x1b   :  { %1719 = vmatprep.mubr.msk.bf16.mxu0 %vm373_vm0, %v1823_v12  ;;  %1767 = vmatprep.mubr.msk.bf16.mxu1 %vm373_vm0, %v1825_v13 }
  0x22   :  { %1720 = vmatmul.mubr.msk.bf16.gmra.mrb[8].mxu0 %vm373_vm0, %v1824_v14  ;;  %1768 = vmatmul.mubr.msk.bf16.gmra.mrb[8].mxu1 %vm373_vm0, %v1826_v15 }
  0x23   :  { %1723 = vmatprep.mubr.msk.bf16.mxu0 %vm373_vm0, %v1827_v16  ;;  %1771 = vmatprep.mubr.msk.bf16.mxu1 %vm373_vm0, %v1829_v17 }
  0x2a   :  { %1724 = vmatmul.mubr.msk.bf16.gmra.mrb[12].mxu0 %vm373_vm0, %v1828_v18  ;;  %1772 = vmatmul.mubr.msk.bf16.gmra.mrb[12].mxu1 %vm373_vm0, %v1830_v19 }
  0x2b   :  { %1727 = vmatprep.mubr.msk.bf16.mxu0 %vm373_vm0, %v1831_v20  ;;  %1775 = vmatprep.mubr.msk.bf16.mxu1 %vm373_vm0, %v1833_v21 }
  0x32   :  { %1728 = vmatmul.mubr.msk.bf16.gmra.mrb[16].mxu0 %vm373_vm0, %v1832_v22  ;;  %1776 = vmatmul.mubr.msk.bf16.gmra.mrb[16].mxu1 %vm373_vm0, %v1834_v23 }
  0x33   :  { %1731 = vmatprep.mubr.msk.bf16.mxu0 %vm373_vm0, %v1835_v24  ;;  %1779 = vmatprep.mubr.msk.bf16.mxu1 %vm373_vm0, %v1837_v25 }
  0x3a   :  { %1732 = vmatmul.mubr.msk.bf16.gmra.mrb[20].mxu0 %vm373_vm0, %v1836_v26  ;;  %1780 = vmatmul.mubr.msk.bf16.gmra.mrb[20].mxu1 %vm373_vm0, %v1838_v27 }
  0x3b   :  { %1735 = vmatprep.mubr.msk.bf16.mxu0 %vm373_vm0, %v1839_v28  ;;  %1783 = vmatprep.mubr.msk.bf16.mxu1 %vm373_vm0, %v1841_v29 }
  0x42   :  { %1736 = vmatmul.mubr.msk.bf16.gmra.mrb[24].mxu0 %vm373_vm0, %v1840_v30  ;;  %1784 = vmatmul.mubr.msk.bf16.gmra.mrb[24].mxu1 %vm373_vm0, %v1842_v31 }
  0x43   :  { %1739 = vmatprep.mubr.msk.bf16.mxu0 %vm373_vm0, %v1843_v32  ;;  %1787 = vmatprep.mubr.msk.bf16.mxu1 %vm373_vm0, %v1845_v33 }
  0x4a   :  { %1740 = vmatmul.mubr.msk.bf16.gmra.mrb[28].mxu0 %vm373_vm0, %v1844_v34  ;;  %1788 = vmatmul.mubr.msk.bf16.gmra.mrb[28].mxu1 %vm373_vm0, %v1846_v35 }
  0x4b   :  { %1743 = vmatprep.mubr.msk.bf16.mxu0 %vm373_vm0, %v1847_v36  ;;  %1791 = vmatprep.mubr.msk.bf16.mxu1 %vm373_vm0, %v1849_v37 }
  0x52   :  { %1744 = vmatmul.mubr.msk.bf16.gmra.mrb[32].mxu0 %vm373_vm0, %v1848_v38  ;;  %1792 = vmatmul.mubr.msk.bf16.gmra.mrb[32].mxu1 %vm373_vm0, %v1850_v39 }
  0x53   :  { %1747 = vmatprep.mubr.msk.bf16.mxu0 %vm373_vm0, %v1851_v40  ;;  %1795 = vmatprep.mubr.msk.bf16.mxu1 %vm373_vm0, %v1853_v41 }
  0x5a   :  { %1748 = vmatmul.mubr.msk.bf16.gmra.mrb[36].mxu0 %vm373_vm0, %v1852_v42  ;;  %1796 = vmatmul.mubr.msk.bf16.gmra.mrb[36].mxu1 %vm373_vm0, %v1854_v43 }
  0x5b   :  { %1751 = vmatprep.mubr.msk.bf16.mxu0 %vm373_vm0, %v1855_v44  ;;  %1799 = vmatprep.mubr.msk.bf16.mxu1 %vm373_vm0, %v1857_v45 }
  0x62   :  { %1752 = vmatmul.mubr.msk.bf16.gmra.mrb[40].mxu0 %vm373_vm0, %v1856_v46  ;;  %1800 = vmatmul.mubr.msk.bf16.gmra.mrb[40].mxu1 %vm373_vm0, %v1858_v47 }
  0x63   :  { %1755 = vmatprep.mubr.msk.bf16.mxu0 %vm373_vm0, %v1859_v48 }
  0x6a   :  { %1756 = vmatmul.mubr.msk.bf16.gmra.mrb[44].mxu0 %vm373_vm0, %v1860_v49 }
  0xe5   :  { %v1713_v51 = vpop.f32.mrb[0].mxu0  ;;  %v1761_v52 = vpop.f32.mrb[0].mxu1 }
  0xe6   :  { %v555_v53 = vadd.f32 %v1713_v51, %v2080_v50  ;;  %v546_v54 = vpop.f32.mrb[1].mxu0  ;;  %v747_v55 = vadd.f32 %v1761_v52, %v2080_v50  ;;  %v738_v56 = vpop.f32.mrb[1].mxu1 }
  0xe7   :  { %v547_v57 = vadd.f32 %v2080_v50, %v546_v54  ;;  %v1714_v58 = vpop.f32.mrb[2].mxu0  ;;  %v739_v59 = vadd.f32 %v2080_v50, %v738_v56  ;;  %v1762_v60 = vpop.f32.mrb[2].mxu1 }
  0xe8   :  { %v1564_v61 = vpack.c.bf16 %v555_v53, %v555_v53  ;;  %v558_v62 = vadd.f32 %v1714_v58, %v2080_v50  ;;  %v549_v63 = vpop.f32.mrb[3].mxu0  ;;  %v1612_v0 = vpack.c.bf16 %v747_v55, %v747_v55  ;;  %v750_v1 = vadd.f32 %v1762_v60, %v2080_v50  ;;  %v741_v2 = vpop.f32.mrb[3].mxu1 }
  0xe9   :  { %v1562_v3 = vpack.c.bf16 %v547_v57, %v547_v57  ;;  %v550_v4 = vadd.f32 %v2080_v50, %v549_v63  ;;  %v1610_v5 = vpack.c.bf16 %v739_v59, %v739_v59  ;;  %v742_v6 = vadd.f32 %v2080_v50, %v741_v2 }
  0xea   :  { %1280 = vst.msk [vmem:[%s2539_s3 + $0x8] sm:$0xf] %vm1277_vm1, %v1564_v61  ;;  %v1565_v7 = vpack.c.bf16 %v558_v62, %v558_v62  ;;  %1328 = vst.msk [vmem:[%s2539_s3 + $0xc8] sm:$0xf] %vm1277_vm1, %v1612_v0  ;;  %v1613_v8 = vpack.c.bf16 %v750_v1, %v750_v1 }
  0xeb   :  { %1278 = vst.msk [vmem:[%s2539_s3] sm:$0xf] %vm1277_vm1, %v1562_v3  ;;  %v1563_v9 = vpack.c.bf16 %v550_v4, %v550_v4  ;;  %1326 = vst.msk [vmem:[%s2539_s3 + $0xc0] sm:$0xf] %vm1277_vm1, %v1610_v5  ;;  %v1611_v10 = vpack.c.bf16 %v742_v6, %v742_v6 }
  0xec   :  { %1281 = vst.msk [vmem:[%s2539_s3 + $0xc] sm:$0xf] %vm1277_vm1, %v1565_v7  ;;  %1329 = vst.msk [vmem:[%s2539_s3 + $0xcc] sm:$0xf] %vm1277_vm1, %v1613_v8 }
  0xed   :  { %1279 = vst.msk [vmem:[%s2539_s3 + $0x4] sm:$0xf] %vm1277_vm1, %v1563_v9  ;;  %v1717_v11 = vpop.f32.mrb[4].mxu0  ;;  %1327 = vst.msk [vmem:[%s2539_s3 + $0xc4] sm:$0xf] %vm1277_vm1, %v1611_v10  ;;  %v1765_v12 = vpop.f32.mrb[4].mxu1 }
  0xee   :  { %v571_v13 = vadd.f32 %v1717_v11, %v2080_v50  ;;  %v562_v14 = vpop.f32.mrb[5].mxu0  ;;  %v763_v15 = vadd.f32 %v1765_v12, %v2080_v50  ;;  %v754_v16 = vpop.f32.mrb[5].mxu1 }
  0xef   :  { %v563_v17 = vadd.f32 %v2080_v50, %v562_v14  ;;  %v1718_v18 = vpop.f32.mrb[6].mxu0  ;;  %v755_v19 = vadd.f32 %v2080_v50, %v754_v16  ;;  %v1766_v20 = vpop.f32.mrb[6].mxu1 }
  0xf0   :  { %v1568_v21 = vpack.c.bf16 %v571_v13, %v571_v13  ;;  %v574_v22 = vadd.f32 %v1718_v18, %v2080_v50  ;;  %v565_v23 = vpop.f32.mrb[7].mxu0  ;;  %v1616_v24 = vpack.c.bf16 %v763_v15, %v763_v15  ;;  %v766_v25 = vadd.f32 %v1766_v20, %v2080_v50  ;;  %v757_v26 = vpop.f32.mrb[7].mxu1 }
  0xf1   :  { %v1566_v27 = vpack.c.bf16 %v563_v17, %v563_v17  ;;  %v566_v28 = vadd.f32 %v2080_v50, %v565_v23  ;;  %v1614_v29 = vpack.c.bf16 %v755_v19, %v755_v19  ;;  %v758_v30 = vadd.f32 %v2080_v50, %v757_v26 }
  0xf2   :  { %1284 = vst.msk [vmem:[%s2539_s3 + $0x18] sm:$0xf] %vm1277_vm1, %v1568_v21  ;;  %v1569_v31 = vpack.c.bf16 %v574_v22, %v574_v22  ;;  %1332 = vst.msk [vmem:[%s2539_s3 + $0xd8] sm:$0xf] %vm1277_vm1, %v1616_v24  ;;  %v1617_v32 = vpack.c.bf16 %v766_v25, %v766_v25 }
  0xf3   :  { %1282 = vst.msk [vmem:[%s2539_s3 + $0x10] sm:$0xf] %vm1277_vm1, %v1566_v27  ;;  %v1567_v33 = vpack.c.bf16 %v566_v28, %v566_v28  ;;  %1330 = vst.msk [vmem:[%s2539_s3 + $0xd0] sm:$0xf] %vm1277_vm1, %v1614_v29  ;;  %v1615_v34 = vpack.c.bf16 %v758_v30, %v758_v30 }
  0xf4   :  { %1285 = vst.msk [vmem:[%s2539_s3 + $0x1c] sm:$0xf] %vm1277_vm1, %v1569_v31  ;;  %1333 = vst.msk [vmem:[%s2539_s3 + $0xdc] sm:$0xf] %vm1277_vm1, %v1617_v32 }
  0xf5   :  { %1283 = vst.msk [vmem:[%s2539_s3 + $0x14] sm:$0xf] %vm1277_vm1, %v1567_v33  ;;  %v1721_v35 = vpop.f32.mrb[8].mxu0  ;;  %1331 = vst.msk [vmem:[%s2539_s3 + $0xd4] sm:$0xf] %vm1277_vm1, %v1615_v34  ;;  %v1769_v36 = vpop.f32.mrb[8].mxu1 }
  0xf6   :  { %v587_v37 = vadd.f32 %v1721_v35, %v2080_v50  ;;  %v578_v38 = vpop.f32.mrb[9].mxu0  ;;  %v779_v39 = vadd.f32 %v1769_v36, %v2080_v50  ;;  %v770_v40 = vpop.f32.mrb[9].mxu1 }
  0xf7   :  { %v579_v41 = vadd.f32 %v2080_v50, %v578_v38  ;;  %v1722_v42 = vpop.f32.mrb[10].mxu0  ;;  %v771_v43 = vadd.f32 %v2080_v50, %v770_v40  ;;  %v1770_v44 = vpop.f32.mrb[10].mxu1 }
  0xf8   :  { %v1572_v45 = vpack.c.bf16 %v587_v37, %v587_v37  ;;  %v590_v46 = vadd.f32 %v1722_v42, %v2080_v50  ;;  %v581_v47 = vpop.f32.mrb[11].mxu0  ;;  %v1620_v48 = vpack.c.bf16 %v779_v39, %v779_v39  ;;  %v782_v49 = vadd.f32 %v1770_v44, %v2080_v50  ;;  %v773_v51 = vpop.f32.mrb[11].mxu1 }
  0xf9   :  { %v1570_v52 = vpack.c.bf16 %v579_v41, %v579_v41  ;;  %v582_v53 = vadd.f32 %v2080_v50, %v581_v47  ;;  %v1618_v54 = vpack.c.bf16 %v771_v43, %v771_v43  ;;  %v774_v55 = vadd.f32 %v2080_v50, %v773_v51 }
  0xfa   :  { %1288 = vst.msk [vmem:[%s2539_s3 + $0x28] sm:$0xf] %vm1277_vm1, %v1572_v45  ;;  %v1573_v56 = vpack.c.bf16 %v590_v46, %v590_v46  ;;  %1336 = vst.msk [vmem:[%s2539_s3 + $0xe8] sm:$0xf] %vm1277_vm1, %v1620_v48  ;;  %v1621_v57 = vpack.c.bf16 %v782_v49, %v782_v49 }
  0xfb   :  { %1286 = vst.msk [vmem:[%s2539_s3 + $0x20] sm:$0xf] %vm1277_vm1, %v1570_v52  ;;  %v1571_v58 = vpack.c.bf16 %v582_v53, %v582_v53  ;;  %1334 = vst.msk [vmem:[%s2539_s3 + $0xe0] sm:$0xf] %vm1277_vm1, %v1618_v54  ;;  %v1619_v59 = vpack.c.bf16 %v774_v55, %v774_v55 }
  0xfc   :  { %1289 = vst.msk [vmem:[%s2539_s3 + $0x2c] sm:$0xf] %vm1277_vm1, %v1573_v56  ;;  %1337 = vst.msk [vmem:[%s2539_s3 + $0xec] sm:$0xf] %vm1277_vm1, %v1621_v57 }
  0xfd   :  { %1287 = vst.msk [vmem:[%s2539_s3 + $0x24] sm:$0xf] %vm1277_vm1, %v1571_v58  ;;  %v1725_v60 = vpop.f32.mrb[12].mxu0  ;;  %1335 = vst.msk [vmem:[%s2539_s3 + $0xe4] sm:$0xf] %vm1277_vm1, %v1619_v59  ;;  %v1773_v61 = vpop.f32.mrb[12].mxu1 }
  0xfe   :  { %v603_v62 = vadd.f32 %v1725_v60, %v2080_v50  ;;  %v594_v63 = vpop.f32.mrb[13].mxu0  ;;  %v795_v0 = vadd.f32 %v1773_v61, %v2080_v50  ;;  %v786_v1 = vpop.f32.mrb[13].mxu1 }
  0xff   :  { %v595_v2 = vadd.f32 %v2080_v50, %v594_v63  ;;  %v1726_v3 = vpop.f32.mrb[14].mxu0  ;;  %v787_v4 = vadd.f32 %v2080_v50, %v786_v1  ;;  %v1774_v5 = vpop.f32.mrb[14].mxu1 }
 0x100   :  { %v1576_v6 = vpack.c.bf16 %v603_v62, %v603_v62  ;;  %v606_v7 = vadd.f32 %v1726_v3, %v2080_v50  ;;  %v597_v8 = vpop.f32.mrb[15].mxu0  ;;  %v1624_v9 = vpack.c.bf16 %v795_v0, %v795_v0  ;;  %v798_v10 = vadd.f32 %v1774_v5, %v2080_v50  ;;  %v789_v11 = vpop.f32.mrb[15].mxu1 }
 0x101   :  { %v1574_v12 = vpack.c.bf16 %v595_v2, %v595_v2  ;;  %v598_v13 = vadd.f32 %v2080_v50, %v597_v8  ;;  %v1622_v14 = vpack.c.bf16 %v787_v4, %v787_v4  ;;  %v790_v15 = vadd.f32 %v2080_v50, %v789_v11 }
 0x102   :  { %1292 = vst.msk [vmem:[%s2539_s3 + $0x38] sm:$0xf] %vm1277_vm1, %v1576_v6  ;;  %v1577_v16 = vpack.c.bf16 %v606_v7, %v606_v7  ;;  %1340 = vst.msk [vmem:[%s2539_s3 + $0xf8] sm:$0xf] %vm1277_vm1, %v1624_v9  ;;  %v1625_v17 = vpack.c.bf16 %v798_v10, %v798_v10 }
 0x103   :  { %1290 = vst.msk [vmem:[%s2539_s3 + $0x30] sm:$0xf] %vm1277_vm1, %v1574_v12  ;;  %v1575_v18 = vpack.c.bf16 %v598_v13, %v598_v13  ;;  %1338 = vst.msk [vmem:[%s2539_s3 + $0xf0] sm:$0xf] %vm1277_vm1, %v1622_v14  ;;  %v1623_v19 = vpack.c.bf16 %v790_v15, %v790_v15 }
 0x104   :  { %1293 = vst.msk [vmem:[%s2539_s3 + $0x3c] sm:$0xf] %vm1277_vm1, %v1577_v16  ;;  %1341 = vst.msk [vmem:[%s2539_s3 + $0xfc] sm:$0xf] %vm1277_vm1, %v1625_v17 }
 0x105   :  { %1291 = vst.msk [vmem:[%s2539_s3 + $0x34] sm:$0xf] %vm1277_vm1, %v1575_v18  ;;  %v1729_v20 = vpop.f32.mrb[16].mxu0  ;;  %1339 = vst.msk [vmem:[%s2539_s3 + $0xf4] sm:$0xf] %vm1277_vm1, %v1623_v19  ;;  %v1777_v21 = vpop.f32.mrb[16].mxu1 }
 0x106   :  { %v619_v22 = vadd.f32 %v1729_v20, %v2080_v50  ;;  %v610_v23 = vpop.f32.mrb[17].mxu0  ;;  %v811_v24 = vadd.f32 %v1777_v21, %v2080_v50  ;;  %v802_v25 = vpop.f32.mrb[17].mxu1 }
 0x107   :  { %v611_v26 = vadd.f32 %v2080_v50, %v610_v23  ;;  %v1730_v27 = vpop.f32.mrb[18].mxu0  ;;  %v803_v28 = vadd.f32 %v2080_v50, %v802_v25  ;;  %v1778_v29 = vpop.f32.mrb[18].mxu1 }
 0x108   :  { %v1580_v30 = vpack.c.bf16 %v619_v22, %v619_v22  ;;  %v622_v31 = vadd.f32 %v1730_v27, %v2080_v50  ;;  %v613_v32 = vpop.f32.mrb[19].mxu0  ;;  %v1628_v33 = vpack.c.bf16 %v811_v24, %v811_v24  ;;  %v814_v34 = vadd.f32 %v1778_v29, %v2080_v50  ;;  %v805_v35 = vpop.f32.mrb[19].mxu1 }
 0x109   :  { %v1578_v36 = vpack.c.bf16 %v611_v26, %v611_v26  ;;  %v614_v37 = vadd.f32 %v2080_v50, %v613_v32  ;;  %v1626_v38 = vpack.c.bf16 %v803_v28, %v803_v28  ;;  %v806_v39 = vadd.f32 %v2080_v50, %v805_v35 }
 0x10a   :  { %1296 = vst.msk [vmem:[%s2539_s3 + $0x48] sm:$0xf] %vm1277_vm1, %v1580_v30  ;;  %v1581_v40 = vpack.c.bf16 %v622_v31, %v622_v31  ;;  %1344 = vst.msk [vmem:[%s2539_s3 + $0x108] sm:$0xf] %vm1277_vm1, %v1628_v33  ;;  %v1629_v41 = vpack.c.bf16 %v814_v34, %v814_v34 }
 0x10b   :  { %1294 = vst.msk [vmem:[%s2539_s3 + $0x40] sm:$0xf] %vm1277_vm1, %v1578_v36  ;;  %v1579_v42 = vpack.c.bf16 %v614_v37, %v614_v37  ;;  %1342 = vst.msk [vmem:[%s2539_s3 + $0x100] sm:$0xf] %vm1277_vm1, %v1626_v38  ;;  %v1627_v43 = vpack.c.bf16 %v806_v39, %v806_v39 }
 0x10c   :  { %1297 = vst.msk [vmem:[%s2539_s3 + $0x4c] sm:$0xf] %vm1277_vm1, %v1581_v40  ;;  %1345 = vst.msk [vmem:[%s2539_s3 + $0x10c] sm:$0xf] %vm1277_vm1, %v1629_v41 }
 0x10d   :  { %1295 = vst.msk [vmem:[%s2539_s3 + $0x44] sm:$0xf] %vm1277_vm1, %v1579_v42  ;;  %v1733_v44 = vpop.f32.mrb[20].mxu0  ;;  %1343 = vst.msk [vmem:[%s2539_s3 + $0x104] sm:$0xf] %vm1277_vm1, %v1627_v43  ;;  %v1781_v45 = vpop.f32.mrb[20].mxu1 }
 0x10e   :  { %v635_v46 = vadd.f32 %v1733_v44, %v2080_v50  ;;  %v626_v47 = vpop.f32.mrb[21].mxu0  ;;  %v827_v48 = vadd.f32 %v1781_v45, %v2080_v50  ;;  %v818_v49 = vpop.f32.mrb[21].mxu1 }
 0x10f   :  { %v627_v51 = vadd.f32 %v2080_v50, %v626_v47  ;;  %v1734_v52 = vpop.f32.mrb[22].mxu0  ;;  %v819_v53 = vadd.f32 %v2080_v50, %v818_v49  ;;  %v1782_v54 = vpop.f32.mrb[22].mxu1 }
 0x110   :  { %v1584_v55 = vpack.c.bf16 %v635_v46, %v635_v46  ;;  %v638_v56 = vadd.f32 %v1734_v52, %v2080_v50  ;;  %v629_v57 = vpop.f32.mrb[23].mxu0  ;;  %v1632_v58 = vpack.c.bf16 %v827_v48, %v827_v48  ;;  %v830_v59 = vadd.f32 %v1782_v54, %v2080_v50  ;;  %v821_v60 = vpop.f32.mrb[23].mxu1 }
 0x111   :  { %v1582_v61 = vpack.c.bf16 %v627_v51, %v627_v51  ;;  %v630_v62 = vadd.f32 %v2080_v50, %v629_v57  ;;  %v1630_v63 = vpack.c.bf16 %v819_v53, %v819_v53  ;;  %v822_v0 = vadd.f32 %v2080_v50, %v821_v60 }
 0x112   :  { %1300 = vst.msk [vmem:[%s2539_s3 + $0x58] sm:$0xf] %vm1277_vm1, %v1584_v55  ;;  %v1585_v1 = vpack.c.bf16 %v638_v56, %v638_v56  ;;  %1348 = vst.msk [vmem:[%s2539_s3 + $0x118] sm:$0xf] %vm1277_vm1, %v1632_v58  ;;  %v1633_v2 = vpack.c.bf16 %v830_v59, %v830_v59 }
 0x113   :  { %1298 = vst.msk [vmem:[%s2539_s3 + $0x50] sm:$0xf] %vm1277_vm1, %v1582_v61  ;;  %v1583_v3 = vpack.c.bf16 %v630_v62, %v630_v62  ;;  %1346 = vst.msk [vmem:[%s2539_s3 + $0x110] sm:$0xf] %vm1277_vm1, %v1630_v63  ;;  %v1631_v4 = vpack.c.bf16 %v822_v0, %v822_v0 }
 0x114   :  { %1301 = vst.msk [vmem:[%s2539_s3 + $0x5c] sm:$0xf] %vm1277_vm1, %v1585_v1  ;;  %1349 = vst.msk [vmem:[%s2539_s3 + $0x11c] sm:$0xf] %vm1277_vm1, %v1633_v2 }
 0x115   :  { %1299 = vst.msk [vmem:[%s2539_s3 + $0x54] sm:$0xf] %vm1277_vm1, %v1583_v3  ;;  %v1737_v5 = vpop.f32.mrb[24].mxu0  ;;  %1347 = vst.msk [vmem:[%s2539_s3 + $0x114] sm:$0xf] %vm1277_vm1, %v1631_v4  ;;  %v1785_v6 = vpop.f32.mrb[24].mxu1 }
 0x116   :  { %v651_v7 = vadd.f32 %v1737_v5, %v2080_v50  ;;  %v642_v8 = vpop.f32.mrb[25].mxu0  ;;  %v843_v9 = vadd.f32 %v1785_v6, %v2080_v50  ;;  %v834_v10 = vpop.f32.mrb[25].mxu1 }
 0x117   :  { %v643_v11 = vadd.f32 %v2080_v50, %v642_v8  ;;  %v1738_v12 = vpop.f32.mrb[26].mxu0  ;;  %v835_v13 = vadd.f32 %v2080_v50, %v834_v10  ;;  %v1786_v14 = vpop.f32.mrb[26].mxu1 }
 0x118   :  { %v1588_v15 = vpack.c.bf16 %v651_v7, %v651_v7  ;;  %v654_v16 = vadd.f32 %v1738_v12, %v2080_v50  ;;  %v645_v17 = vpop.f32.mrb[27].mxu0  ;;  %v1636_v18 = vpack.c.bf16 %v843_v9, %v843_v9  ;;  %v846_v19 = vadd.f32 %v1786_v14, %v2080_v50  ;;  %v837_v20 = vpop.f32.mrb[27].mxu1 }
 0x119   :  { %v1586_v21 = vpack.c.bf16 %v643_v11, %v643_v11  ;;  %v646_v22 = vadd.f32 %v2080_v50, %v645_v17  ;;  %v1634_v23 = vpack.c.bf16 %v835_v13, %v835_v13  ;;  %v838_v24 = vadd.f32 %v2080_v50, %v837_v20 }
 0x11a   :  { %1304 = vst.msk [vmem:[%s2539_s3 + $0x68] sm:$0xf] %vm1277_vm1, %v1588_v15  ;;  %v1589_v25 = vpack.c.bf16 %v654_v16, %v654_v16  ;;  %1352 = vst.msk [vmem:[%s2539_s3 + $0x128] sm:$0xf] %vm1277_vm1, %v1636_v18  ;;  %v1637_v26 = vpack.c.bf16 %v846_v19, %v846_v19 }
 0x11b   :  { %1302 = vst.msk [vmem:[%s2539_s3 + $0x60] sm:$0xf] %vm1277_vm1, %v1586_v21  ;;  %v1587_v27 = vpack.c.bf16 %v646_v22, %v646_v22  ;;  %1350 = vst.msk [vmem:[%s2539_s3 + $0x120] sm:$0xf] %vm1277_vm1, %v1634_v23  ;;  %v1635_v28 = vpack.c.bf16 %v838_v24, %v838_v24 }
 0x11c   :  { %1305 = vst.msk [vmem:[%s2539_s3 + $0x6c] sm:$0xf] %vm1277_vm1, %v1589_v25  ;;  %1353 = vst.msk [vmem:[%s2539_s3 + $0x12c] sm:$0xf] %vm1277_vm1, %v1637_v26 }
 0x11d   :  { %1303 = vst.msk [vmem:[%s2539_s3 + $0x64] sm:$0xf] %vm1277_vm1, %v1587_v27  ;;  %v1741_v29 = vpop.f32.mrb[28].mxu0  ;;  %1351 = vst.msk [vmem:[%s2539_s3 + $0x124] sm:$0xf] %vm1277_vm1, %v1635_v28  ;;  %v1789_v30 = vpop.f32.mrb[28].mxu1 }
 0x11e   :  { %v667_v31 = vadd.f32 %v1741_v29, %v2080_v50  ;;  %v658_v32 = vpop.f32.mrb[29].mxu0  ;;  %v859_v33 = vadd.f32 %v1789_v30, %v2080_v50  ;;  %v850_v34 = vpop.f32.mrb[29].mxu1 }
 0x11f   :  { %v659_v35 = vadd.f32 %v2080_v50, %v658_v32  ;;  %v1742_v36 = vpop.f32.mrb[30].mxu0  ;;  %v851_v37 = vadd.f32 %v2080_v50, %v850_v34  ;;  %v1790_v38 = vpop.f32.mrb[30].mxu1 }
 0x120   :  { %v1592_v39 = vpack.c.bf16 %v667_v31, %v667_v31  ;;  %v670_v40 = vadd.f32 %v1742_v36, %v2080_v50  ;;  %v661_v41 = vpop.f32.mrb[31].mxu0  ;;  %v1640_v42 = vpack.c.bf16 %v859_v33, %v859_v33  ;;  %v862_v43 = vadd.f32 %v1790_v38, %v2080_v50  ;;  %v853_v44 = vpop.f32.mrb[31].mxu1 }
 0x121   :  { %v1590_v45 = vpack.c.bf16 %v659_v35, %v659_v35  ;;  %v662_v46 = vadd.f32 %v2080_v50, %v661_v41  ;;  %v1638_v47 = vpack.c.bf16 %v851_v37, %v851_v37  ;;  %v854_v48 = vadd.f32 %v2080_v50, %v853_v44 }
 0x122   :  { %1308 = vst.msk [vmem:[%s2539_s3 + $0x78] sm:$0xf] %vm1277_vm1, %v1592_v39  ;;  %v1593_v49 = vpack.c.bf16 %v670_v40, %v670_v40  ;;  %1356 = vst.msk [vmem:[%s2539_s3 + $0x138] sm:$0xf] %vm1277_vm1, %v1640_v42  ;;  %v1641_v51 = vpack.c.bf16 %v862_v43, %v862_v43 }
 0x123   :  { %1306 = vst.msk [vmem:[%s2539_s3 + $0x70] sm:$0xf] %vm1277_vm1, %v1590_v45  ;;  %v1591_v52 = vpack.c.bf16 %v662_v46, %v662_v46  ;;  %1354 = vst.msk [vmem:[%s2539_s3 + $0x130] sm:$0xf] %vm1277_vm1, %v1638_v47  ;;  %v1639_v53 = vpack.c.bf16 %v854_v48, %v854_v48 }
 0x124   :  { %1309 = vst.msk [vmem:[%s2539_s3 + $0x7c] sm:$0xf] %vm1277_vm1, %v1593_v49  ;;  %1357 = vst.msk [vmem:[%s2539_s3 + $0x13c] sm:$0xf] %vm1277_vm1, %v1641_v51 }
 0x125   :  { %1307 = vst.msk [vmem:[%s2539_s3 + $0x74] sm:$0xf] %vm1277_vm1, %v1591_v52  ;;  %v1745_v54 = vpop.f32.mrb[32].mxu0  ;;  %1355 = vst.msk [vmem:[%s2539_s3 + $0x134] sm:$0xf] %vm1277_vm1, %v1639_v53  ;;  %v1793_v55 = vpop.f32.mrb[32].mxu1 }
 0x126   :  { %v683_v56 = vadd.f32 %v1745_v54, %v2080_v50  ;;  %v674_v57 = vpop.f32.mrb[33].mxu0  ;;  %v875_v58 = vadd.f32 %v1793_v55, %v2080_v50  ;;  %v866_v59 = vpop.f32.mrb[33].mxu1 }
 0x127   :  { %v675_v60 = vadd.f32 %v2080_v50, %v674_v57  ;;  %v1746_v61 = vpop.f32.mrb[34].mxu0  ;;  %v867_v62 = vadd.f32 %v2080_v50, %v866_v59  ;;  %v1794_v63 = vpop.f32.mrb[34].mxu1 }
 0x128   :  { %v1596_v0 = vpack.c.bf16 %v683_v56, %v683_v56  ;;  %v686_v1 = vadd.f32 %v1746_v61, %v2080_v50  ;;  %v677_v2 = vpop.f32.mrb[35].mxu0  ;;  %v1644_v3 = vpack.c.bf16 %v875_v58, %v875_v58  ;;  %v878_v4 = vadd.f32 %v1794_v63, %v2080_v50  ;;  %v869_v5 = vpop.f32.mrb[35].mxu1 }
 0x129   :  { %v1594_v6 = vpack.c.bf16 %v675_v60, %v675_v60  ;;  %v678_v7 = vadd.f32 %v2080_v50, %v677_v2  ;;  %v1642_v8 = vpack.c.bf16 %v867_v62, %v867_v62  ;;  %v870_v9 = vadd.f32 %v2080_v50, %v869_v5 }
 0x12a   :  { %1312 = vst.msk [vmem:[%s2539_s3 + $0x88] sm:$0xf] %vm1277_vm1, %v1596_v0  ;;  %v1597_v10 = vpack.c.bf16 %v686_v1, %v686_v1  ;;  %1360 = vst.msk [vmem:[%s2539_s3 + $0x148] sm:$0xf] %vm1277_vm1, %v1644_v3  ;;  %v1645_v11 = vpack.c.bf16 %v878_v4, %v878_v4 }
 0x12b   :  { %1310 = vst.msk [vmem:[%s2539_s3 + $0x80] sm:$0xf] %vm1277_vm1, %v1594_v6  ;;  %v1595_v12 = vpack.c.bf16 %v678_v7, %v678_v7  ;;  %1358 = vst.msk [vmem:[%s2539_s3 + $0x140] sm:$0xf] %vm1277_vm1, %v1642_v8  ;;  %v1643_v13 = vpack.c.bf16 %v870_v9, %v870_v9 }
 0x12c   :  { %1313 = vst.msk [vmem:[%s2539_s3 + $0x8c] sm:$0xf] %vm1277_vm1, %v1597_v10  ;;  %1361 = vst.msk [vmem:[%s2539_s3 + $0x14c] sm:$0xf] %vm1277_vm1, %v1645_v11 }
 0x12d   :  { %1311 = vst.msk [vmem:[%s2539_s3 + $0x84] sm:$0xf] %vm1277_vm1, %v1595_v12  ;;  %v1749_v14 = vpop.f32.mrb[36].mxu0  ;;  %1359 = vst.msk [vmem:[%s2539_s3 + $0x144] sm:$0xf] %vm1277_vm1, %v1643_v13  ;;  %v1797_v15 = vpop.f32.mrb[36].mxu1 }
 0x12e   :  { %v699_v16 = vadd.f32 %v1749_v14, %v2080_v50  ;;  %v690_v17 = vpop.f32.mrb[37].mxu0  ;;  %v891_v18 = vadd.f32 %v1797_v15, %v2080_v50  ;;  %v882_v19 = vpop.f32.mrb[37].mxu1 }
 0x12f   :  { %v691_v20 = vadd.f32 %v2080_v50, %v690_v17  ;;  %v1750_v21 = vpop.f32.mrb[38].mxu0  ;;  %v883_v22 = vadd.f32 %v2080_v50, %v882_v19  ;;  %v1798_v23 = vpop.f32.mrb[38].mxu1 }
 0x130   :  { %v1600_v24 = vpack.c.bf16 %v699_v16, %v699_v16  ;;  %v702_v25 = vadd.f32 %v1750_v21, %v2080_v50  ;;  %v693_v26 = vpop.f32.mrb[39].mxu0  ;;  %v1648_v27 = vpack.c.bf16 %v891_v18, %v891_v18  ;;  %v894_v28 = vadd.f32 %v1798_v23, %v2080_v50  ;;  %v885_v29 = vpop.f32.mrb[39].mxu1 }
 0x131   :  { %v1598_v30 = vpack.c.bf16 %v691_v20, %v691_v20  ;;  %v694_v31 = vadd.f32 %v2080_v50, %v693_v26  ;;  %v1646_v32 = vpack.c.bf16 %v883_v22, %v883_v22  ;;  %v886_v33 = vadd.f32 %v2080_v50, %v885_v29 }
 0x132   :  { %1316 = vst.msk [vmem:[%s2539_s3 + $0x98] sm:$0xf] %vm1277_vm1, %v1600_v24  ;;  %v1601_v34 = vpack.c.bf16 %v702_v25, %v702_v25  ;;  %1364 = vst.msk [vmem:[%s2539_s3 + $0x158] sm:$0xf] %vm1277_vm1, %v1648_v27  ;;  %v1649_v35 = vpack.c.bf16 %v894_v28, %v894_v28 }
 0x133   :  { %1314 = vst.msk [vmem:[%s2539_s3 + $0x90] sm:$0xf] %vm1277_vm1, %v1598_v30  ;;  %v1599_v36 = vpack.c.bf16 %v694_v31, %v694_v31  ;;  %1362 = vst.msk [vmem:[%s2539_s3 + $0x150] sm:$0xf] %vm1277_vm1, %v1646_v32  ;;  %v1647_v37 = vpack.c.bf16 %v886_v33, %v886_v33 }
 0x134   :  { %1317 = vst.msk [vmem:[%s2539_s3 + $0x9c] sm:$0xf] %vm1277_vm1, %v1601_v34  ;;  %1365 = vst.msk [vmem:[%s2539_s3 + $0x15c] sm:$0xf] %vm1277_vm1, %v1649_v35 }
 0x135   :  { %1315 = vst.msk [vmem:[%s2539_s3 + $0x94] sm:$0xf] %vm1277_vm1, %v1599_v36  ;;  %v1753_v38 = vpop.f32.mrb[40].mxu0  ;;  %1363 = vst.msk [vmem:[%s2539_s3 + $0x154] sm:$0xf] %vm1277_vm1, %v1647_v37  ;;  %v1801_v39 = vpop.f32.mrb[40].mxu1 }
 0x136   :  { %v715_v40 = vadd.f32 %v1753_v38, %v2080_v50  ;;  %v706_v41 = vpop.f32.mrb[41].mxu0  ;;  %v907_v42 = vadd.f32 %v1801_v39, %v2080_v50  ;;  %v898_v43 = vpop.f32.mrb[41].mxu1 }
 0x137   :  { %v707_v44 = vadd.f32 %v2080_v50, %v706_v41  ;;  %v1754_v45 = vpop.f32.mrb[42].mxu0  ;;  %v899_v46 = vadd.f32 %v2080_v50, %v898_v43  ;;  %v1802_v47 = vpop.f32.mrb[42].mxu1 }
 0x138   :  { %v1604_v48 = vpack.c.bf16 %v715_v40, %v715_v40  ;;  %v718_v49 = vadd.f32 %v1754_v45, %v2080_v50  ;;  %v709_v51 = vpop.f32.mrb[43].mxu0  ;;  %v1652_v52 = vpack.c.bf16 %v907_v42, %v907_v42  ;;  %v901_v53 = vpop.f32.mrb[43].mxu1 }
 0x139   :  { %v1602_v54 = vpack.c.bf16 %v707_v44, %v707_v44  ;;  %v710_v55 = vadd.f32 %v2080_v50, %v709_v51  ;;  %v1650_v56 = vpack.c.bf16 %v899_v46, %v899_v46  ;;  %v902_v57 = vadd.f32 %v2080_v50, %v901_v53 }
 0x13a   :  { %1320 = vst.msk [vmem:[%s2539_s3 + $0xa8] sm:$0xf] %vm1277_vm1, %v1604_v48  ;;  %v1605_v58 = vpack.c.bf16 %v718_v49, %v718_v49 }
 0x13b   :  { %1369 = vst.msk [vmem:[%s2539_s3 + $0x168] sm:$0x1] %vm1368_vm2, %v1652_v52  ;;  %v1603_v59 = vpack.c.bf16 %v710_v55, %v710_v55  ;;  %v1651_v60 = vpack.c.bf16 %v902_v57, %v902_v57 }
 0x13c   :  { %1318 = vst.msk [vmem:[%s2539_s3 + $0xa0] sm:$0xf] %vm1277_vm1, %v1602_v54  ;;  %1366 = vst.msk [vmem:[%s2539_s3 + $0x160] sm:$0xf] %vm1277_vm1, %v1650_v56 }
 0x13d   :  { %1321 = vst.msk [vmem:[%s2539_s3 + $0xac] sm:$0xf] %vm1277_vm1, %v1605_v58  ;;  %1319 = vst.msk [vmem:[%s2539_s3 + $0xa4] sm:$0xf] %vm1277_vm1, %v1603_v59  ;;  %v1757_v61 = vpop.f32.mrb[44].mxu0 }
 0x13e   :  { %1367 = vst.msk [vmem:[%s2539_s3 + $0x164] sm:$0xf] %vm1277_vm1, %v1651_v60  ;;  %v731_v62 = vadd.f32 %v1757_v61, %v2080_v50  ;;  %v722_v63 = vpop.f32.mrb[45].mxu0 }
 0x13f   :  { %v723_v0 = vadd.f32 %v2080_v50, %v722_v63  ;;  %v1758_v1 = vpop.f32.mrb[46].mxu0 }
 0x140   :  { %v1608_v2 = vpack.c.bf16 %v731_v62, %v731_v62  ;;  %v734_v3 = vadd.f32 %v1758_v1, %v2080_v50  ;;  %v725_v4 = vpop.f32.mrb[47].mxu0 }
 0x141   :  { %v1606_v5 = vpack.c.bf16 %v723_v0, %v723_v0  ;;  %v726_v6 = vadd.f32 %v2080_v50, %v725_v4 }
 0x142   :  { %1324 = vst.msk [vmem:[%s2539_s3 + $0xb8] sm:$0xf] %vm1277_vm1, %v1608_v2  ;;  %v1609_v7 = vpack.c.bf16 %v734_v3, %v734_v3 }
 0x143   :  { %1322 = vst.msk [vmem:[%s2539_s3 + $0xb0] sm:$0xf] %vm1277_vm1, %v1606_v5  ;;  %v1607_v8 = vpack.c.bf16 %v726_v6, %v726_v6 }
 0x144   :  { %1325 = vst.msk [vmem:[%s2539_s3 + $0xbc] sm:$0xf] %vm1277_vm1, %v1609_v7 }
 0x145   :  { %1323 = vst.msk [vmem:[%s2539_s3 + $0xb4] sm:$0xf] %vm1277_vm1, %v1607_v8 }

// kernel: actor_critic_forward.4
= control target key start
LH: loop header
LB: loop body
LE: loop exit
PB: predicated region body
PF: predicated region fallthrough
CT: control target
= control target key end

     0   :  { %vm571_vm0 = vcmask 519168   ;;  %s1028_s1 = inlined_call_operand.vmem [shape: bf16[512,64], index: 1, kind: input, shape index: {}]   ;;  %s1029_s0 = inlined_call_operand.vmem [shape: bf16[72,512], index: 0, kind: input, shape index: {}]   ;;  %s1030_s2 = inlined_call_operand.vmem [shape: f32[1,64], index: 2, kind: input, shape index: {}]   ;;  %s1031_s3 = inlined_call_operand.vmem [shape: bf16[72,64], index: 3, kind: output, shape index: {}]  }
   0x1   :  { %v748_v0 = vld [vmem:[%s1028_s1 + $0x40] sm:$0xff]   ;;  %v752_v4 = vld [vmem:[%s1028_s1 + $0x48] sm:$0xff]   ;;  %v756_v8 = vld [vmem:[%s1028_s1 + $0x50] sm:$0xff]  }
   0x2   :  { %v749_v1 = vld [vmem:[%s1028_s1 + $0xc0] sm:$0xff]   ;;  %656 = vmatprep.subr.bf16.mxu0 %v748_v0  ;;  %v753_v5 = vld [vmem:[%s1028_s1 + $0xc8] sm:$0xff]   ;;  %v757_v9 = vld [vmem:[%s1028_s1 + $0xd0] sm:$0xff]  }
   0x3   :  { %v750_v2 = vld [vmem:[%s1028_s1] sm:$0xff]   ;;  %702 = vmatprep.subr.bf16.mxu1 %v749_v1  ;;  %v754_v6 = vld [vmem:[%s1028_s1 + $0x8] sm:$0xff]   ;;  %v758_v10 = vld [vmem:[%s1028_s1 + $0x10] sm:$0xff]  }
   0x4   :  { %v751_v3 = vld [vmem:[%s1028_s1 + $0x80] sm:$0xff]   ;;  %657 = vmatpush3.bf16.msra.mxu0 %v750_v2  ;;  %v755_v7 = vld [vmem:[%s1028_s1 + $0x88] sm:$0xff]   ;;  %v759_v11 = vld [vmem:[%s1028_s1 + $0x90] sm:$0xff]  }
   0x5   :  { %703 = vmatpush3.bf16.msra.mxu1 %v751_v3  ;;  %658 = vmatprep.subr.bf16.mxu0 %v752_v4  ;;  %v760_v12 = vld [vmem:[%s1028_s1 + $0x58] sm:$0xff]   ;;  %v764_v16 = vld [vmem:[%s1028_s1 + $0x60] sm:$0xff]   ;;  %v768_v20 = vld [vmem:[%s1028_s1 + $0x68] sm:$0xff]  }
   0x6   :  { %704 = vmatprep.subr.bf16.mxu1 %v753_v5  ;;  %v761_v13 = vld [vmem:[%s1028_s1 + $0xd8] sm:$0xff]   ;;  %v765_v17 = vld [vmem:[%s1028_s1 + $0xe0] sm:$0xff]   ;;  %v769_v21 = vld [vmem:[%s1028_s1 + $0xe8] sm:$0xff]  }
   0x7   :  { %v762_v14 = vld [vmem:[%s1028_s1 + $0x18] sm:$0xff]   ;;  %v766_v18 = vld [vmem:[%s1028_s1 + $0x20] sm:$0xff]   ;;  %v770_v22 = vld [vmem:[%s1028_s1 + $0x28] sm:$0xff]  }
   0x8   :  { %659 = vmatpush3.bf16.msra.mxu0 %v754_v6  ;;  %v763_v15 = vld [vmem:[%s1028_s1 + $0x98] sm:$0xff]   ;;  %v767_v19 = vld [vmem:[%s1028_s1 + $0xa0] sm:$0xff]   ;;  %v771_v23 = vld [vmem:[%s1028_s1 + $0xa8] sm:$0xff]  }
   0x9   :  { %705 = vmatpush3.bf16.msra.mxu1 %v755_v7  ;;  %660 = vmatprep.subr.bf16.mxu0 %v756_v8  ;;  %v772_v24 = vld [vmem:[%s1028_s1 + $0x70] sm:$0xff]   ;;  %v776_v28 = vld [vmem:[%s1028_s1 + $0x78] sm:$0xff]   ;;  %v31_v46 = vld [vmem:[%s1029_s0 + $0x80] sm:$0xff] }
   0xa   :  { %706 = vmatprep.subr.bf16.mxu1 %v757_v9  ;;  %v773_v25 = vld [vmem:[%s1028_s1 + $0xf0] sm:$0xff]   ;;  %v777_v29 = vld [vmem:[%s1028_s1 + $0xf8] sm:$0xff]   ;;  %v32_v47 = vld [vmem:[%s1029_s0 + $0x88] sm:$0xff]  ;;  %v603_v50 = vcombine.high %v31_v46, %v31_v46  ;;  %v602_v52 = vcombine.low %v31_v46, %v31_v46 }
   0xb   :  { %v774_v26 = vld [vmem:[%s1028_s1 + $0x30] sm:$0xff]   ;;  %v778_v30 = vld [vmem:[%s1028_s1 + $0x38] sm:$0xff]   ;;  %v605_v51 = vcombine.high %v32_v47, %v32_v47  ;;  %v604_v53 = vcombine.low %v32_v47, %v32_v47  ;;  %v981_v56 = vld [vmem:[%s1030_s2] ss:$0 sm:$0xff] }
   0xc   :  { %661 = vmatpush3.bf16.msra.mxu0 %v758_v10  ;;  %v775_v27 = vld [vmem:[%s1028_s1 + $0xb0] sm:$0xff]   ;;  %v779_v31 = vld [vmem:[%s1028_s1 + $0xb8] sm:$0xff]  }
   0xd   :  { %707 = vmatpush3.bf16.msra.mxu1 %v759_v11  ;;  %662 = vmatprep.subr.bf16.mxu0 %v760_v12  ;;  %v780_v32 = vld [vmem:[%s1029_s0] ss:$16 sps:$4 sm:$0xff]   ;;  %v782_v33 = vld [vmem:[%s1029_s0 + $0x4] ss:$16 sps:$4 sm:$0xff]   ;;  %v783_v34 = vld [vmem:[%s1029_s0 + $0x8] ss:$16 sps:$4 sm:$0xff]  }
   0xe   :  { %708 = vmatprep.subr.bf16.mxu1 %v761_v13  ;;  %v785_v35 = vld [vmem:[%s1029_s0 + $0xc] ss:$16 sps:$4 sm:$0xff]   ;;  %422 = vmatprep.mubr.bf16.mxu0 %v782_v33  ;;  %v786_v36 = vld [vmem:[%s1029_s0 + $0x24] ss:$16 sps:$4 sm:$0xff]   ;;  %v790_v38 = vld [vmem:[%s1029_s0 + $0x20] ss:$16 sps:$4 sm:$0xff]  }
   0xf   :  { %494 = vmatprep.mubr.bf16.mxu1 %v785_v35  ;;  %v788_v37 = vld [vmem:[%s1029_s0 + $0x2c] ss:$16 sps:$4 sm:$0xff]   ;;  %v791_v39 = vld [vmem:[%s1029_s0 + $0x28] ss:$16 sps:$4 sm:$0xff]   ;;  %v792_v40 = vld [vmem:[%s1029_s0 + $0x44] ss:$16 sps:$4 sm:$0xff]  }
  0x10   :  { %663 = vmatpush3.bf16.msra.mxu0 %v762_v14  ;;  %v794_v41 = vld [vmem:[%s1029_s0 + $0x4c] ss:$16 sps:$4 sm:$0xff]   ;;  %v796_v42 = vld [vmem:[%s1029_s0 + $0x40] ss:$16 sps:$4 sm:$0xff]   ;;  %v797_v43 = vld [vmem:[%s1029_s0 + $0x48] ss:$16 sps:$4 sm:$0xff]  }
  0x11   :  { %709 = vmatpush3.bf16.msra.mxu1 %v763_v15  ;;  %664 = vmatprep.subr.bf16.mxu0 %v764_v16  ;;  %v798_v44 = vld [vmem:[%s1029_s0 + $0x64] ss:$16 sps:$4 sm:$0xff]   ;;  %v800_v45 = vld [vmem:[%s1029_s0 + $0x6c] ss:$16 sps:$4 sm:$0xff]   ;;  %v802_v48 = vld [vmem:[%s1029_s0 + $0x60] ss:$16 sps:$4 sm:$0xff]  }
  0x12   :  { %710 = vmatprep.subr.bf16.mxu1 %v765_v17  ;;  %v803_v49 = vld [vmem:[%s1029_s0 + $0x68] ss:$16 sps:$4 sm:$0xff]  }
  0x14   :  { %665 = vmatpush3.bf16.msra.mxu0 %v766_v18 }
  0x15   :  { %711 = vmatpush3.bf16.msra.mxu1 %v767_v19  ;;  %666 = vmatprep.subr.bf16.mxu0 %v768_v20 }
  0x16   :  { %712 = vmatprep.subr.bf16.mxu1 %v769_v21 }
  0x18   :  { %667 = vmatpush3.bf16.msra.mxu0 %v770_v22 }
  0x19   :  { %713 = vmatpush3.bf16.msra.mxu1 %v771_v23  ;;  %668 = vmatprep.subr.bf16.mxu0 %v772_v24 }
  0x1a   :  { %714 = vmatprep.subr.bf16.mxu1 %v773_v25 }
  0x1c   :  { %669 = vmatpush3.bf16.msra.mxu0 %v774_v26 }
  0x1d   :  { %715 = vmatpush3.bf16.msra.mxu1 %v775_v27  ;;  %670 = vmatprep.subr.bf16.mxu0 %v776_v28 }
  0x1e   :  { %716 = vmatprep.subr.bf16.mxu1 %v777_v29 }
  0x20   :  { %671 = vmatpush3.bf16.msra.mxu0 %v778_v30 }
  0x21   :  { %717 = vmatpush3.bf16.msra.mxu1 %v779_v31 }
  0x23   :  { %423 = vmatmul.mubr.bf16.vlgmr.msra.gmra.mrb[0].mxu0 %v780_v32 }
  0x24   :  { %495 = vmatmul.mubr.bf16.vlgmr.msra.gmra.mrb[0].mxu1 %v783_v34  ;;  %430 = vmatprep.mubr.bf16.mxu0 %v786_v36 }
  0x25   :  { %502 = vmatprep.mubr.bf16.mxu1 %v788_v37 }
  0x2b   :  { %431 = vmatmul.mubr.bf16.gmra.mrb[4].mxu0 %v790_v38 }
  0x2c   :  { %503 = vmatmul.mubr.bf16.gmra.mrb[4].mxu1 %v791_v39  ;;  %438 = vmatprep.mubr.bf16.mxu0 %v792_v40 }
  0x2d   :  { %510 = vmatprep.mubr.bf16.mxu1 %v794_v41 }
  0x33   :  { %439 = vmatmul.mubr.bf16.gmra.mrb[8].mxu0 %v796_v42 }
  0x34   :  { %511 = vmatmul.mubr.bf16.gmra.mrb[8].mxu1 %v797_v43  ;;  %446 = vmatprep.mubr.bf16.mxu0 %v798_v44 }
  0x35   :  { %518 = vmatprep.mubr.bf16.mxu1 %v800_v45 }
  0x3b   :  { %447 = vmatmul.mubr.bf16.gmra.mrb[12].mxu0 %v802_v48 }
  0x3c   :  { %519 = vmatmul.mubr.bf16.gmra.mrb[12].mxu1 %v803_v49  ;;  %454 = vmatprep.mubr.bf16.mxu0 %v603_v50 }
  0x3d   :  { %526 = vmatprep.mubr.bf16.mxu1 %v605_v51 }
  0x43   :  { %455 = vmatmul.mubr.bf16.gmra.mrb[16].mxu0 %v602_v52 }
  0x44   :  { %527 = vmatmul.mubr.bf16.gmra.mrb[16].mxu1 %v604_v53 }
  0xf6   :  { %v672_v54 = vpop.f32.mrb[0].mxu0 }
  0xf7   :  { %v718_v55 = vpop.f32.mrb[0].mxu1  ;;  %v673_v57 = vpop.f32.mrb[1].mxu0 }
  0xf8   :  { %v674_v58 = vadd.f32 %v673_v57, %v672_v54  ;;  %v719_v59 = vpop.f32.mrb[1].mxu1  ;;  %v675_v60 = vpop.f32.mrb[2].mxu0 }
  0xf9   :  { %v720_v61 = vadd.f32 %v719_v59, %v718_v55  ;;  %v721_v62 = vpop.f32.mrb[2].mxu1  ;;  %v676_v63 = vpop.f32.mrb[3].mxu0 }
  0xfa   :  { %v425_v0 = vadd.f32 %v674_v58, %v981_v56  ;;  %v677_v1 = vadd.f32 %v676_v63, %v675_v60  ;;  %v722_v2 = vpop.f32.mrb[3].mxu1 }
  0xfb   :  { %v723_v3 = vadd.f32 %v722_v2, %v721_v62 }
  0xfc   :  { %v497_v4 = vadd.f32 %v720_v61, %v425_v0  ;;  %v428_v5 = vadd.f32 %v677_v1, %v981_v56 }
  0xfe   :  { %v647_v6 = vpack.c.bf16 %v497_v4, %v497_v4  ;;  %v500_v7 = vadd.f32 %v723_v3, %v428_v5  ;;  %v678_v8 = vpop.f32.mrb[4].mxu0 }
  0xff   :  { %v724_v9 = vpop.f32.mrb[4].mxu1  ;;  %v679_v10 = vpop.f32.mrb[5].mxu0 }
 0x100   :  { %572 = vst.msk [vmem:[%s1031_s3] sm:$0xf] %vm571_vm0, %v647_v6  ;;  %v648_v11 = vpack.c.bf16 %v500_v7, %v500_v7  ;;  %v680_v12 = vadd.f32 %v679_v10, %v678_v8  ;;  %v725_v13 = vpop.f32.mrb[5].mxu1  ;;  %v681_v14 = vpop.f32.mrb[6].mxu0 }
 0x101   :  { %v726_v15 = vadd.f32 %v725_v13, %v724_v9  ;;  %v727_v16 = vpop.f32.mrb[6].mxu1  ;;  %v682_v17 = vpop.f32.mrb[7].mxu0 }
 0x102   :  { %573 = vst.msk [vmem:[%s1031_s3 + $0x4] sm:$0xf] %vm571_vm0, %v648_v11  ;;  %v433_v18 = vadd.f32 %v680_v12, %v981_v56  ;;  %v683_v19 = vadd.f32 %v682_v17, %v681_v14  ;;  %v728_v20 = vpop.f32.mrb[7].mxu1 }
 0x103   :  { %v729_v21 = vadd.f32 %v728_v20, %v727_v16 }
 0x104   :  { %v505_v22 = vadd.f32 %v726_v15, %v433_v18  ;;  %v436_v23 = vadd.f32 %v683_v19, %v981_v56 }
 0x106   :  { %v649_v24 = vpack.c.bf16 %v505_v22, %v505_v22  ;;  %v508_v25 = vadd.f32 %v729_v21, %v436_v23  ;;  %v684_v26 = vpop.f32.mrb[8].mxu0 }
 0x107   :  { %v730_v27 = vpop.f32.mrb[8].mxu1  ;;  %v685_v28 = vpop.f32.mrb[9].mxu0 }
 0x108   :  { %574 = vst.msk [vmem:[%s1031_s3 + $0x8] sm:$0xf] %vm571_vm0, %v649_v24  ;;  %v650_v29 = vpack.c.bf16 %v508_v25, %v508_v25  ;;  %v686_v30 = vadd.f32 %v685_v28, %v684_v26  ;;  %v731_v31 = vpop.f32.mrb[9].mxu1  ;;  %v687_v32 = vpop.f32.mrb[10].mxu0 }
 0x109   :  { %v732_v33 = vadd.f32 %v731_v31, %v730_v27  ;;  %v733_v34 = vpop.f32.mrb[10].mxu1  ;;  %v688_v35 = vpop.f32.mrb[11].mxu0 }
 0x10a   :  { %575 = vst.msk [vmem:[%s1031_s3 + $0xc] sm:$0xf] %vm571_vm0, %v650_v29  ;;  %v441_v36 = vadd.f32 %v686_v30, %v981_v56  ;;  %v689_v37 = vadd.f32 %v688_v35, %v687_v32  ;;  %v734_v38 = vpop.f32.mrb[11].mxu1 }
 0x10b   :  { %v735_v39 = vadd.f32 %v734_v38, %v733_v34 }
 0x10c   :  { %v513_v40 = vadd.f32 %v732_v33, %v441_v36  ;;  %v444_v41 = vadd.f32 %v689_v37, %v981_v56 }
 0x10e   :  { %v651_v42 = vpack.c.bf16 %v513_v40, %v513_v40  ;;  %v516_v43 = vadd.f32 %v735_v39, %v444_v41  ;;  %v690_v44 = vpop.f32.mrb[12].mxu0 }
 0x10f   :  { %v736_v45 = vpop.f32.mrb[12].mxu1  ;;  %v691_v46 = vpop.f32.mrb[13].mxu0 }
 0x110   :  { %576 = vst.msk [vmem:[%s1031_s3 + $0x10] sm:$0xf] %vm571_vm0, %v651_v42  ;;  %v652_v47 = vpack.c.bf16 %v516_v43, %v516_v43  ;;  %v692_v48 = vadd.f32 %v691_v46, %v690_v44  ;;  %v737_v49 = vpop.f32.mrb[13].mxu1  ;;  %v693_v50 = vpop.f32.mrb[14].mxu0 }
 0x111   :  { %v738_v51 = vadd.f32 %v737_v49, %v736_v45  ;;  %v739_v52 = vpop.f32.mrb[14].mxu1  ;;  %v694_v53 = vpop.f32.mrb[15].mxu0 }
 0x112   :  { %577 = vst.msk [vmem:[%s1031_s3 + $0x14] sm:$0xf] %vm571_vm0, %v652_v47  ;;  %v449_v54 = vadd.f32 %v692_v48, %v981_v56  ;;  %v695_v55 = vadd.f32 %v694_v53, %v693_v50  ;;  %v740_v57 = vpop.f32.mrb[15].mxu1 }
 0x113   :  { %v741_v58 = vadd.f32 %v740_v57, %v739_v52 }
 0x114   :  { %v521_v59 = vadd.f32 %v738_v51, %v449_v54  ;;  %v452_v60 = vadd.f32 %v695_v55, %v981_v56 }
 0x116   :  { %v653_v61 = vpack.c.bf16 %v521_v59, %v521_v59  ;;  %v524_v62 = vadd.f32 %v741_v58, %v452_v60  ;;  %v696_v63 = vpop.f32.mrb[16].mxu0 }
 0x117   :  { %v742_v0 = vpop.f32.mrb[16].mxu1  ;;  %v697_v1 = vpop.f32.mrb[17].mxu0 }
 0x118   :  { %578 = vst.msk [vmem:[%s1031_s3 + $0x18] sm:$0xf] %vm571_vm0, %v653_v61  ;;  %v654_v2 = vpack.c.bf16 %v524_v62, %v524_v62  ;;  %v698_v3 = vadd.f32 %v697_v1, %v696_v63  ;;  %v743_v4 = vpop.f32.mrb[17].mxu1  ;;  %v699_v5 = vpop.f32.mrb[18].mxu0 }
 0x119   :  { %v744_v6 = vadd.f32 %v743_v4, %v742_v0  ;;  %v745_v7 = vpop.f32.mrb[18].mxu1  ;;  %v700_v8 = vpop.f32.mrb[19].mxu0 }
 0x11a   :  { %579 = vst.msk [vmem:[%s1031_s3 + $0x1c] sm:$0xf] %vm571_vm0, %v654_v2  ;;  %v457_v9 = vadd.f32 %v698_v3, %v981_v56  ;;  %v746_v10 = vpop.f32.mrb[19].mxu1 }
 0x11c   :  { %v529_v11 = vadd.f32 %v744_v6, %v457_v9 }
 0x11e   :  { %v655_v12 = vpack.c.bf16 %v529_v11, %v529_v11 }
 0x120   :  { %580 = vst.msk [vmem:[%s1031_s3 + $0x20] sm:$0xf] %vm571_vm0, %v655_v12 }

// kernel: actor_critic_forward.5
= control target key start
LH: loop header
LB: loop body
LE: loop exit
PB: predicated region body
PF: predicated region fallthrough
CT: control target
= control target key end

     0   :  { %v8847_v22 = vmov 1966171168   ;;  %v1208_v24 = vlaneseq  ;;  %vm8849_vm0 = vmmov 0   ;;  %vm6654_vm1 = vcmask 523264   ;;  %s10838_s1 = inlined_call_operand.vmem [shape: bf16[9216,64], index: 1, kind: input, shape index: {}]   ;;  %s10839_s0 = inlined_call_operand.vmem [shape: bf16[2,9216], index: 0, kind: input, shape index: {}]   ;;  %s10840_s2 = inlined_call_operand.vmem [shape: f32[1,64], index: 2, kind: input, shape index: {}]   ;;  %s10841_s3 = inlined_call_operand.vmem [shape: bf16[64,128], index: 3, kind: input, shape index: {}]   ;;  %s10842_s5 = inlined_call_operand.vmem [shape: bf16[128,7], index: 5, kind: input, shape index: {}]   ;;  %s10843_s4 = inlined_call_operand.vmem [shape: f32[1,128], index: 4, kind: input, shape index: {}]   ;;  %s10844_s6 = inlined_call_operand.vmem [shape: f32[1,7], index: 6, kind: input, shape index: {}]   ;;  %s10845_s7 = inlined_call_operand.vmem [shape: f32[2,7], index: 7, kind: output, shape index: {}]  }
   0x1   :  { %v8250_v0 = vld [vmem:[%s10838_s1 + $0x40] sm:$0xff]   ;;  %v8254_v4 = vld [vmem:[%s10838_s1 + $0x48] sm:$0xff]   ;;  %v8258_v8 = vld [vmem:[%s10838_s1 + $0x50] sm:$0xff]   ;;  %v1206_v23 = vunpack.c.l.s4 %v8847_v22  ;;  %vm6811_vm2 = vcmask 50176  }
   0x2   :  { %v8251_v1 = vld [vmem:[%s10838_s1 + $0xc0] sm:$0xff]   ;;  %7409 = vmatprep.subr.bf16.mxu0 %v8250_v0  ;;  %v8255_v5 = vld [vmem:[%s10838_s1 + $0xc8] sm:$0xff]   ;;  %v8259_v9 = vld [vmem:[%s10838_s1 + $0xd0] sm:$0xff]   ;;  %v1209_v30 = vshrl.u32 %v1208_v24, 7 }
   0x3   :  { %v8252_v2 = vld [vmem:[%s10838_s1] sm:$0xff]   ;;  %7431 = vmatprep.subr.bf16.mxu1 %v8251_v1  ;;  %v8256_v6 = vld [vmem:[%s10838_s1 + $0x8] sm:$0xff]   ;;  %v8260_v10 = vld [vmem:[%s10838_s1 + $0x10] sm:$0xff]   ;;  %v1207_v29 = vunpack.c.0.s8 %v1206_v23 }
   0x4   :  { %v8253_v3 = vld [vmem:[%s10838_s1 + $0x80] sm:$0xff]   ;;  %7410 = vmatpush3.bf16.msra.mxu0 %v8252_v2  ;;  %v8257_v7 = vld [vmem:[%s10838_s1 + $0x88] sm:$0xff]   ;;  %v8261_v11 = vld [vmem:[%s10838_s1 + $0x90] sm:$0xff]  }
   0x5   :  { %7432 = vmatpush3.bf16.msra.mxu1 %v8253_v3  ;;  %7411 = vmatprep.subr.bf16.mxu0 %v8254_v4  ;;  %v8262_v12 = vld [vmem:[%s10838_s1 + $0x58] sm:$0xff]   ;;  %v8266_v16 = vld [vmem:[%s10838_s1 + $0x60] sm:$0xff]   ;;  %v8270_v20 = vld [vmem:[%s10838_s1 + $0x68] sm:$0xff]   ;;  %v8980_v35 = vsub.s32 %v1207_v29, %v1209_v30 }
   0x6   :  { %7433 = vmatprep.subr.bf16.mxu1 %v8255_v5  ;;  %v8263_v13 = vld [vmem:[%s10838_s1 + $0xd8] sm:$0xff]   ;;  %v8267_v17 = vld [vmem:[%s10838_s1 + $0xe0] sm:$0xff]   ;;  %v8271_v21 = vld [vmem:[%s10838_s1 + $0xe8] sm:$0xff]  }
   0x7   :  { %v8264_v14 = vld [vmem:[%s10838_s1 + $0x18] sm:$0xff]   ;;  %v8268_v18 = vld [vmem:[%s10838_s1 + $0x20] sm:$0xff]   ;;  %v8272_v25 = vld [vmem:[%s10838_s1 + $0x28] sm:$0xff]  }
   0x8   :  { %7412 = vmatpush3.bf16.msra.mxu0 %v8256_v6  ;;  %v8265_v15 = vld [vmem:[%s10838_s1 + $0x98] sm:$0xff]   ;;  %v8269_v19 = vld [vmem:[%s10838_s1 + $0xa0] sm:$0xff]   ;;  %v8273_v26 = vld [vmem:[%s10838_s1 + $0xa8] sm:$0xff]  }
   0x9   :  { %7434 = vmatpush3.bf16.msra.mxu1 %v8257_v7  ;;  %7413 = vmatprep.subr.bf16.mxu0 %v8258_v8  ;;  %v8274_v27 = vld [vmem:[%s10838_s1 + $0x70] sm:$0xff]   ;;  %v8278_v33 = vld [vmem:[%s10838_s1 + $0x78] sm:$0xff]   ;;  %v27_v38 = vld [vmem:[%s10839_s0] sm:$0xff] }
   0xa   :  { %7435 = vmatprep.subr.bf16.mxu1 %v8259_v9  ;;  %v8275_v28 = vld [vmem:[%s10838_s1 + $0xf0] sm:$0xff]   ;;  %v8279_v34 = vld [vmem:[%s10838_s1 + $0xf8] sm:$0xff]   ;;  %v1204_v39 = vcombine.high %v27_v38, %v27_v38  ;;  %v1211_v40 = vrot.slane %v27_v38, %v8980_v35  ;;  %v8283_v41 = vld [vmem:[%s10838_s1 + $0x140] sm:$0xff]  }
   0xb   :  { %v8276_v31 = vld [vmem:[%s10838_s1 + $0x30] sm:$0xff]   ;;  %v8280_v36 = vld [vmem:[%s10838_s1 + $0x38] sm:$0xff]   ;;  %v8284_v42 = vld [vmem:[%s10838_s1 + $0x1c0] sm:$0xff]  }
   0xc   :  { %7414 = vmatpush3.bf16.msra.mxu0 %v8260_v10  ;;  %v8277_v32 = vld [vmem:[%s10838_s1 + $0xb0] sm:$0xff]   ;;  %v8281_v37 = vld [vmem:[%s10838_s1 + $0xb8] sm:$0xff]   ;;  %v1219_v43 = vcombine.high %v1211_v40, %v1211_v40  ;;  %v1227_v44 = vrot.slane %v1211_v40, %v8980_v35  ;;  %v9000_v45 = vrot.slane %v1204_v39, %v8980_v35  ;;  %v8285_v46 = vld [vmem:[%s10838_s1 + $0x100] sm:$0xff]  }
   0xd   :  { %7436 = vmatpush3.bf16.msra.mxu1 %v8261_v11  ;;  %7415 = vmatprep.subr.bf16.mxu0 %v8262_v12  ;;  %v8286_v48 = vld [vmem:[%s10838_s1 + $0x180] sm:$0xff]   ;;  %v8287_v51 = vld [vmem:[%s10838_s1 + $0x148] sm:$0xff]   ;;  %v8291_v58 = vld [vmem:[%s10838_s1 + $0x150] sm:$0xff]  }
   0xe   :  { %7437 = vmatprep.subr.bf16.mxu1 %v8263_v13  ;;  %v1241_v47 = vrot.slane %v1219_v43, %v8980_v35  ;;  %v1220_v49 = vcombine.high %v9000_v45, %v9000_v45  ;;  %v1249_v50 = vcombine.high %v1227_v44, %v1227_v44  ;;  %v8288_v53 = vld [vmem:[%s10838_s1 + $0x1c8] sm:$0xff]   ;;  %v8292_v59 = vld [vmem:[%s10838_s1 + $0x1d0] sm:$0xff]   ;;  %v8295_v62 = vld [vmem:[%s10838_s1 + $0x158] sm:$0xff]  }
   0xf   :  { %v8289_v55 = vld [vmem:[%s10838_s1 + $0x108] sm:$0xff]   ;;  %v8293_v60 = vld [vmem:[%s10838_s1 + $0x110] sm:$0xff]   ;;  %v8296_v63 = vld [vmem:[%s10838_s1 + $0x1d8] sm:$0xff]  }
  0x10   :  { %7416 = vmatpush3.bf16.msra.mxu0 %v8264_v14  ;;  %5205 = vmatprep.mubr.bf16.mxu0 %v1241_v47  ;;  %v1251_v52 = vcombine.high %v1241_v47, %v1241_v47  ;;  %v1248_v54 = vrot.slane %v1220_v49, %v8980_v35  ;;  %v8290_v56 = vld [vmem:[%s10838_s1 + $0x188] sm:$0xff]   ;;  %v8294_v61 = vld [vmem:[%s10838_s1 + $0x190] sm:$0xff]   ;;  %v8297_v0 = vld [vmem:[%s10838_s1 + $0x118] sm:$0xff]  }
  0x11   :  { %7438 = vmatpush3.bf16.msra.mxu1 %v8265_v15  ;;  %7417 = vmatprep.subr.bf16.mxu0 %v8266_v16  ;;  %v8298_v1 = vld [vmem:[%s10838_s1 + $0x198] sm:$0xff]   ;;  %v8299_v2 = vld [vmem:[%s10838_s1 + $0x160] sm:$0xff]   ;;  %v8303_v6 = vld [vmem:[%s10838_s1 + $0x168] sm:$0xff]  }
  0x12   :  { %7439 = vmatprep.subr.bf16.mxu1 %v8267_v17  ;;  %5245 = vmatprep.mubr.bf16.mxu1 %v1251_v52  ;;  %v1252_v57 = vcombine.high %v1248_v54, %v1248_v54  ;;  %v8300_v3 = vld [vmem:[%s10838_s1 + $0x1e0] sm:$0xff]   ;;  %v8304_v7 = vld [vmem:[%s10838_s1 + $0x1e8] sm:$0xff]   ;;  %v8307_v10 = vld [vmem:[%s10838_s1 + $0x170] sm:$0xff]  }
  0x13   :  { %v8301_v4 = vld [vmem:[%s10838_s1 + $0x120] sm:$0xff]   ;;  %v8305_v8 = vld [vmem:[%s10838_s1 + $0x128] sm:$0xff]   ;;  %v8308_v11 = vld [vmem:[%s10838_s1 + $0x1f0] sm:$0xff]  }
  0x14   :  { %7418 = vmatpush3.bf16.msra.mxu0 %v8268_v18  ;;  %v8302_v5 = vld [vmem:[%s10838_s1 + $0x1a0] sm:$0xff]   ;;  %v8306_v9 = vld [vmem:[%s10838_s1 + $0x1a8] sm:$0xff]   ;;  %v8309_v12 = vld [vmem:[%s10838_s1 + $0x130] sm:$0xff]   ;;  %v1234_v18 = vrot.slane %v9000_v45, %v8980_v35 }
  0x15   :  { %7440 = vmatpush3.bf16.msra.mxu1 %v8269_v19  ;;  %7419 = vmatprep.subr.bf16.mxu0 %v8270_v20  ;;  %v8310_v13 = vld [vmem:[%s10838_s1 + $0x1b0] sm:$0xff]   ;;  %v8311_v14 = vld [vmem:[%s10838_s1 + $0x178] sm:$0xff]   ;;  %v8315_v19 = vld [vmem:[%s10838_s1 + $0x240] sm:$0xff]  }
  0x16   :  { %7441 = vmatprep.subr.bf16.mxu1 %v8271_v21  ;;  %v8312_v15 = vld [vmem:[%s10838_s1 + $0x1f8] sm:$0xff]   ;;  %v8316_v20 = vld [vmem:[%s10838_s1 + $0x2c0] sm:$0xff]   ;;  %v1250_v23 = vcombine.high %v1234_v18, %v1234_v18  ;;  %v8319_v24 = vld [vmem:[%s10838_s1 + $0x248] sm:$0xff]  }
  0x17   :  { %v8313_v16 = vld [vmem:[%s10838_s1 + $0x138] sm:$0xff]   ;;  %v8317_v21 = vld [vmem:[%s10838_s1 + $0x200] sm:$0xff]   ;;  %v8324_v29 = vld [vmem:[%s10838_s1 + $0x2d0] sm:$0xff]  }
  0x18   :  { %7420 = vmatpush3.bf16.msra.mxu0 %v8272_v25  ;;  %v8314_v17 = vld [vmem:[%s10838_s1 + $0x1b8] sm:$0xff]   ;;  %v8318_v22 = vld [vmem:[%s10838_s1 + $0x280] sm:$0xff]   ;;  %v8320_v25 = vld [vmem:[%s10838_s1 + $0x2c8] sm:$0xff]  }
  0x19   :  { %7442 = vmatpush3.bf16.msra.mxu1 %v8273_v26  ;;  %7421 = vmatprep.subr.bf16.mxu0 %v8274_v27  ;;  %v8321_v26 = vld [vmem:[%s10838_s1 + $0x208] sm:$0xff]   ;;  %v8325_v30 = vld [vmem:[%s10838_s1 + $0x210] sm:$0xff]   ;;  %v8332_v38 = vld [vmem:[%s10838_s1 + $0x2e0] sm:$0xff]  }
  0x1a   :  { %7443 = vmatprep.subr.bf16.mxu1 %v8275_v28  ;;  %v8322_v27 = vld [vmem:[%s10838_s1 + $0x288] sm:$0xff]   ;;  %v8323_v28 = vld [vmem:[%s10838_s1 + $0x250] sm:$0xff]   ;;  %v8333_v39 = vld [vmem:[%s10838_s1 + $0x220] sm:$0xff]  }
  0x1b   :  { %v8334_v40 = vld [vmem:[%s10838_s1 + $0x2a0] sm:$0xff]   ;;  %v8337_v43 = vld [vmem:[%s10838_s1 + $0x228] sm:$0xff]   ;;  %v8339_v45 = vld [vmem:[%s10838_s1 + $0x270] sm:$0xff]  }
  0x1c   :  { %7422 = vmatpush3.bf16.msra.mxu0 %v8276_v31  ;;  %v8326_v31 = vld [vmem:[%s10838_s1 + $0x290] sm:$0xff]   ;;  %v8343_v49 = vld [vmem:[%s10838_s1 + $0x278] sm:$0xff]   ;;  %v28_v52 = vld [vmem:[%s10839_s0 + $0x8] sm:$0xff] }
  0x1d   :  { %7444 = vmatpush3.bf16.msra.mxu1 %v8277_v32  ;;  %7423 = vmatprep.subr.bf16.mxu0 %v8278_v33  ;;  %v8327_v32 = vld [vmem:[%s10838_s1 + $0x258] sm:$0xff]   ;;  %v8341_v47 = vld [vmem:[%s10838_s1 + $0x230] sm:$0xff]  }
  0x1e   :  { %7445 = vmatprep.subr.bf16.mxu1 %v8279_v34  ;;  %v8328_v33 = vld [vmem:[%s10838_s1 + $0x2d8] sm:$0xff]  }
  0x1f   :  { %v8329_v34 = vld [vmem:[%s10838_s1 + $0x218] sm:$0xff]  }
  0x20   :  { %7424 = vmatpush3.bf16.msra.mxu0 %v8280_v36  ;;  %v8330_v36 = vld [vmem:[%s10838_s1 + $0x298] sm:$0xff]  }
  0x21   :  { %7446 = vmatpush3.bf16.msra.mxu1 %v8281_v37  ;;  %7453 = vmatprep.subr.bf16.mxu0 %v8283_v41  ;;  %v8331_v37 = vld [vmem:[%s10838_s1 + $0x260] sm:$0xff]   ;;  %v8335_v41 = vld [vmem:[%s10838_s1 + $0x268] sm:$0xff]  }
  0x22   :  { %7475 = vmatprep.subr.bf16.mxu1 %v8284_v42  ;;  %v8336_v42 = vld [vmem:[%s10838_s1 + $0x2e8] sm:$0xff]  }
  0x23   :  { %5206 = vmatmul.mubr.bf16.vlgmr.msra.gmra.mrb[0].mxu0 %v1227_v44  ;;  %v8338_v44 = vld [vmem:[%s10838_s1 + $0x2a8] sm:$0xff]  }
  0x24   :  { %7454 = vmatpush3.bf16.msra.mxu0 %v8285_v46  ;;  %5246 = vmatmul.mubr.bf16.vlgmr.msra.gmra.mrb[0].mxu1 %v1249_v50  ;;  %v8340_v46 = vld [vmem:[%s10838_s1 + $0x2f0] sm:$0xff]   ;;  %v8344_v50 = vld [vmem:[%s10838_s1 + $0x2f8] sm:$0xff]  }
  0x25   :  { %7455 = vmatprep.subr.bf16.mxu0 %v8287_v51  ;;  %7476 = vmatpush3.bf16.msra.mxu1 %v8286_v48  ;;  %v8342_v48 = vld [vmem:[%s10838_s1 + $0x2b0] sm:$0xff]   ;;  %v8345_v51 = vld [vmem:[%s10838_s1 + $0x238] sm:$0xff]  }
  0x26   :  { %5285 = vmatprep.mubr.bf16.mxu0 %v1248_v54  ;;  %7477 = vmatprep.subr.bf16.mxu1 %v8288_v53  ;;  %v8346_v53 = vld [vmem:[%s10838_s1 + $0x2b8] sm:$0xff]   ;;  %v1260_v54 = vrot.slane %v28_v52, %v8980_v35 }
  0x27   :  { %5325 = vmatprep.mubr.bf16.mxu1 %v1252_v57 }
  0x28   :  { %7456 = vmatpush3.bf16.msra.mxu0 %v8289_v55  ;;  %v1253_v55 = vcombine.high %v28_v52, %v28_v52  ;;  %v1268_v57 = vcombine.high %v1260_v54, %v1260_v54  ;;  %v8396_v52 = vld [vmem:[%s10838_s1 + $0x460] sm:$0xff]  }
  0x29   :  { %7457 = vmatprep.subr.bf16.mxu0 %v8291_v58  ;;  %7478 = vmatpush3.bf16.msra.mxu1 %v8290_v56  ;;  %v8347_v56 = vld [vmem:[%s10838_s1 + $0x340] sm:$0xff]   ;;  %v1276_v58 = vrot.slane %v1260_v54, %v8980_v35 }
  0x2a   :  { %7479 = vmatprep.subr.bf16.mxu1 %v8292_v59  ;;  %v8348_v59 = vld [vmem:[%s10838_s1 + $0x3c0] sm:$0xff]  }
  0x2b   :  { %v8398_v54 = vld [vmem:[%s10838_s1 + $0x420] sm:$0xff]  }
  0x2c   :  { %7458 = vmatpush3.bf16.msra.mxu0 %v8293_v60  ;;  %v9206_v60 = vrot.slane %v1253_v55, %v8980_v35  ;;  %v8399_v55 = vld [vmem:[%s10838_s1 + $0x4a0] sm:$0xff]  }
  0x2d   :  { %7459 = vmatprep.subr.bf16.mxu0 %v8295_v62  ;;  %7480 = vmatpush3.bf16.msra.mxu1 %v8294_v61  ;;  %v8349_v61 = vld [vmem:[%s10838_s1 + $0x300] sm:$0xff]   ;;  %v1290_v62 = vrot.slane %v1268_v57, %v8980_v35  ;;  %v8401_v57 = vld [vmem:[%s10838_s1 + $0x4e8] sm:$0xff]  }
  0x2e   :  { %7481 = vmatprep.subr.bf16.mxu1 %v8296_v63  ;;  %v8350_v63 = vld [vmem:[%s10838_s1 + $0x380] sm:$0xff]  }
  0x30   :  { %7460 = vmatpush3.bf16.msra.mxu0 %v8297_v0  ;;  %v1269_v0 = vcombine.high %v9206_v60, %v9206_v60 }
  0x31   :  { %7461 = vmatprep.subr.bf16.mxu0 %v8299_v2  ;;  %7482 = vmatpush3.bf16.msra.mxu1 %v8298_v1  ;;  %v1298_v1 = vcombine.high %v1276_v58, %v1276_v58  ;;  %v8351_v2 = vld [vmem:[%s10838_s1 + $0x348] sm:$0xff]  }
  0x32   :  { %7483 = vmatprep.subr.bf16.mxu1 %v8300_v3  ;;  %v1300_v3 = vcombine.high %v1290_v62, %v1290_v62 }
  0x34   :  { %7462 = vmatpush3.bf16.msra.mxu0 %v8301_v4  ;;  %v8352_v4 = vld [vmem:[%s10838_s1 + $0x3c8] sm:$0xff]  }
  0x35   :  { %7463 = vmatprep.subr.bf16.mxu0 %v8303_v6  ;;  %7484 = vmatpush3.bf16.msra.mxu1 %v8302_v5  ;;  %v1297_v5 = vrot.slane %v1269_v0, %v8980_v35  ;;  %v8353_v6 = vld [vmem:[%s10838_s1 + $0x308] sm:$0xff]   ;;  %v8408_v0 = vld [vmem:[%s10838_s1 + $0x478] sm:$0xff]  }
  0x36   :  { %7485 = vmatprep.subr.bf16.mxu1 %v8304_v7  ;;  %v8354_v7 = vld [vmem:[%s10838_s1 + $0x388] sm:$0xff]  }
  0x38   :  { %7464 = vmatpush3.bf16.msra.mxu0 %v8305_v8  ;;  %v1301_v8 = vcombine.high %v1297_v5, %v1297_v5 }
  0x39   :  { %7465 = vmatprep.subr.bf16.mxu0 %v8307_v10  ;;  %7486 = vmatpush3.bf16.msra.mxu1 %v8306_v9  ;;  %v8355_v9 = vld [vmem:[%s10838_s1 + $0x350] sm:$0xff]  }
  0x3a   :  { %7487 = vmatprep.subr.bf16.mxu1 %v8308_v11  ;;  %v8356_v10 = vld [vmem:[%s10838_s1 + $0x3d0] sm:$0xff]  }
  0x3b   :  { %v8357_v11 = vld [vmem:[%s10838_s1 + $0x310] sm:$0xff]  }
  0x3c   :  { %7466 = vmatpush3.bf16.msra.mxu0 %v8309_v12  ;;  %v8358_v12 = vld [vmem:[%s10838_s1 + $0x390] sm:$0xff]  }
  0x3d   :  { %7467 = vmatprep.subr.bf16.mxu0 %v8311_v14  ;;  %7488 = vmatpush3.bf16.msra.mxu1 %v8310_v13  ;;  %v8359_v13 = vld [vmem:[%s10838_s1 + $0x358] sm:$0xff]  }
  0x3e   :  { %7489 = vmatprep.subr.bf16.mxu1 %v8312_v15  ;;  %v8360_v14 = vld [vmem:[%s10838_s1 + $0x3d8] sm:$0xff]  }
  0x3f   :  { %v8361_v15 = vld [vmem:[%s10838_s1 + $0x318] sm:$0xff]  }
  0x40   :  { %7468 = vmatpush3.bf16.msra.mxu0 %v8313_v16  ;;  %v8362_v16 = vld [vmem:[%s10838_s1 + $0x398] sm:$0xff]  }
  0x41   :  { %7497 = vmatprep.subr.bf16.mxu0 %v8315_v19  ;;  %7490 = vmatpush3.bf16.msra.mxu1 %v8314_v17  ;;  %v8363_v17 = vld [vmem:[%s10838_s1 + $0x360] sm:$0xff]  }
  0x42   :  { %7519 = vmatprep.subr.bf16.mxu1 %v8316_v20  ;;  %v8365_v19 = vld [vmem:[%s10838_s1 + $0x320] sm:$0xff]  }
  0x43   :  { %5286 = vmatmul.mubr.bf16.vlgmr.msra.gmra.mrb[4].mxu0 %v1234_v18  ;;  %v8364_v18 = vld [vmem:[%s10838_s1 + $0x3e0] sm:$0xff]  }
  0x44   :  { %7498 = vmatpush3.bf16.msra.mxu0 %v8317_v21  ;;  %5326 = vmatmul.mubr.bf16.vlgmr.msra.gmra.mrb[4].mxu1 %v1250_v23  ;;  %v8366_v20 = vld [vmem:[%s10838_s1 + $0x3a0] sm:$0xff]   ;;  %v8367_v21 = vld [vmem:[%s10838_s1 + $0x368] sm:$0xff]  }
  0x45   :  { %7499 = vmatprep.subr.bf16.mxu0 %v8319_v24  ;;  %7520 = vmatpush3.bf16.msra.mxu1 %v8318_v22  ;;  %v8368_v22 = vld [vmem:[%s10838_s1 + $0x3e8] sm:$0xff]  }
  0x46   :  { %7521 = vmatprep.subr.bf16.mxu1 %v8320_v25  ;;  %5365 = vmatprep.mubr.bf16.mxu0 %v1290_v62  ;;  %v8369_v23 = vld [vmem:[%s10838_s1 + $0x328] sm:$0xff]   ;;  %v8371_v25 = vld [vmem:[%s10838_s1 + $0x370] sm:$0xff]  }
  0x47   :  { %5405 = vmatprep.mubr.bf16.mxu1 %v1300_v3  ;;  %v8370_v24 = vld [vmem:[%s10838_s1 + $0x3a8] sm:$0xff]   ;;  %v8406_v62 = vld [vmem:[%s10838_s1 + $0x430] sm:$0xff]  }
  0x48   :  { %7500 = vmatpush3.bf16.msra.mxu0 %v8321_v26  ;;  %v8372_v26 = vld [vmem:[%s10838_s1 + $0x3f0] sm:$0xff]  }
  0x49   :  { %7501 = vmatprep.subr.bf16.mxu0 %v8323_v28  ;;  %7522 = vmatpush3.bf16.msra.mxu1 %v8322_v27  ;;  %v8373_v27 = vld [vmem:[%s10838_s1 + $0x330] sm:$0xff]  }
  0x4a   :  { %7523 = vmatprep.subr.bf16.mxu1 %v8324_v29  ;;  %v8374_v28 = vld [vmem:[%s10838_s1 + $0x3b0] sm:$0xff]   ;;  %v8375_v29 = vld [vmem:[%s10838_s1 + $0x378] sm:$0xff]  }
  0x4b   :  { %v29_v3 = vld [vmem:[%s10839_s0 + $0x10] sm:$0xff] }
  0x4c   :  { %7502 = vmatpush3.bf16.msra.mxu0 %v8325_v30  ;;  %v8376_v30 = vld [vmem:[%s10838_s1 + $0x3f8] sm:$0xff]  }
  0x4d   :  { %7503 = vmatprep.subr.bf16.mxu0 %v8327_v32  ;;  %7524 = vmatpush3.bf16.msra.mxu1 %v8326_v31  ;;  %v8377_v31 = vld [vmem:[%s10838_s1 + $0x338] sm:$0xff]  }
  0x4e   :  { %7525 = vmatprep.subr.bf16.mxu1 %v8328_v33  ;;  %v8378_v32 = vld [vmem:[%s10838_s1 + $0x3b8] sm:$0xff]   ;;  %v1283_v33 = vrot.slane %v9206_v60, %v8980_v35  ;;  %v8404_v60 = vld [vmem:[%s10838_s1 + $0x470] sm:$0xff]  }
  0x50   :  { %7504 = vmatpush3.bf16.msra.mxu0 %v8329_v34  ;;  %v8380_v34 = vld [vmem:[%s10838_s1 + $0x440] sm:$0xff]  }
  0x51   :  { %7505 = vmatprep.subr.bf16.mxu0 %v8331_v37  ;;  %7526 = vmatpush3.bf16.msra.mxu1 %v8330_v36  ;;  %v8381_v36 = vld [vmem:[%s10838_s1 + $0x4c0] sm:$0xff]  }
  0x52   :  { %7527 = vmatprep.subr.bf16.mxu1 %v8332_v38  ;;  %v8382_v37 = vld [vmem:[%s10838_s1 + $0x400] sm:$0xff]  }
  0x53   :  { %v8383_v38 = vld [vmem:[%s10838_s1 + $0x480] sm:$0xff]  }
  0x54   :  { %7506 = vmatpush3.bf16.msra.mxu0 %v8333_v39  ;;  %v1299_v39 = vcombine.high %v1283_v33, %v1283_v33 }
  0x55   :  { %7507 = vmatprep.subr.bf16.mxu0 %v8335_v41  ;;  %7528 = vmatpush3.bf16.msra.mxu1 %v8334_v40  ;;  %v8384_v40 = vld [vmem:[%s10838_s1 + $0x448] sm:$0xff]  }
  0x56   :  { %7529 = vmatprep.subr.bf16.mxu1 %v8336_v42  ;;  %v8385_v41 = vld [vmem:[%s10838_s1 + $0x4c8] sm:$0xff]  }
  0x57   :  { %v8386_v42 = vld [vmem:[%s10838_s1 + $0x408] sm:$0xff]  }
  0x58   :  { %7508 = vmatpush3.bf16.msra.mxu0 %v8337_v43  ;;  %v8387_v43 = vld [vmem:[%s10838_s1 + $0x488] sm:$0xff]  }
  0x59   :  { %7509 = vmatprep.subr.bf16.mxu0 %v8339_v45  ;;  %7530 = vmatpush3.bf16.msra.mxu1 %v8338_v44  ;;  %v8388_v44 = vld [vmem:[%s10838_s1 + $0x450] sm:$0xff]  }
  0x5a   :  { %7531 = vmatprep.subr.bf16.mxu1 %v8340_v46  ;;  %v8389_v45 = vld [vmem:[%s10838_s1 + $0x4d0] sm:$0xff]  }
  0x5b   :  { %v8390_v46 = vld [vmem:[%s10838_s1 + $0x410] sm:$0xff]  }
  0x5c   :  { %7510 = vmatpush3.bf16.msra.mxu0 %v8341_v47  ;;  %v8391_v47 = vld [vmem:[%s10838_s1 + $0x490] sm:$0xff]  }
  0x5d   :  { %7511 = vmatprep.subr.bf16.mxu0 %v8343_v49  ;;  %7532 = vmatpush3.bf16.msra.mxu1 %v8342_v48  ;;  %v8392_v48 = vld [vmem:[%s10838_s1 + $0x458] sm:$0xff]  }
  0x5e   :  { %7533 = vmatprep.subr.bf16.mxu1 %v8344_v50  ;;  %v8393_v49 = vld [vmem:[%s10838_s1 + $0x4d8] sm:$0xff]  }
  0x5f   :  { %v8394_v50 = vld [vmem:[%s10838_s1 + $0x418] sm:$0xff]  }
  0x60   :  { %7512 = vmatpush3.bf16.msra.mxu0 %v8345_v51  ;;  %v8395_v51 = vld [vmem:[%s10838_s1 + $0x498] sm:$0xff]  }
  0x61   :  { %7541 = vmatprep.subr.bf16.mxu0 %v8347_v56  ;;  %7534 = vmatpush3.bf16.msra.mxu1 %v8346_v53  ;;  %v8397_v53 = vld [vmem:[%s10838_s1 + $0x4e0] sm:$0xff]   ;;  %v8400_v56 = vld [vmem:[%s10838_s1 + $0x468] sm:$0xff]  }
  0x62   :  { %7563 = vmatprep.subr.bf16.mxu1 %v8348_v59  ;;  %v8403_v59 = vld [vmem:[%s10838_s1 + $0x4a8] sm:$0xff]  }
  0x63   :  { %5366 = vmatmul.mubr.bf16.vlgmr.msra.gmra.mrb[8].mxu0 %v1276_v58  ;;  %v8402_v58 = vld [vmem:[%s10838_s1 + $0x428] sm:$0xff]  }
  0x64   :  { %7542 = vmatpush3.bf16.msra.mxu0 %v8349_v61  ;;  %5406 = vmatmul.mubr.bf16.vlgmr.msra.gmra.mrb[8].mxu1 %v1298_v1  ;;  %v8405_v61 = vld [vmem:[%s10838_s1 + $0x4f0] sm:$0xff]   ;;  %v8409_v1 = vld [vmem:[%s10838_s1 + $0x4f8] sm:$0xff]  }
  0x65   :  { %7543 = vmatprep.subr.bf16.mxu0 %v8351_v2  ;;  %7564 = vmatpush3.bf16.msra.mxu1 %v8350_v63  ;;  %v8407_v63 = vld [vmem:[%s10838_s1 + $0x4b0] sm:$0xff]   ;;  %v8410_v2 = vld [vmem:[%s10838_s1 + $0x438] sm:$0xff]  }
  0x66   :  { %5445 = vmatprep.mubr.bf16.mxu0 %v1297_v5  ;;  %7565 = vmatprep.subr.bf16.mxu1 %v8352_v4  ;;  %v8411_v4 = vld [vmem:[%s10838_s1 + $0x4b8] sm:$0xff]   ;;  %v1309_v5 = vrot.slane %v29_v3, %v8980_v35 }
  0x67   :  { %5485 = vmatprep.mubr.bf16.mxu1 %v1301_v8 }
  0x68   :  { %7544 = vmatpush3.bf16.msra.mxu0 %v8353_v6  ;;  %v1302_v6 = vcombine.high %v29_v3, %v29_v3  ;;  %v1317_v8 = vcombine.high %v1309_v5, %v1309_v5  ;;  %v8461_v3 = vld [vmem:[%s10838_s1 + $0x660] sm:$0xff]  }
  0x69   :  { %7545 = vmatprep.subr.bf16.mxu0 %v8355_v9  ;;  %7566 = vmatpush3.bf16.msra.mxu1 %v8354_v7  ;;  %v8412_v7 = vld [vmem:[%s10838_s1 + $0x540] sm:$0xff]   ;;  %v1325_v9 = vrot.slane %v1309_v5, %v8980_v35 }
  0x6a   :  { %7567 = vmatprep.subr.bf16.mxu1 %v8356_v10  ;;  %v8413_v10 = vld [vmem:[%s10838_s1 + $0x5c0] sm:$0xff]  }
  0x6b   :  { %v8463_v5 = vld [vmem:[%s10838_s1 + $0x620] sm:$0xff]  }
  0x6c   :  { %7546 = vmatpush3.bf16.msra.mxu0 %v8357_v11  ;;  %v9412_v11 = vrot.slane %v1302_v6, %v8980_v35  ;;  %v8464_v6 = vld [vmem:[%s10838_s1 + $0x6a0] sm:$0xff]  }
  0x6d   :  { %7547 = vmatprep.subr.bf16.mxu0 %v8359_v13  ;;  %7568 = vmatpush3.bf16.msra.mxu1 %v8358_v12  ;;  %v8414_v12 = vld [vmem:[%s10838_s1 + $0x500] sm:$0xff]   ;;  %v1339_v13 = vrot.slane %v1317_v8, %v8980_v35  ;;  %v8466_v8 = vld [vmem:[%s10838_s1 + $0x6e8] sm:$0xff]  }
  0x6e   :  { %7569 = vmatprep.subr.bf16.mxu1 %v8360_v14  ;;  %v8415_v14 = vld [vmem:[%s10838_s1 + $0x580] sm:$0xff]  }
  0x70   :  { %7548 = vmatpush3.bf16.msra.mxu0 %v8361_v15  ;;  %v1318_v15 = vcombine.high %v9412_v11, %v9412_v11 }
  0x71   :  { %7549 = vmatprep.subr.bf16.mxu0 %v8363_v17  ;;  %7570 = vmatpush3.bf16.msra.mxu1 %v8362_v16  ;;  %v1347_v16 = vcombine.high %v1325_v9, %v1325_v9  ;;  %v8416_v17 = vld [vmem:[%s10838_s1 + $0x548] sm:$0xff]  }
  0x72   :  { %7571 = vmatprep.subr.bf16.mxu1 %v8364_v18  ;;  %v1349_v18 = vcombine.high %v1339_v13, %v1339_v13 }
  0x74   :  { %7550 = vmatpush3.bf16.msra.mxu0 %v8365_v19  ;;  %v8417_v19 = vld [vmem:[%s10838_s1 + $0x5c8] sm:$0xff]  }
  0x75   :  { %7551 = vmatprep.subr.bf16.mxu0 %v8367_v21  ;;  %7572 = vmatpush3.bf16.msra.mxu1 %v8366_v20  ;;  %v1346_v20 = vrot.slane %v1318_v15, %v8980_v35  ;;  %v8418_v21 = vld [vmem:[%s10838_s1 + $0x508] sm:$0xff]   ;;  %v8473_v15 = vld [vmem:[%s10838_s1 + $0x678] sm:$0xff]  }
  0x76   :  { %7573 = vmatprep.subr.bf16.mxu1 %v8368_v22  ;;  %v8419_v22 = vld [vmem:[%s10838_s1 + $0x588] sm:$0xff]  }
  0x78   :  { %7552 = vmatpush3.bf16.msra.mxu0 %v8369_v23  ;;  %v1350_v23 = vcombine.high %v1346_v20, %v1346_v20 }
  0x79   :  { %7553 = vmatprep.subr.bf16.mxu0 %v8371_v25  ;;  %7574 = vmatpush3.bf16.msra.mxu1 %v8370_v24  ;;  %v8420_v24 = vld [vmem:[%s10838_s1 + $0x550] sm:$0xff]  }
  0x7a   :  { %7575 = vmatprep.subr.bf16.mxu1 %v8372_v26  ;;  %v8421_v25 = vld [vmem:[%s10838_s1 + $0x5d0] sm:$0xff]  }
  0x7b   :  { %v8422_v26 = vld [vmem:[%s10838_s1 + $0x510] sm:$0xff]  }
  0x7c   :  { %7554 = vmatpush3.bf16.msra.mxu0 %v8373_v27  ;;  %v8423_v27 = vld [vmem:[%s10838_s1 + $0x590] sm:$0xff]  }
  0x7d   :  { %7555 = vmatprep.subr.bf16.mxu0 %v8375_v29  ;;  %7576 = vmatpush3.bf16.msra.mxu1 %v8374_v28  ;;  %v8424_v28 = vld [vmem:[%s10838_s1 + $0x558] sm:$0xff]  }
  0x7e   :  { %7577 = vmatprep.subr.bf16.mxu1 %v8376_v30  ;;  %v8425_v29 = vld [vmem:[%s10838_s1 + $0x5d8] sm:$0xff]  }
  0x7f   :  { %v8426_v30 = vld [vmem:[%s10838_s1 + $0x518] sm:$0xff]  }
  0x80   :  { %7556 = vmatpush3.bf16.msra.mxu0 %v8377_v31  ;;  %v8427_v31 = vld [vmem:[%s10838_s1 + $0x598] sm:$0xff]  }
  0x81   :  { %7585 = vmatprep.subr.bf16.mxu0 %v8380_v34  ;;  %7578 = vmatpush3.bf16.msra.mxu1 %v8378_v32  ;;  %v8428_v32 = vld [vmem:[%s10838_s1 + $0x560] sm:$0xff]  }
  0x82   :  { %7607 = vmatprep.subr.bf16.mxu1 %v8381_v36  ;;  %v8430_v34 = vld [vmem:[%s10838_s1 + $0x520] sm:$0xff]  }
  0x83   :  { %5446 = vmatmul.mubr.bf16.vlgmr.msra.gmra.mrb[12].mxu0 %v1283_v33  ;;  %v8429_v33 = vld [vmem:[%s10838_s1 + $0x5e0] sm:$0xff]  }
  0x84   :  { %7586 = vmatpush3.bf16.msra.mxu0 %v8382_v37  ;;  %5486 = vmatmul.mubr.bf16.vlgmr.msra.gmra.mrb[12].mxu1 %v1299_v39  ;;  %v8431_v36 = vld [vmem:[%s10838_s1 + $0x5a0] sm:$0xff]   ;;  %v8432_v37 = vld [vmem:[%s10838_s1 + $0x568] sm:$0xff]  }
  0x85   :  { %7587 = vmatprep.subr.bf16.mxu0 %v8384_v40  ;;  %7608 = vmatpush3.bf16.msra.mxu1 %v8383_v38  ;;  %v8433_v38 = vld [vmem:[%s10838_s1 + $0x5e8] sm:$0xff]  }
  0x86   :  { %7609 = vmatprep.subr.bf16.mxu1 %v8385_v41  ;;  %5525 = vmatprep.mubr.bf16.mxu0 %v1339_v13  ;;  %v8434_v39 = vld [vmem:[%s10838_s1 + $0x528] sm:$0xff]   ;;  %v8436_v41 = vld [vmem:[%s10838_s1 + $0x570] sm:$0xff]  }
  0x87   :  { %5565 = vmatprep.mubr.bf16.mxu1 %v1349_v18  ;;  %v8435_v40 = vld [vmem:[%s10838_s1 + $0x5a8] sm:$0xff]   ;;  %v8471_v13 = vld [vmem:[%s10838_s1 + $0x630] sm:$0xff]   ;;  %v30_v18 = vld [vmem:[%s10839_s0 + $0x18] sm:$0xff] }
  0x88   :  { %7588 = vmatpush3.bf16.msra.mxu0 %v8386_v42  ;;  %v8437_v42 = vld [vmem:[%s10838_s1 + $0x5f0] sm:$0xff]  }
  0x89   :  { %7589 = vmatprep.subr.bf16.mxu0 %v8388_v44  ;;  %7610 = vmatpush3.bf16.msra.mxu1 %v8387_v43  ;;  %v8438_v43 = vld [vmem:[%s10838_s1 + $0x530] sm:$0xff]  }
  0x8a   :  { %7611 = vmatprep.subr.bf16.mxu1 %v8389_v45  ;;  %v8439_v44 = vld [vmem:[%s10838_s1 + $0x5b0] sm:$0xff]   ;;  %v8440_v45 = vld [vmem:[%s10838_s1 + $0x578] sm:$0xff]  }
  0x8c   :  { %7590 = vmatpush3.bf16.msra.mxu0 %v8390_v46  ;;  %v8441_v46 = vld [vmem:[%s10838_s1 + $0x5f8] sm:$0xff]  }
  0x8d   :  { %7591 = vmatprep.subr.bf16.mxu0 %v8392_v48  ;;  %7612 = vmatpush3.bf16.msra.mxu1 %v8391_v47  ;;  %v8442_v47 = vld [vmem:[%s10838_s1 + $0x538] sm:$0xff]  }
  0x8e   :  { %7613 = vmatprep.subr.bf16.mxu1 %v8393_v49  ;;  %v8443_v48 = vld [vmem:[%s10838_s1 + $0x5b8] sm:$0xff]   ;;  %v1332_v49 = vrot.slane %v9412_v11, %v8980_v35  ;;  %v8469_v11 = vld [vmem:[%s10838_s1 + $0x670] sm:$0xff]  }
  0x90   :  { %7592 = vmatpush3.bf16.msra.mxu0 %v8394_v50  ;;  %v8445_v50 = vld [vmem:[%s10838_s1 + $0x640] sm:$0xff]  }
  0x91   :  { %7593 = vmatprep.subr.bf16.mxu0 %v8396_v52  ;;  %7614 = vmatpush3.bf16.msra.mxu1 %v8395_v51  ;;  %v8446_v51 = vld [vmem:[%s10838_s1 + $0x6c0] sm:$0xff]  }
  0x92   :  { %7615 = vmatprep.subr.bf16.mxu1 %v8397_v53  ;;  %v8447_v52 = vld [vmem:[%s10838_s1 + $0x600] sm:$0xff]  }
  0x93   :  { %v8448_v53 = vld [vmem:[%s10838_s1 + $0x680] sm:$0xff]  }
  0x94   :  { %7594 = vmatpush3.bf16.msra.mxu0 %v8398_v54  ;;  %v1348_v54 = vcombine.high %v1332_v49, %v1332_v49 }
  0x95   :  { %7595 = vmatprep.subr.bf16.mxu0 %v8400_v56  ;;  %7616 = vmatpush3.bf16.msra.mxu1 %v8399_v55  ;;  %v8449_v55 = vld [vmem:[%s10838_s1 + $0x648] sm:$0xff]  }
  0x96   :  { %7617 = vmatprep.subr.bf16.mxu1 %v8401_v57  ;;  %v8450_v56 = vld [vmem:[%s10838_s1 + $0x6c8] sm:$0xff]  }
  0x97   :  { %v8451_v57 = vld [vmem:[%s10838_s1 + $0x608] sm:$0xff]  }
  0x98   :  { %7596 = vmatpush3.bf16.msra.mxu0 %v8402_v58  ;;  %v8452_v58 = vld [vmem:[%s10838_s1 + $0x688] sm:$0xff]  }
  0x99   :  { %7597 = vmatprep.subr.bf16.mxu0 %v8404_v60  ;;  %7618 = vmatpush3.bf16.msra.mxu1 %v8403_v59  ;;  %v8453_v59 = vld [vmem:[%s10838_s1 + $0x650] sm:$0xff]  }
  0x9a   :  { %7619 = vmatprep.subr.bf16.mxu1 %v8405_v61  ;;  %v8454_v60 = vld [vmem:[%s10838_s1 + $0x6d0] sm:$0xff]  }
  0x9b   :  { %v8455_v61 = vld [vmem:[%s10838_s1 + $0x610] sm:$0xff]  }
  0x9c   :  { %7598 = vmatpush3.bf16.msra.mxu0 %v8406_v62  ;;  %v8456_v62 = vld [vmem:[%s10838_s1 + $0x690] sm:$0xff]  }
  0x9d   :  { %7599 = vmatprep.subr.bf16.mxu0 %v8408_v0  ;;  %7620 = vmatpush3.bf16.msra.mxu1 %v8407_v63  ;;  %v8457_v63 = vld [vmem:[%s10838_s1 + $0x658] sm:$0xff]  }
  0x9e   :  { %7621 = vmatprep.subr.bf16.mxu1 %v8409_v1  ;;  %v8458_v0 = vld [vmem:[%s10838_s1 + $0x6d8] sm:$0xff]  }
  0x9f   :  { %v8459_v1 = vld [vmem:[%s10838_s1 + $0x618] sm:$0xff]  }
  0xa0   :  { %7600 = vmatpush3.bf16.msra.mxu0 %v8410_v2  ;;  %v8460_v2 = vld [vmem:[%s10838_s1 + $0x698] sm:$0xff]  }
  0xa1   :  { %7629 = vmatprep.subr.bf16.mxu0 %v8412_v7  ;;  %7622 = vmatpush3.bf16.msra.mxu1 %v8411_v4  ;;  %v8462_v4 = vld [vmem:[%s10838_s1 + $0x6e0] sm:$0xff]   ;;  %v8465_v7 = vld [vmem:[%s10838_s1 + $0x668] sm:$0xff]  }
  0xa2   :  { %7651 = vmatprep.subr.bf16.mxu1 %v8413_v10  ;;  %v8468_v10 = vld [vmem:[%s10838_s1 + $0x6a8] sm:$0xff]  }
  0xa3   :  { %5526 = vmatmul.mubr.bf16.vlgmr.msra.gmra.mrb[16].mxu0 %v1325_v9  ;;  %v8467_v9 = vld [vmem:[%s10838_s1 + $0x628] sm:$0xff]  }
  0xa4   :  { %7630 = vmatpush3.bf16.msra.mxu0 %v8414_v12  ;;  %5566 = vmatmul.mubr.bf16.vlgmr.msra.gmra.mrb[16].mxu1 %v1347_v16  ;;  %v8470_v12 = vld [vmem:[%s10838_s1 + $0x6f0] sm:$0xff]   ;;  %v8474_v16 = vld [vmem:[%s10838_s1 + $0x6f8] sm:$0xff]  }
  0xa5   :  { %7631 = vmatprep.subr.bf16.mxu0 %v8416_v17  ;;  %7652 = vmatpush3.bf16.msra.mxu1 %v8415_v14  ;;  %v8472_v14 = vld [vmem:[%s10838_s1 + $0x6b0] sm:$0xff]   ;;  %v8475_v17 = vld [vmem:[%s10838_s1 + $0x638] sm:$0xff]  }
  0xa6   :  { %5605 = vmatprep.mubr.bf16.mxu0 %v1346_v20  ;;  %7653 = vmatprep.subr.bf16.mxu1 %v8417_v19  ;;  %v1358_v19 = vrot.slane %v30_v18, %v8980_v35  ;;  %v8477_v20 = vld [vmem:[%s10838_s1 + $0x740] sm:$0xff]  }
  0xa7   :  { %5645 = vmatprep.mubr.bf16.mxu1 %v1350_v23 }
  0xa8   :  { %7632 = vmatpush3.bf16.msra.mxu0 %v8418_v21  ;;  %v1351_v21 = vcombine.high %v30_v18, %v30_v18  ;;  %v1366_v23 = vcombine.high %v1358_v19, %v1358_v19 }
  0xa9   :  { %7633 = vmatprep.subr.bf16.mxu0 %v8420_v24  ;;  %7654 = vmatpush3.bf16.msra.mxu1 %v8419_v22  ;;  %v8476_v22 = vld [vmem:[%s10838_s1 + $0x6b8] sm:$0xff]   ;;  %v1374_v24 = vrot.slane %v1358_v19, %v8980_v35  ;;  %v8514_v19 = vld [vmem:[%s10838_s1 + $0x848] sm:$0xff]  }
  0xaa   :  { %7655 = vmatprep.subr.bf16.mxu1 %v8421_v25  ;;  %v8478_v25 = vld [vmem:[%s10838_s1 + $0x7c0] sm:$0xff]  }
  0xac   :  { %7634 = vmatpush3.bf16.msra.mxu0 %v8422_v26  ;;  %v9618_v26 = vrot.slane %v1351_v21, %v8980_v35  ;;  %v8516_v21 = vld [vmem:[%s10838_s1 + $0x808] sm:$0xff]  }
  0xad   :  { %7635 = vmatprep.subr.bf16.mxu0 %v8424_v28  ;;  %7656 = vmatpush3.bf16.msra.mxu1 %v8423_v27  ;;  %v1388_v27 = vrot.slane %v1366_v23, %v8980_v35  ;;  %v8479_v28 = vld [vmem:[%s10838_s1 + $0x700] sm:$0xff]   ;;  %v8518_v23 = vld [vmem:[%s10838_s1 + $0x850] sm:$0xff]  }
  0xae   :  { %7657 = vmatprep.subr.bf16.mxu1 %v8425_v29  ;;  %v1367_v29 = vcombine.high %v9618_v26, %v9618_v26 }
  0xb0   :  { %7636 = vmatpush3.bf16.msra.mxu0 %v8426_v30  ;;  %v1396_v30 = vcombine.high %v1374_v24, %v1374_v24 }
  0xb1   :  { %7637 = vmatprep.subr.bf16.mxu0 %v8428_v32  ;;  %7658 = vmatpush3.bf16.msra.mxu1 %v8427_v31  ;;  %v8481_v31 = vld [vmem:[%s10838_s1 + $0x748] sm:$0xff]   ;;  %v1398_v32 = vcombine.high %v1388_v27, %v1388_v27 }
  0xb2   :  { %7659 = vmatprep.subr.bf16.mxu1 %v8429_v33  ;;  %v8480_v33 = vld [vmem:[%s10838_s1 + $0x780] sm:$0xff]  }
  0xb4   :  { %7638 = vmatpush3.bf16.msra.mxu0 %v8430_v34  ;;  %v1395_v34 = vrot.slane %v1367_v29, %v8980_v35  ;;  %v8524_v29 = vld [vmem:[%s10838_s1 + $0x818] sm:$0xff]  }
  0xb5   :  { %7639 = vmatprep.subr.bf16.mxu0 %v8432_v37  ;;  %7660 = vmatpush3.bf16.msra.mxu1 %v8431_v36  ;;  %v8482_v36 = vld [vmem:[%s10838_s1 + $0x7c8] sm:$0xff]  }
  0xb6   :  { %7661 = vmatprep.subr.bf16.mxu1 %v8433_v38  ;;  %v8483_v37 = vld [vmem:[%s10838_s1 + $0x708] sm:$0xff]   ;;  %v1399_v38 = vcombine.high %v1395_v34, %v1395_v34 }
  0xb8   :  { %7640 = vmatpush3.bf16.msra.mxu0 %v8434_v39  ;;  %v8485_v39 = vld [vmem:[%s10838_s1 + $0x750] sm:$0xff]  }
  0xb9   :  { %7641 = vmatprep.subr.bf16.mxu0 %v8436_v41  ;;  %7662 = vmatpush3.bf16.msra.mxu1 %v8435_v40  ;;  %v8484_v40 = vld [vmem:[%s10838_s1 + $0x788] sm:$0xff]   ;;  %v8486_v41 = vld [vmem:[%s10838_s1 + $0x7d0] sm:$0xff]  }
  0xba   :  { %7663 = vmatprep.subr.bf16.mxu1 %v8437_v42  ;;  %v8487_v42 = vld [vmem:[%s10838_s1 + $0x710] sm:$0xff]  }
  0xbc   :  { %7642 = vmatpush3.bf16.msra.mxu0 %v8438_v43  ;;  %v8489_v43 = vld [vmem:[%s10838_s1 + $0x758] sm:$0xff]  }
  0xbd   :  { %7643 = vmatprep.subr.bf16.mxu0 %v8440_v45  ;;  %7664 = vmatpush3.bf16.msra.mxu1 %v8439_v44  ;;  %v8488_v44 = vld [vmem:[%s10838_s1 + $0x790] sm:$0xff]   ;;  %v8490_v45 = vld [vmem:[%s10838_s1 + $0x7d8] sm:$0xff]  }
  0xbe   :  { %7665 = vmatprep.subr.bf16.mxu1 %v8441_v46  ;;  %v8491_v46 = vld [vmem:[%s10838_s1 + $0x718] sm:$0xff]  }
  0xc0   :  { %7644 = vmatpush3.bf16.msra.mxu0 %v8442_v47  ;;  %v8493_v47 = vld [vmem:[%s10838_s1 + $0x760] sm:$0xff]  }
  0xc1   :  { %7673 = vmatprep.subr.bf16.mxu0 %v8445_v50  ;;  %7666 = vmatpush3.bf16.msra.mxu1 %v8443_v48  ;;  %v8492_v48 = vld [vmem:[%s10838_s1 + $0x798] sm:$0xff]   ;;  %v8495_v50 = vld [vmem:[%s10838_s1 + $0x720] sm:$0xff]  }
  0xc2   :  { %7695 = vmatprep.subr.bf16.mxu1 %v8446_v51  ;;  %v8497_v51 = vld [vmem:[%s10838_s1 + $0x768] sm:$0xff]  }
  0xc3   :  { %5606 = vmatmul.mubr.bf16.vlgmr.msra.gmra.mrb[20].mxu0 %v1332_v49  ;;  %v8494_v49 = vld [vmem:[%s10838_s1 + $0x7e0] sm:$0xff]  }
  0xc4   :  { %7674 = vmatpush3.bf16.msra.mxu0 %v8447_v52  ;;  %5646 = vmatmul.mubr.bf16.vlgmr.msra.gmra.mrb[20].mxu1 %v1348_v54  ;;  %v8496_v52 = vld [vmem:[%s10838_s1 + $0x7a0] sm:$0xff]  }
  0xc5   :  { %7675 = vmatprep.subr.bf16.mxu0 %v8449_v55  ;;  %7696 = vmatpush3.bf16.msra.mxu1 %v8448_v53  ;;  %v8498_v53 = vld [vmem:[%s10838_s1 + $0x7e8] sm:$0xff]   ;;  %v6817_v54 = vld [vmem:[%s10840_s2] ss:$0 sm:$0xff] }
  0xc6   :  { %7697 = vmatprep.subr.bf16.mxu1 %v8450_v56  ;;  %5685 = vmatprep.mubr.bf16.mxu0 %v1388_v27  ;;  %v8499_v55 = vld [vmem:[%s10838_s1 + $0x728] sm:$0xff]   ;;  %v8522_v27 = vld [vmem:[%s10838_s1 + $0x858] sm:$0xff]  }
  0xc7   :  { %5725 = vmatprep.mubr.bf16.mxu1 %v1398_v32  ;;  %v8527_v32 = vld [vmem:[%s10838_s1 + $0x8e0] sm:$0xff]  }
  0xc8   :  { %7676 = vmatpush3.bf16.msra.mxu0 %v8451_v57  ;;  %v8501_v57 = vld [vmem:[%s10838_s1 + $0x770] sm:$0xff]  }
  0xc9   :  { %7677 = vmatprep.subr.bf16.mxu0 %v8453_v59  ;;  %7698 = vmatpush3.bf16.msra.mxu1 %v8452_v58  ;;  %v8500_v59 = vld [vmem:[%s10838_s1 + $0x7a8] sm:$0xff]  }
  0xca   :  { %7699 = vmatprep.subr.bf16.mxu1 %v8454_v60 }
  0xcc   :  { %7678 = vmatpush3.bf16.msra.mxu0 %v8455_v61 }
  0xcd   :  { %7679 = vmatprep.subr.bf16.mxu0 %v8457_v63  ;;  %7700 = vmatpush3.bf16.msra.mxu1 %v8456_v62  ;;  %v8502_v63 = vld [vmem:[%s10838_s1 + $0x7f0] sm:$0xff]  }
  0xce   :  { %7701 = vmatprep.subr.bf16.mxu1 %v8458_v0  ;;  %v8503_v0 = vld [vmem:[%s10838_s1 + $0x730] sm:$0xff]  }
  0xd0   :  { %7680 = vmatpush3.bf16.msra.mxu0 %v8459_v1 }
  0xd1   :  { %7681 = vmatprep.subr.bf16.mxu0 %v8461_v3  ;;  %7702 = vmatpush3.bf16.msra.mxu1 %v8460_v2  ;;  %v8504_v3 = vld [vmem:[%s10838_s1 + $0x7b0] sm:$0xff]  }
  0xd2   :  { %7703 = vmatprep.subr.bf16.mxu1 %v8462_v4 }
  0xd4   :  { %7682 = vmatpush3.bf16.msra.mxu0 %v8463_v5 }
  0xd5   :  { %7683 = vmatprep.subr.bf16.mxu0 %v8465_v7  ;;  %7704 = vmatpush3.bf16.msra.mxu1 %v8464_v6  ;;  %v8505_v7 = vld [vmem:[%s10838_s1 + $0x778] sm:$0xff]  }
  0xd6   :  { %7705 = vmatprep.subr.bf16.mxu1 %v8466_v8 }
  0xd8   :  { %7684 = vmatpush3.bf16.msra.mxu0 %v8467_v9  ;;  %v8506_v9 = vld [vmem:[%s10838_s1 + $0x7f8] sm:$0xff]  }
  0xd9   :  { %7685 = vmatprep.subr.bf16.mxu0 %v8469_v11  ;;  %7706 = vmatpush3.bf16.msra.mxu1 %v8468_v10  ;;  %v8507_v11 = vld [vmem:[%s10838_s1 + $0x738] sm:$0xff]  }
  0xda   :  { %7707 = vmatprep.subr.bf16.mxu1 %v8470_v12  ;;  %v8508_v12 = vld [vmem:[%s10838_s1 + $0x7b8] sm:$0xff]  }
  0xdc   :  { %7686 = vmatpush3.bf16.msra.mxu0 %v8471_v13  ;;  %v1381_v13 = vrot.slane %v9618_v26, %v8980_v35  ;;  %v8521_v26 = vld [vmem:[%s10838_s1 + $0x890] sm:$0xff]  }
  0xdd   :  { %7687 = vmatprep.subr.bf16.mxu0 %v8473_v15  ;;  %7708 = vmatpush3.bf16.msra.mxu1 %v8472_v14  ;;  %v8510_v14 = vld [vmem:[%s10838_s1 + $0x840] sm:$0xff]  }
  0xde   :  { %7709 = vmatprep.subr.bf16.mxu1 %v8474_v16  ;;  %v8511_v15 = vld [vmem:[%s10838_s1 + $0x8c0] sm:$0xff]   ;;  %v1397_v18 = vcombine.high %v1381_v13, %v1381_v13 }
  0xdf   :  { %v8512_v16 = vld [vmem:[%s10838_s1 + $0x800] sm:$0xff]  }
  0xe0   :  { %7688 = vmatpush3.bf16.msra.mxu0 %v8475_v17  ;;  %v8513_v17 = vld [vmem:[%s10838_s1 + $0x880] sm:$0xff]  }
  0xe1   :  { %7717 = vmatprep.subr.bf16.mxu0 %v8477_v20  ;;  %7710 = vmatpush3.bf16.msra.mxu1 %v8476_v22  ;;  %v8515_v20 = vld [vmem:[%s10838_s1 + $0x8c8] sm:$0xff]  }
  0xe2   :  { %7739 = vmatprep.subr.bf16.mxu1 %v8478_v25  ;;  %v8517_v22 = vld [vmem:[%s10838_s1 + $0x888] sm:$0xff]   ;;  %v8520_v25 = vld [vmem:[%s10838_s1 + $0x810] sm:$0xff]  }
  0xe3   :  { %5686 = vmatmul.mubr.bf16.vlgmr.msra.gmra.mrb[24].mxu0 %v1374_v24  ;;  %v8519_v24 = vld [vmem:[%s10838_s1 + $0x8d0] sm:$0xff]  }
  0xe4   :  { %7718 = vmatpush3.bf16.msra.mxu0 %v8479_v28  ;;  %5726 = vmatmul.mubr.bf16.vlgmr.msra.gmra.mrb[24].mxu1 %v1396_v30  ;;  %v8523_v28 = vld [vmem:[%s10838_s1 + $0x8d8] sm:$0xff]  }
  0xe5   :  { %7719 = vmatprep.subr.bf16.mxu0 %v8481_v31  ;;  %7740 = vmatpush3.bf16.msra.mxu1 %v8480_v33  ;;  %v8525_v30 = vld [vmem:[%s10838_s1 + $0x898] sm:$0xff]   ;;  %v8526_v31 = vld [vmem:[%s10838_s1 + $0x860] sm:$0xff]  }
  0xe6   :  { %5765 = vmatprep.mubr.bf16.mxu0 %v1395_v34  ;;  %7741 = vmatprep.subr.bf16.mxu1 %v8482_v36  ;;  %v8528_v33 = vld [vmem:[%s10838_s1 + $0x820] sm:$0xff]   ;;  %v8530_v36 = vld [vmem:[%s10838_s1 + $0x868] sm:$0xff]  }
  0xe7   :  { %5805 = vmatprep.mubr.bf16.mxu1 %v1399_v38  ;;  %v8529_v34 = vld [vmem:[%s10838_s1 + $0x8a0] sm:$0xff]   ;;  %v8532_v38 = vld [vmem:[%s10838_s1 + $0x828] sm:$0xff]  }
  0xe8   :  { %7720 = vmatpush3.bf16.msra.mxu0 %v8483_v37  ;;  %v8531_v37 = vld [vmem:[%s10838_s1 + $0x8e8] sm:$0xff]  }
  0xe9   :  { %7721 = vmatprep.subr.bf16.mxu0 %v8485_v39  ;;  %7742 = vmatpush3.bf16.msra.mxu1 %v8484_v40  ;;  %v8533_v39 = vld [vmem:[%s10838_s1 + $0x8a8] sm:$0xff]  }
  0xea   :  { %7743 = vmatprep.subr.bf16.mxu1 %v8486_v41  ;;  %v8534_v41 = vld [vmem:[%s10838_s1 + $0x870] sm:$0xff]  }
  0xec   :  { %7722 = vmatpush3.bf16.msra.mxu0 %v8487_v42 }
  0xed   :  { %7723 = vmatprep.subr.bf16.mxu0 %v8489_v43  ;;  %7744 = vmatpush3.bf16.msra.mxu1 %v8488_v44  ;;  %v8535_v43 = vld [vmem:[%s10838_s1 + $0x8f0] sm:$0xff]  }
  0xee   :  { %7745 = vmatprep.subr.bf16.mxu1 %v8490_v45 }
  0xf0   :  { %7724 = vmatpush3.bf16.msra.mxu0 %v8491_v46 }
  0xf1   :  { %7725 = vmatprep.subr.bf16.mxu0 %v8493_v47  ;;  %7746 = vmatpush3.bf16.msra.mxu1 %v8492_v48 }
  0xf2   :  { %7747 = vmatprep.subr.bf16.mxu1 %v8494_v49  ;;  %v8536_v49 = vld [vmem:[%s10838_s1 + $0x830] sm:$0xff]  }
  0xf4   :  { %7726 = vmatpush3.bf16.msra.mxu0 %v8495_v50  ;;  %v8537_v50 = vld [vmem:[%s10838_s1 + $0x8b0] sm:$0xff]  }
  0xf5   :  { %7727 = vmatprep.subr.bf16.mxu0 %v8497_v51  ;;  %7748 = vmatpush3.bf16.msra.mxu1 %v8496_v52 }
  0xf6   :  { %v7425_v56 = vpop.f32.mrb[0].mxu0  ;;  %7749 = vmatprep.subr.bf16.mxu1 %v8498_v53 }
  0xf7   :  { %v7426_v58 = vpop.f32.mrb[1].mxu0  ;;  %v7447_v60 = vpop.f32.mrb[0].mxu1 }
  0xf8   :  { %v7427_v61 = vadd.f32 %v7426_v58, %v7425_v56  ;;  %v7428_v62 = vpop.f32.mrb[2].mxu0  ;;  %v7448_v1 = vpop.f32.mrb[1].mxu1  ;;  %7728 = vmatpush3.bf16.msra.mxu0 %v8499_v55  ;;  %v8539_v56 = vld [vmem:[%s10838_s1 + $0x8f8] sm:$0xff]  }
  0xf9   :  { %v7429_v2 = vpop.f32.mrb[3].mxu0  ;;  %v7449_v5 = vadd.f32 %v7448_v1, %v7447_v60  ;;  %v7450_v6 = vpop.f32.mrb[2].mxu1  ;;  %7729 = vmatprep.subr.bf16.mxu0 %v8501_v57  ;;  %7750 = vmatpush3.bf16.msra.mxu1 %v8500_v59  ;;  %v8540_v58 = vld [vmem:[%s10838_s1 + $0x838] sm:$0xff]   ;;  %v31_v59 = vld [vmem:[%s10839_s0 + $0x20] sm:$0xff] }
  0xfa   :  { %v5208_v4 = vadd.f32 %v7427_v61, %v6817_v54  ;;  %v7451_v8 = vpop.f32.mrb[3].mxu1  ;;  %7751 = vmatprep.subr.bf16.mxu1 %v8502_v63  ;;  %v8538_v54 = vld [vmem:[%s10838_s1 + $0x878] sm:$0xff]   ;;  %v1407_v60 = vrot.slane %v31_v59, %v8980_v35  ;;  %v8542_v61 = vld [vmem:[%s10838_s1 + $0x940] sm:$0xff]   ;;  %v1400_v62 = vcombine.high %v31_v59, %v31_v59  ;;  %v8579_v59 = vld [vmem:[%s10838_s1 + $0xa48] sm:$0xff]  }
  0xfb   :  { %v8541_v63 = vld [vmem:[%s10838_s1 + $0x8b8] sm:$0xff]   ;;  %v8543_v2 = vld [vmem:[%s10838_s1 + $0x9c0] sm:$0xff]  }
  0xfc   :  { %v9711_v10 = vadd.f32 %v7449_v5, %v5208_v4  ;;  %7730 = vmatpush3.bf16.msra.mxu0 %v8503_v0  ;;  %v1415_v0 = vcombine.high %v1407_v60, %v1407_v60  ;;  %v1423_v1 = vrot.slane %v1407_v60, %v8980_v35  ;;  %v8544_v4 = vld [vmem:[%s10838_s1 + $0x900] sm:$0xff]   ;;  %v8580_v60 = vld [vmem:[%s10838_s1 + $0xac8] sm:$0xff]  }
  0xfd   :  { %7731 = vmatprep.subr.bf16.mxu0 %v8505_v7  ;;  %7752 = vmatpush3.bf16.msra.mxu1 %v8504_v3  ;;  %v9832_v3 = vrot.slane %v1400_v62, %v8980_v35  ;;  %v8545_v6 = vld [vmem:[%s10838_s1 + $0x980] sm:$0xff]   ;;  %v8582_v62 = vld [vmem:[%s10838_s1 + $0xa88] sm:$0xff]  }
  0xfe   :  { %7753 = vmatprep.subr.bf16.mxu1 %v8506_v9  ;;  %v1437_v5 = vrot.slane %v1415_v0, %v8980_v35  ;;  %v1445_v8 = vcombine.high %v1423_v1, %v1423_v1  ;;  %v8546_v9 = vld [vmem:[%s10838_s1 + $0x948] sm:$0xff]   ;;  %v8584_v0 = vld [vmem:[%s10838_s1 + $0xad0] sm:$0xff]  }
  0xff   :  { %v1416_v7 = vcombine.high %v9832_v3, %v9832_v3 }
 0x100   :  { %7732 = vmatpush3.bf16.msra.mxu0 %v8507_v11  ;;  %v8547_v11 = vld [vmem:[%s10838_s1 + $0x9c8] sm:$0xff]  }
 0x101   :  { %7761 = vmatprep.subr.bf16.mxu0 %v8510_v14  ;;  %7754 = vmatpush3.bf16.msra.mxu1 %v8508_v12  ;;  %v1444_v12 = vrot.slane %v1416_v7, %v8980_v35  ;;  %v8549_v14 = vld [vmem:[%s10838_s1 + $0x988] sm:$0xff]   ;;  %v8591_v7 = vld [vmem:[%s10838_s1 + $0xa60] sm:$0xff]  }
 0x102   :  { %7783 = vmatprep.subr.bf16.mxu1 %v8511_v15 }
 0x103   :  { %5766 = vmatmul.mubr.bf16.vlgmr.msra.gmra.mrb[28].mxu0 %v1381_v13  ;;  %v8548_v13 = vld [vmem:[%s10838_s1 + $0x908] sm:$0xff]   ;;  %v1448_v15 = vcombine.high %v1444_v12, %v1444_v12 }
 0x104   :  { %7762 = vmatpush3.bf16.msra.mxu0 %v8512_v16  ;;  %5806 = vmatmul.mubr.bf16.vlgmr.msra.gmra.mrb[28].mxu1 %v1397_v18  ;;  %v8550_v16 = vld [vmem:[%s10838_s1 + $0x950] sm:$0xff]  }
 0x105   :  { %7763 = vmatprep.subr.bf16.mxu0 %v8514_v19  ;;  %7784 = vmatpush3.bf16.msra.mxu1 %v8513_v17  ;;  %v8551_v17 = vld [vmem:[%s10838_s1 + $0x9d0] sm:$0xff]  }
 0x106   :  { %7785 = vmatprep.subr.bf16.mxu1 %v8515_v20  ;;  %5845 = vmatprep.mubr.bf16.mxu0 %v1437_v5  ;;  %v8552_v18 = vld [vmem:[%s10838_s1 + $0x910] sm:$0xff]   ;;  %v8554_v20 = vld [vmem:[%s10838_s1 + $0x958] sm:$0xff]  }
 0x107   :  { %v8553_v19 = vld [vmem:[%s10838_s1 + $0x990] sm:$0xff]  }
 0x108   :  { %7764 = vmatpush3.bf16.msra.mxu0 %v8516_v21  ;;  %v8555_v21 = vld [vmem:[%s10838_s1 + $0x9d8] sm:$0xff]  }
 0x109   :  { %7765 = vmatprep.subr.bf16.mxu0 %v8518_v23  ;;  %7786 = vmatpush3.bf16.msra.mxu1 %v8517_v22  ;;  %v8556_v22 = vld [vmem:[%s10838_s1 + $0x918] sm:$0xff]  }
 0x10a   :  { %7787 = vmatprep.subr.bf16.mxu1 %v8519_v24  ;;  %v8557_v23 = vld [vmem:[%s10838_s1 + $0x998] sm:$0xff]   ;;  %v8558_v24 = vld [vmem:[%s10838_s1 + $0x960] sm:$0xff]  }
 0x10c   :  { %7766 = vmatpush3.bf16.msra.mxu0 %v8520_v25  ;;  %v8559_v25 = vld [vmem:[%s10838_s1 + $0x9e0] sm:$0xff]  }
 0x10d   :  { %7767 = vmatprep.subr.bf16.mxu0 %v8522_v27  ;;  %7788 = vmatpush3.bf16.msra.mxu1 %v8521_v26  ;;  %v8560_v26 = vld [vmem:[%s10838_s1 + $0x920] sm:$0xff]  }
 0x10e   :  { %7789 = vmatprep.subr.bf16.mxu1 %v8523_v28  ;;  %v8561_v27 = vld [vmem:[%s10838_s1 + $0x9a0] sm:$0xff]   ;;  %v8562_v28 = vld [vmem:[%s10838_s1 + $0x968] sm:$0xff]  }
 0x110   :  { %7768 = vmatpush3.bf16.msra.mxu0 %v8524_v29  ;;  %v8563_v29 = vld [vmem:[%s10838_s1 + $0x9e8] sm:$0xff]  }
 0x111   :  { %7769 = vmatprep.subr.bf16.mxu0 %v8526_v31  ;;  %7790 = vmatpush3.bf16.msra.mxu1 %v8525_v30  ;;  %v8564_v30 = vld [vmem:[%s10838_s1 + $0x928] sm:$0xff]  }
 0x112   :  { %7791 = vmatprep.subr.bf16.mxu1 %v8527_v32  ;;  %v8565_v32 = vld [vmem:[%s10838_s1 + $0x9a8] sm:$0xff]  }
 0x114   :  { %7770 = vmatpush3.bf16.msra.mxu0 %v8528_v33 }
 0x115   :  { %7771 = vmatprep.subr.bf16.mxu0 %v8530_v36  ;;  %7792 = vmatpush3.bf16.msra.mxu1 %v8529_v34  ;;  %v8566_v34 = vld [vmem:[%s10838_s1 + $0x970] sm:$0xff]  }
 0x116   :  { %v7469_v40 = vpop.f32.mrb[4].mxu0  ;;  %7793 = vmatprep.subr.bf16.mxu1 %v8531_v37 }
 0x117   :  { %v7470_v42 = vpop.f32.mrb[5].mxu0  ;;  %v7491_v44 = vpop.f32.mrb[4].mxu1 }
 0x118   :  { %v7471_v45 = vadd.f32 %v7470_v42, %v7469_v40  ;;  %v7472_v46 = vpop.f32.mrb[6].mxu0  ;;  %v7492_v47 = vpop.f32.mrb[5].mxu1  ;;  %7772 = vmatpush3.bf16.msra.mxu0 %v8532_v38  ;;  %v8568_v40 = vld [vmem:[%s10838_s1 + $0x930] sm:$0xff]  }
 0x119   :  { %v7473_v48 = vpop.f32.mrb[7].mxu0  ;;  %v7493_v52 = vadd.f32 %v7492_v47, %v7491_v44  ;;  %v7494_v53 = vpop.f32.mrb[6].mxu1  ;;  %7773 = vmatprep.subr.bf16.mxu0 %v8534_v41  ;;  %7794 = vmatpush3.bf16.msra.mxu1 %v8533_v39  ;;  %v8567_v39 = vld [vmem:[%s10838_s1 + $0x9f0] sm:$0xff]  }
 0x11a   :  { %v5288_v51 = vadd.f32 %v7471_v45, %v9711_v10  ;;  %v7495_v55 = vpop.f32.mrb[7].mxu1  ;;  %7795 = vmatprep.subr.bf16.mxu1 %v8535_v43  ;;  %v1447_v10 = vcombine.high %v1437_v5, %v1437_v5  ;;  %v8569_v46 = vld [vmem:[%s10838_s1 + $0x9b0] sm:$0xff]   ;;  %v8570_v48 = vld [vmem:[%s10838_s1 + $0x978] sm:$0xff]   ;;  %v1430_v53 = vrot.slane %v9832_v3, %v8980_v35 }
 0x11b   :  { %v8576_v55 = vld [vmem:[%s10838_s1 + $0xac0] sm:$0xff]   ;;  %v8587_v3 = vld [vmem:[%s10838_s1 + $0xa58] sm:$0xff]  }
 0x11c   :  { %v9812_v57 = vadd.f32 %v7493_v52, %v5288_v51  ;;  %7774 = vmatpush3.bf16.msra.mxu0 %v8536_v49  ;;  %5885 = vmatprep.mubr.bf16.mxu1 %v1447_v10  ;;  %v8572_v51 = vld [vmem:[%s10838_s1 + $0x938] sm:$0xff]   ;;  %v8594_v10 = vld [vmem:[%s10838_s1 + $0xaa0] sm:$0xff]  }
 0x11d   :  { %7775 = vmatprep.subr.bf16.mxu0 %v8538_v54  ;;  %7796 = vmatpush3.bf16.msra.mxu1 %v8537_v50  ;;  %v8571_v50 = vld [vmem:[%s10838_s1 + $0x9f8] sm:$0xff]   ;;  %v8575_v54 = vld [vmem:[%s10838_s1 + $0xa40] sm:$0xff]  }
 0x11e   :  { %7797 = vmatprep.subr.bf16.mxu1 %v8539_v56  ;;  %v8573_v52 = vld [vmem:[%s10838_s1 + $0x9b8] sm:$0xff]   ;;  %v8577_v56 = vld [vmem:[%s10838_s1 + $0xa00] sm:$0xff]  }
 0x11f   :  { %v8589_v5 = vld [vmem:[%s10838_s1 + $0xa18] sm:$0xff]  }
 0x120   :  { %7776 = vmatpush3.bf16.msra.mxu0 %v8540_v58  ;;  %v1446_v58 = vcombine.high %v1430_v53, %v1430_v53 }
 0x121   :  { %7805 = vmatprep.subr.bf16.mxu0 %v8542_v61  ;;  %7798 = vmatpush3.bf16.msra.mxu1 %v8541_v63  ;;  %v8581_v61 = vld [vmem:[%s10838_s1 + $0xa08] sm:$0xff]   ;;  %v8583_v63 = vld [vmem:[%s10838_s1 + $0xa50] sm:$0xff]  }
 0x122   :  { %7827 = vmatprep.subr.bf16.mxu1 %v8543_v2  ;;  %v8586_v2 = vld [vmem:[%s10838_s1 + $0xa90] sm:$0xff]  }
 0x123   :  { %5846 = vmatmul.mubr.bf16.vlgmr.msra.gmra.mrb[32].mxu0 %v1423_v1  ;;  %v8585_v1 = vld [vmem:[%s10838_s1 + $0xa10] sm:$0xff]  }
 0x124   :  { %7806 = vmatpush3.bf16.msra.mxu0 %v8544_v4  ;;  %5886 = vmatmul.mubr.bf16.vlgmr.msra.gmra.mrb[32].mxu1 %v1445_v8  ;;  %v8588_v4 = vld [vmem:[%s10838_s1 + $0xad8] sm:$0xff]   ;;  %v8592_v8 = vld [vmem:[%s10838_s1 + $0xae0] sm:$0xff]  }
 0x125   :  { %7807 = vmatprep.subr.bf16.mxu0 %v8546_v9  ;;  %7828 = vmatpush3.bf16.msra.mxu1 %v8545_v6  ;;  %v8590_v6 = vld [vmem:[%s10838_s1 + $0xa98] sm:$0xff]   ;;  %v8593_v9 = vld [vmem:[%s10838_s1 + $0xa20] sm:$0xff]  }
 0x126   :  { %5925 = vmatprep.mubr.bf16.mxu0 %v1444_v12  ;;  %7829 = vmatprep.subr.bf16.mxu1 %v8547_v11  ;;  %v8595_v11 = vld [vmem:[%s10838_s1 + $0xa68] sm:$0xff]  }
 0x127   :  { %5965 = vmatprep.mubr.bf16.mxu1 %v1448_v15  ;;  %v8596_v12 = vld [vmem:[%s10838_s1 + $0xae8] sm:$0xff]  }
 0x128   :  { %7808 = vmatpush3.bf16.msra.mxu0 %v8548_v13  ;;  %v8597_v13 = vld [vmem:[%s10838_s1 + $0xa28] sm:$0xff]  }
 0x129   :  { %7809 = vmatprep.subr.bf16.mxu0 %v8550_v16  ;;  %7830 = vmatpush3.bf16.msra.mxu1 %v8549_v14  ;;  %v8598_v15 = vld [vmem:[%s10838_s1 + $0xaa8] sm:$0xff]  }
 0x12a   :  { %7831 = vmatprep.subr.bf16.mxu1 %v8551_v17  ;;  %v8599_v17 = vld [vmem:[%s10838_s1 + $0xa70] sm:$0xff]  }
 0x12c   :  { %7810 = vmatpush3.bf16.msra.mxu0 %v8552_v18 }
 0x12d   :  { %7811 = vmatprep.subr.bf16.mxu0 %v8554_v20  ;;  %7832 = vmatpush3.bf16.msra.mxu1 %v8553_v19 }
 0x12e   :  { %7833 = vmatprep.subr.bf16.mxu1 %v8555_v21 }
 0x130   :  { %7812 = vmatpush3.bf16.msra.mxu0 %v8556_v22 }
 0x131   :  { %7813 = vmatprep.subr.bf16.mxu0 %v8558_v24  ;;  %7834 = vmatpush3.bf16.msra.mxu1 %v8557_v23  ;;  %v8600_v23 = vld [vmem:[%s10838_s1 + $0xaf0] sm:$0xff]  }
 0x132   :  { %7835 = vmatprep.subr.bf16.mxu1 %v8559_v25  ;;  %v8601_v24 = vld [vmem:[%s10838_s1 + $0xa30] sm:$0xff]  }
 0x134   :  { %7814 = vmatpush3.bf16.msra.mxu0 %v8560_v26 }
 0x135   :  { %7815 = vmatprep.subr.bf16.mxu0 %v8562_v28  ;;  %7836 = vmatpush3.bf16.msra.mxu1 %v8561_v27  ;;  %v8602_v28 = vld [vmem:[%s10838_s1 + $0xab0] sm:$0xff]  }
 0x136   :  { %v7513_v31 = vpop.f32.mrb[8].mxu0  ;;  %7837 = vmatprep.subr.bf16.mxu1 %v8563_v29 }
 0x137   :  { %v7514_v33 = vpop.f32.mrb[9].mxu0  ;;  %v7535_v36 = vpop.f32.mrb[8].mxu1 }
 0x138   :  { %v7515_v37 = vadd.f32 %v7514_v33, %v7513_v31  ;;  %v7516_v38 = vpop.f32.mrb[10].mxu0  ;;  %v7536_v41 = vpop.f32.mrb[9].mxu1  ;;  %7816 = vmatpush3.bf16.msra.mxu0 %v8564_v30  ;;  %v8603_v30 = vld [vmem:[%s10838_s1 + $0xa78] sm:$0xff]  }
 0x139   :  { %v7517_v42 = vpop.f32.mrb[11].mxu0  ;;  %v7537_v44 = vadd.f32 %v7536_v41, %v7535_v36  ;;  %v7538_v45 = vpop.f32.mrb[10].mxu1  ;;  %7817 = vmatprep.subr.bf16.mxu0 %v8566_v34  ;;  %7838 = vmatpush3.bf16.msra.mxu1 %v8565_v32  ;;  %v8604_v32 = vld [vmem:[%s10838_s1 + $0xaf8] sm:$0xff]   ;;  %v32_v34 = vld [vmem:[%s10839_s0 + $0x28] sm:$0xff] }
 0x13a   :  { %v5368_v43 = vadd.f32 %v7515_v37, %v9812_v57  ;;  %v7539_v47 = vpop.f32.mrb[11].mxu1  ;;  %7839 = vmatprep.subr.bf16.mxu1 %v8567_v39  ;;  %v8578_v57 = vld [vmem:[%s10838_s1 + $0xa80] sm:$0xff]   ;;  %v8605_v33 = vld [vmem:[%s10838_s1 + $0xa38] sm:$0xff]   ;;  %v1456_v36 = vrot.slane %v32_v34, %v8980_v35  ;;  %v1449_v38 = vcombine.high %v32_v34, %v32_v34  ;;  %v8644_v34 = vld [vmem:[%s10838_s1 + $0xc48] sm:$0xff]  }
 0x13b   :  { %v8607_v37 = vld [vmem:[%s10838_s1 + $0xb40] sm:$0xff]   ;;  %v8606_v39 = vld [vmem:[%s10838_s1 + $0xab8] sm:$0xff]  }
 0x13c   :  { %v9920_v49 = vadd.f32 %v7537_v44, %v5368_v43  ;;  %7818 = vmatpush3.bf16.msra.mxu0 %v8568_v40  ;;  %v1464_v40 = vcombine.high %v1456_v36, %v1456_v36  ;;  %v1472_v41 = vrot.slane %v1456_v36, %v8980_v35  ;;  %v8608_v42 = vld [vmem:[%s10838_s1 + $0xbc0] sm:$0xff]   ;;  %v10044_v43 = vrot.slane %v1449_v38, %v8980_v35  ;;  %v8645_v36 = vld [vmem:[%s10838_s1 + $0xcc8] sm:$0xff]  }
 0x13d   :  { %7819 = vmatprep.subr.bf16.mxu0 %v8570_v48  ;;  %7840 = vmatpush3.bf16.msra.mxu1 %v8569_v46  ;;  %v8609_v44 = vld [vmem:[%s10838_s1 + $0xb00] sm:$0xff]   ;;  %v8647_v38 = vld [vmem:[%s10838_s1 + $0xc88] sm:$0xff]  }
 0x13e   :  { %7841 = vmatprep.subr.bf16.mxu1 %v8571_v50  ;;  %v1486_v45 = vrot.slane %v1464_v40, %v8980_v35  ;;  %v8610_v46 = vld [vmem:[%s10838_s1 + $0xb80] sm:$0xff]   ;;  %v1465_v47 = vcombine.high %v10044_v43, %v10044_v43  ;;  %v1494_v48 = vcombine.high %v1472_v41, %v1472_v41  ;;  %v8649_v40 = vld [vmem:[%s10838_s1 + $0xcd0] sm:$0xff]  }
 0x140   :  { %7820 = vmatpush3.bf16.msra.mxu0 %v8572_v51  ;;  %v1496_v50 = vcombine.high %v1486_v45, %v1486_v45  ;;  %v8612_v51 = vld [vmem:[%s10838_s1 + $0xbc8] sm:$0xff]  }
 0x141   :  { %7849 = vmatprep.subr.bf16.mxu0 %v8575_v54  ;;  %7842 = vmatpush3.bf16.msra.mxu1 %v8573_v52  ;;  %v1493_v52 = vrot.slane %v1465_v47, %v8980_v35  ;;  %v8614_v54 = vld [vmem:[%s10838_s1 + $0xb88] sm:$0xff]   ;;  %v8656_v47 = vld [vmem:[%s10838_s1 + $0xc60] sm:$0xff]  }
 0x142   :  { %7871 = vmatprep.subr.bf16.mxu1 %v8576_v55 }
 0x143   :  { %5926 = vmatmul.mubr.bf16.vlgmr.msra.gmra.mrb[36].mxu0 %v1430_v53  ;;  %v8613_v53 = vld [vmem:[%s10838_s1 + $0xb08] sm:$0xff]   ;;  %v1497_v55 = vcombine.high %v1493_v52, %v1493_v52 }
 0x144   :  { %7850 = vmatpush3.bf16.msra.mxu0 %v8577_v56  ;;  %5966 = vmatmul.mubr.bf16.vlgmr.msra.gmra.mrb[36].mxu1 %v1446_v58  ;;  %v8615_v56 = vld [vmem:[%s10838_s1 + $0xb50] sm:$0xff]  }
 0x145   :  { %7851 = vmatprep.subr.bf16.mxu0 %v8579_v59  ;;  %7872 = vmatpush3.bf16.msra.mxu1 %v8578_v57  ;;  %v8616_v57 = vld [vmem:[%s10838_s1 + $0xbd0] sm:$0xff]  }
 0x146   :  { %7873 = vmatprep.subr.bf16.mxu1 %v8580_v60  ;;  %6005 = vmatprep.mubr.bf16.mxu0 %v1486_v45  ;;  %v8617_v58 = vld [vmem:[%s10838_s1 + $0xb10] sm:$0xff]   ;;  %v8619_v60 = vld [vmem:[%s10838_s1 + $0xb58] sm:$0xff]  }
 0x147   :  { %6045 = vmatprep.mubr.bf16.mxu1 %v1496_v50  ;;  %v8618_v59 = vld [vmem:[%s10838_s1 + $0xb90] sm:$0xff]   ;;  %v8654_v45 = vld [vmem:[%s10838_s1 + $0xc18] sm:$0xff]   ;;  %v8659_v50 = vld [vmem:[%s10838_s1 + $0xca0] sm:$0xff]  }
 0x148   :  { %7852 = vmatpush3.bf16.msra.mxu0 %v8581_v61  ;;  %v8620_v61 = vld [vmem:[%s10838_s1 + $0xbd8] sm:$0xff]  }
 0x149   :  { %7853 = vmatprep.subr.bf16.mxu0 %v8583_v63  ;;  %7874 = vmatpush3.bf16.msra.mxu1 %v8582_v62  ;;  %v8621_v62 = vld [vmem:[%s10838_s1 + $0xb18] sm:$0xff]  }
 0x14a   :  { %7875 = vmatprep.subr.bf16.mxu1 %v8584_v0  ;;  %v8622_v63 = vld [vmem:[%s10838_s1 + $0xb98] sm:$0xff]   ;;  %v8623_v0 = vld [vmem:[%s10838_s1 + $0xb60] sm:$0xff]  }
 0x14c   :  { %7854 = vmatpush3.bf16.msra.mxu0 %v8585_v1  ;;  %v8624_v1 = vld [vmem:[%s10838_s1 + $0xbe0] sm:$0xff]  }
 0x14d   :  { %7855 = vmatprep.subr.bf16.mxu0 %v8587_v3  ;;  %7876 = vmatpush3.bf16.msra.mxu1 %v8586_v2  ;;  %v8625_v2 = vld [vmem:[%s10838_s1 + $0xb20] sm:$0xff]  }
 0x14e   :  { %7877 = vmatprep.subr.bf16.mxu1 %v8588_v4  ;;  %v8626_v3 = vld [vmem:[%s10838_s1 + $0xba0] sm:$0xff]   ;;  %v8627_v4 = vld [vmem:[%s10838_s1 + $0xb68] sm:$0xff]  }
 0x150   :  { %7856 = vmatpush3.bf16.msra.mxu0 %v8589_v5  ;;  %v8628_v5 = vld [vmem:[%s10838_s1 + $0xbe8] sm:$0xff]  }
 0x151   :  { %7857 = vmatprep.subr.bf16.mxu0 %v8591_v7  ;;  %7878 = vmatpush3.bf16.msra.mxu1 %v8590_v6  ;;  %v8629_v7 = vld [vmem:[%s10838_s1 + $0xb28] sm:$0xff]  }
 0x152   :  { %7879 = vmatprep.subr.bf16.mxu1 %v8592_v8 }
 0x154   :  { %7858 = vmatpush3.bf16.msra.mxu0 %v8593_v9  ;;  %v8630_v9 = vld [vmem:[%s10838_s1 + $0xba8] sm:$0xff]  }
 0x155   :  { %7859 = vmatprep.subr.bf16.mxu0 %v8595_v11  ;;  %7880 = vmatpush3.bf16.msra.mxu1 %v8594_v10 }
 0x156   :  { %v7557_v14 = vpop.f32.mrb[12].mxu0  ;;  %7881 = vmatprep.subr.bf16.mxu1 %v8596_v12 }
 0x157   :  { %v7558_v16 = vpop.f32.mrb[13].mxu0  ;;  %v7579_v18 = vpop.f32.mrb[12].mxu1 }
 0x158   :  { %v7559_v19 = vadd.f32 %v7558_v16, %v7557_v14  ;;  %v7560_v20 = vpop.f32.mrb[14].mxu0  ;;  %v7580_v21 = vpop.f32.mrb[13].mxu1  ;;  %7860 = vmatpush3.bf16.msra.mxu0 %v8597_v13  ;;  %v8631_v13 = vld [vmem:[%s10838_s1 + $0xb70] sm:$0xff]  }
 0x159   :  { %v7561_v22 = vpop.f32.mrb[15].mxu0  ;;  %v7581_v26 = vadd.f32 %v7580_v21, %v7579_v18  ;;  %v7582_v27 = vpop.f32.mrb[14].mxu1  ;;  %7861 = vmatprep.subr.bf16.mxu0 %v8599_v17  ;;  %7882 = vmatpush3.bf16.msra.mxu1 %v8598_v15  ;;  %v8632_v14 = vld [vmem:[%s10838_s1 + $0xbf0] sm:$0xff]  }
 0x15a   :  { %v5448_v25 = vadd.f32 %v7559_v19, %v9920_v49  ;;  %v7583_v29 = vpop.f32.mrb[15].mxu1  ;;  %7883 = vmatprep.subr.bf16.mxu1 %v8600_v23  ;;  %v8611_v49 = vld [vmem:[%s10838_s1 + $0xb48] sm:$0xff]   ;;  %v8633_v20 = vld [vmem:[%s10838_s1 + $0xb30] sm:$0xff]   ;;  %v8638_v27 = vld [vmem:[%s10838_s1 + $0xbb8] sm:$0xff]  }
 0x15b   :  { %v8634_v22 = vld [vmem:[%s10838_s1 + $0xbb0] sm:$0xff]   ;;  %v8640_v29 = vld [vmem:[%s10838_s1 + $0xc40] sm:$0xff]  }
 0x15c   :  { %v10021_v31 = vadd.f32 %v7581_v26, %v5448_v25  ;;  %7862 = vmatpush3.bf16.msra.mxu0 %v8601_v24  ;;  %v8635_v24 = vld [vmem:[%s10838_s1 + $0xb78] sm:$0xff]  }
 0x15d   :  { %7863 = vmatprep.subr.bf16.mxu0 %v8603_v30  ;;  %7884 = vmatpush3.bf16.msra.mxu1 %v8602_v28  ;;  %v8636_v25 = vld [vmem:[%s10838_s1 + $0xbf8] sm:$0xff]   ;;  %v1479_v28 = vrot.slane %v10044_v43, %v8980_v35  ;;  %v8641_v30 = vld [vmem:[%s10838_s1 + $0xcc0] sm:$0xff]  }
 0x15e   :  { %7885 = vmatprep.subr.bf16.mxu1 %v8604_v32  ;;  %v8637_v26 = vld [vmem:[%s10838_s1 + $0xb38] sm:$0xff]   ;;  %v8643_v32 = vld [vmem:[%s10838_s1 + $0xc80] sm:$0xff]  }
 0x15f   :  { %v8652_v43 = vld [vmem:[%s10838_s1 + $0xc58] sm:$0xff]  }
 0x160   :  { %7864 = vmatpush3.bf16.msra.mxu0 %v8605_v33  ;;  %v1495_v33 = vcombine.high %v1479_v28, %v1479_v28 }
 0x161   :  { %7893 = vmatprep.subr.bf16.mxu0 %v8607_v37  ;;  %7886 = vmatpush3.bf16.msra.mxu1 %v8606_v39  ;;  %v8646_v37 = vld [vmem:[%s10838_s1 + $0xc08] sm:$0xff]   ;;  %v8648_v39 = vld [vmem:[%s10838_s1 + $0xc50] sm:$0xff]  }
 0x162   :  { %7915 = vmatprep.subr.bf16.mxu1 %v8608_v42  ;;  %v8651_v42 = vld [vmem:[%s10838_s1 + $0xc90] sm:$0xff]  }
 0x163   :  { %6006 = vmatmul.mubr.bf16.vlgmr.msra.gmra.mrb[40].mxu0 %v1472_v41  ;;  %v8650_v41 = vld [vmem:[%s10838_s1 + $0xc10] sm:$0xff]  }
 0x164   :  { %7894 = vmatpush3.bf16.msra.mxu0 %v8609_v44  ;;  %6046 = vmatmul.mubr.bf16.vlgmr.msra.gmra.mrb[40].mxu1 %v1494_v48  ;;  %v8653_v44 = vld [vmem:[%s10838_s1 + $0xcd8] sm:$0xff]   ;;  %v8657_v48 = vld [vmem:[%s10838_s1 + $0xce0] sm:$0xff]  }
 0x165   :  { %7895 = vmatprep.subr.bf16.mxu0 %v8611_v49  ;;  %7916 = vmatpush3.bf16.msra.mxu1 %v8610_v46  ;;  %v8655_v46 = vld [vmem:[%s10838_s1 + $0xc98] sm:$0xff]   ;;  %v8658_v49 = vld [vmem:[%s10838_s1 + $0xc20] sm:$0xff]  }
 0x166   :  { %6085 = vmatprep.mubr.bf16.mxu0 %v1493_v52  ;;  %7917 = vmatprep.subr.bf16.mxu1 %v8612_v51  ;;  %v8660_v51 = vld [vmem:[%s10838_s1 + $0xc68] sm:$0xff]  }
 0x167   :  { %6125 = vmatprep.mubr.bf16.mxu1 %v1497_v55  ;;  %v8661_v52 = vld [vmem:[%s10838_s1 + $0xce8] sm:$0xff]  }
 0x168   :  { %7896 = vmatpush3.bf16.msra.mxu0 %v8613_v53 }
 0x169   :  { %7897 = vmatprep.subr.bf16.mxu0 %v8615_v56  ;;  %7918 = vmatpush3.bf16.msra.mxu1 %v8614_v54  ;;  %v8662_v54 = vld [vmem:[%s10838_s1 + $0xc28] sm:$0xff]   ;;  %v8664_v56 = vld [vmem:[%s10838_s1 + $0xc70] sm:$0xff]  }
 0x16a   :  { %7919 = vmatprep.subr.bf16.mxu1 %v8616_v57 }
 0x16c   :  { %7898 = vmatpush3.bf16.msra.mxu0 %v8617_v58 }
 0x16d   :  { %7899 = vmatprep.subr.bf16.mxu0 %v8619_v60  ;;  %7920 = vmatpush3.bf16.msra.mxu1 %v8618_v59 }
 0x16e   :  { %7921 = vmatprep.subr.bf16.mxu1 %v8620_v61  ;;  %v8663_v61 = vld [vmem:[%s10838_s1 + $0xca8] sm:$0xff]  }
 0x170   :  { %7900 = vmatpush3.bf16.msra.mxu0 %v8621_v62 }
 0x171   :  { %7901 = vmatprep.subr.bf16.mxu0 %v8623_v0  ;;  %7922 = vmatpush3.bf16.msra.mxu1 %v8622_v63  ;;  %v8665_v63 = vld [vmem:[%s10838_s1 + $0xcf0] sm:$0xff]  }
 0x172   :  { %7923 = vmatprep.subr.bf16.mxu1 %v8624_v1 }
 0x174   :  { %7902 = vmatpush3.bf16.msra.mxu0 %v8625_v2 }
 0x175   :  { %7903 = vmatprep.subr.bf16.mxu0 %v8627_v4  ;;  %7924 = vmatpush3.bf16.msra.mxu1 %v8626_v3  ;;  %v8666_v3 = vld [vmem:[%s10838_s1 + $0xc30] sm:$0xff]  }
 0x176   :  { %v7601_v6 = vpop.f32.mrb[16].mxu0  ;;  %7925 = vmatprep.subr.bf16.mxu1 %v8628_v5  ;;  %v8668_v5 = vld [vmem:[%s10838_s1 + $0xc78] sm:$0xff]  }
 0x177   :  { %v7602_v8 = vpop.f32.mrb[17].mxu0  ;;  %v7623_v10 = vpop.f32.mrb[16].mxu1 }
 0x178   :  { %v7603_v11 = vadd.f32 %v7602_v8, %v7601_v6  ;;  %v7604_v12 = vpop.f32.mrb[18].mxu0  ;;  %v7624_v15 = vpop.f32.mrb[17].mxu1  ;;  %7904 = vmatpush3.bf16.msra.mxu0 %v8629_v7  ;;  %v8667_v7 = vld [vmem:[%s10838_s1 + $0xcb0] sm:$0xff]   ;;  %v8669_v8 = vld [vmem:[%s10838_s1 + $0xcf8] sm:$0xff]  }
 0x179   :  { %v7605_v16 = vpop.f32.mrb[19].mxu0  ;;  %v7625_v18 = vadd.f32 %v7624_v15, %v7623_v10  ;;  %v7626_v19 = vpop.f32.mrb[18].mxu1  ;;  %7905 = vmatprep.subr.bf16.mxu0 %v8631_v13  ;;  %7926 = vmatpush3.bf16.msra.mxu1 %v8630_v9  ;;  %v8670_v9 = vld [vmem:[%s10838_s1 + $0xc38] sm:$0xff]   ;;  %v33_v10 = vld [vmem:[%s10839_s0 + $0x30] sm:$0xff]  ;;  %v8672_v12 = vld [vmem:[%s10838_s1 + $0xd40] sm:$0xff]  }
 0x17a   :  { %v5528_v17 = vadd.f32 %v7603_v11, %v10021_v31  ;;  %v7627_v21 = vpop.f32.mrb[19].mxu1  ;;  %7927 = vmatprep.subr.bf16.mxu1 %v8632_v14  ;;  %v8642_v31 = vld [vmem:[%s10838_s1 + $0xc00] sm:$0xff]   ;;  %v1505_v11 = vrot.slane %v33_v10, %v8980_v35  ;;  %v1498_v13 = vcombine.high %v33_v10, %v33_v10  ;;  %v8671_v14 = vld [vmem:[%s10838_s1 + $0xcb8] sm:$0xff]   ;;  %v8709_v10 = vld [vmem:[%s10838_s1 + $0xe48] sm:$0xff]  }
 0x17b   :  { %v8674_v19 = vld [vmem:[%s10838_s1 + $0xd00] sm:$0xff]  }
 0x17c   :  { %v10129_v23 = vadd.f32 %v7625_v18, %v5528_v17  ;;  %7906 = vmatpush3.bf16.msra.mxu0 %v8633_v20  ;;  %v1513_v15 = vcombine.high %v1505_v11, %v1505_v11  ;;  %v1521_v16 = vrot.slane %v1505_v11, %v8980_v35  ;;  %v8673_v17 = vld [vmem:[%s10838_s1 + $0xdc0] sm:$0xff]   ;;  %v10256_v18 = vrot.slane %v1498_v13, %v8980_v35  ;;  %v8710_v11 = vld [vmem:[%s10838_s1 + $0xec8] sm:$0xff]  }
 0x17d   :  { %7907 = vmatprep.subr.bf16.mxu0 %v8635_v24  ;;  %7928 = vmatpush3.bf16.msra.mxu1 %v8634_v22  ;;  %v8675_v21 = vld [vmem:[%s10838_s1 + $0xd80] sm:$0xff]   ;;  %v8676_v24 = vld [vmem:[%s10838_s1 + $0xd48] sm:$0xff]  }
 0x17e   :  { %7929 = vmatprep.subr.bf16.mxu1 %v8636_v25  ;;  %v1535_v20 = vrot.slane %v1513_v15, %v8980_v35  ;;  %v1514_v22 = vcombine.high %v10256_v18, %v10256_v18  ;;  %v8712_v13 = vld [vmem:[%s10838_s1 + $0xe88] sm:$0xff]   ;;  %v8714_v15 = vld [vmem:[%s10838_s1 + $0xed0] sm:$0xff]  }
 0x180   :  { %7908 = vmatpush3.bf16.msra.mxu0 %v8637_v26  ;;  %v1545_v25 = vcombine.high %v1535_v20, %v1535_v20  ;;  %v8677_v26 = vld [vmem:[%s10838_s1 + $0xdc8] sm:$0xff]  }
 0x181   :  { %7937 = vmatprep.subr.bf16.mxu0 %v8640_v29  ;;  %7930 = vmatpush3.bf16.msra.mxu1 %v8638_v27  ;;  %v1542_v27 = vrot.slane %v1514_v22, %v8980_v35  ;;  %v8679_v29 = vld [vmem:[%s10838_s1 + $0xd88] sm:$0xff]   ;;  %v8721_v22 = vld [vmem:[%s10838_s1 + $0xe60] sm:$0xff]  }
 0x182   :  { %7959 = vmatprep.subr.bf16.mxu1 %v8641_v30 }
 0x183   :  { %6086 = vmatmul.mubr.bf16.vlgmr.msra.gmra.mrb[44].mxu0 %v1479_v28  ;;  %v8678_v28 = vld [vmem:[%s10838_s1 + $0xd08] sm:$0xff]   ;;  %v1546_v30 = vcombine.high %v1542_v27, %v1542_v27 }
 0x184   :  { %7938 = vmatpush3.bf16.msra.mxu0 %v8642_v31  ;;  %6126 = vmatmul.mubr.bf16.vlgmr.msra.gmra.mrb[44].mxu1 %v1495_v33  ;;  %v8680_v31 = vld [vmem:[%s10838_s1 + $0xd50] sm:$0xff]  }
 0x185   :  { %7939 = vmatprep.subr.bf16.mxu0 %v8644_v34  ;;  %7960 = vmatpush3.bf16.msra.mxu1 %v8643_v32  ;;  %v8681_v32 = vld [vmem:[%s10838_s1 + $0xdd0] sm:$0xff]  }
 0x186   :  { %7961 = vmatprep.subr.bf16.mxu1 %v8645_v36  ;;  %6165 = vmatprep.mubr.bf16.mxu0 %v1535_v20  ;;  %v8682_v33 = vld [vmem:[%s10838_s1 + $0xd10] sm:$0xff]   ;;  %v8684_v36 = vld [vmem:[%s10838_s1 + $0xd58] sm:$0xff]  }
 0x187   :  { %6205 = vmatprep.mubr.bf16.mxu1 %v1545_v25  ;;  %v8683_v34 = vld [vmem:[%s10838_s1 + $0xd90] sm:$0xff]   ;;  %v8719_v20 = vld [vmem:[%s10838_s1 + $0xe18] sm:$0xff]   ;;  %v8724_v25 = vld [vmem:[%s10838_s1 + $0xea0] sm:$0xff]  }
 0x188   :  { %7940 = vmatpush3.bf16.msra.mxu0 %v8646_v37  ;;  %v8685_v37 = vld [vmem:[%s10838_s1 + $0xdd8] sm:$0xff]  }
 0x189   :  { %7941 = vmatprep.subr.bf16.mxu0 %v8648_v39  ;;  %7962 = vmatpush3.bf16.msra.mxu1 %v8647_v38  ;;  %v8686_v38 = vld [vmem:[%s10838_s1 + $0xd18] sm:$0xff]  }
 0x18a   :  { %7963 = vmatprep.subr.bf16.mxu1 %v8649_v40  ;;  %v8687_v39 = vld [vmem:[%s10838_s1 + $0xd98] sm:$0xff]   ;;  %v8688_v40 = vld [vmem:[%s10838_s1 + $0xd60] sm:$0xff]  }
 0x18c   :  { %7942 = vmatpush3.bf16.msra.mxu0 %v8650_v41  ;;  %v8689_v41 = vld [vmem:[%s10838_s1 + $0xde0] sm:$0xff]  }
 0x18d   :  { %7943 = vmatprep.subr.bf16.mxu0 %v8652_v43  ;;  %7964 = vmatpush3.bf16.msra.mxu1 %v8651_v42  ;;  %v8690_v42 = vld [vmem:[%s10838_s1 + $0xd20] sm:$0xff]  }
 0x18e   :  { %7965 = vmatprep.subr.bf16.mxu1 %v8653_v44  ;;  %v8691_v43 = vld [vmem:[%s10838_s1 + $0xda0] sm:$0xff]   ;;  %v8692_v44 = vld [vmem:[%s10838_s1 + $0xd68] sm:$0xff]  }
 0x190   :  { %7944 = vmatpush3.bf16.msra.mxu0 %v8654_v45  ;;  %v8693_v45 = vld [vmem:[%s10838_s1 + $0xde8] sm:$0xff]  }
 0x191   :  { %7945 = vmatprep.subr.bf16.mxu0 %v8656_v47  ;;  %7966 = vmatpush3.bf16.msra.mxu1 %v8655_v46  ;;  %v8694_v47 = vld [vmem:[%s10838_s1 + $0xd28] sm:$0xff]  }
 0x192   :  { %7967 = vmatprep.subr.bf16.mxu1 %v8657_v48 }
 0x194   :  { %7946 = vmatpush3.bf16.msra.mxu0 %v8658_v49  ;;  %v8695_v49 = vld [vmem:[%s10838_s1 + $0xda8] sm:$0xff]  }
 0x195   :  { %7947 = vmatprep.subr.bf16.mxu0 %v8660_v51  ;;  %7968 = vmatpush3.bf16.msra.mxu1 %v8659_v50 }
 0x196   :  { %v7645_v53 = vpop.f32.mrb[20].mxu0  ;;  %7969 = vmatprep.subr.bf16.mxu1 %v8661_v52 }
 0x197   :  { %v7646_v55 = vpop.f32.mrb[21].mxu0  ;;  %v7667_v57 = vpop.f32.mrb[20].mxu1 }
 0x198   :  { %v7647_v58 = vadd.f32 %v7646_v55, %v7645_v53  ;;  %v7648_v59 = vpop.f32.mrb[22].mxu0  ;;  %v7668_v60 = vpop.f32.mrb[21].mxu1  ;;  %7948 = vmatpush3.bf16.msra.mxu0 %v8662_v54  ;;  %v8696_v53 = vld [vmem:[%s10838_s1 + $0xd70] sm:$0xff]  }
 0x199   :  { %v7649_v62 = vpop.f32.mrb[23].mxu0  ;;  %v7669_v1 = vadd.f32 %v7668_v60, %v7667_v57  ;;  %v7670_v2 = vpop.f32.mrb[22].mxu1  ;;  %7949 = vmatprep.subr.bf16.mxu0 %v8664_v56  ;;  %7970 = vmatpush3.bf16.msra.mxu1 %v8663_v61  ;;  %v8697_v54 = vld [vmem:[%s10838_s1 + $0xdf0] sm:$0xff]  }
 0x19a   :  { %v5608_v0 = vadd.f32 %v7647_v58, %v10129_v23  ;;  %v7671_v4 = vpop.f32.mrb[23].mxu1  ;;  %7971 = vmatprep.subr.bf16.mxu1 %v8665_v63  ;;  %v1543_v23 = vcombine.high %v1521_v16, %v1521_v16  ;;  %v8698_v60 = vld [vmem:[%s10838_s1 + $0xd30] sm:$0xff]   ;;  %v8702_v2 = vld [vmem:[%s10838_s1 + $0xd38] sm:$0xff]  }
 0x19b   :  { %v8699_v62 = vld [vmem:[%s10838_s1 + $0xdb0] sm:$0xff]   ;;  %v1528_v4 = vrot.slane %v10256_v18, %v8980_v35  ;;  %v8717_v18 = vld [vmem:[%s10838_s1 + $0xe58] sm:$0xff]  }
 0x19c   :  { %v10230_v6 = vadd.f32 %v7669_v1, %v5608_v0  ;;  %7950 = vmatpush3.bf16.msra.mxu0 %v8666_v3  ;;  %v8700_v0 = vld [vmem:[%s10838_s1 + $0xd78] sm:$0xff]  }
 0x19d   :  { %7951 = vmatprep.subr.bf16.mxu0 %v8668_v5  ;;  %7972 = vmatpush3.bf16.msra.mxu1 %v8667_v7  ;;  %v8701_v1 = vld [vmem:[%s10838_s1 + $0xdf8] sm:$0xff]   ;;  %v8705_v5 = vld [vmem:[%s10838_s1 + $0xe40] sm:$0xff]  }
 0x19e   :  { %7973 = vmatprep.subr.bf16.mxu1 %v8669_v8  ;;  %v8703_v3 = vld [vmem:[%s10838_s1 + $0xdb8] sm:$0xff]   ;;  %v8707_v7 = vld [vmem:[%s10838_s1 + $0xe00] sm:$0xff]  }
 0x19f   :  { %v8708_v8 = vld [vmem:[%s10838_s1 + $0xe80] sm:$0xff]  }
 0x1a0   :  { %7952 = vmatpush3.bf16.msra.mxu0 %v8670_v9  ;;  %v1544_v9 = vcombine.high %v1528_v4, %v1528_v4 }
 0x1a1   :  { %7981 = vmatprep.subr.bf16.mxu0 %v8672_v12  ;;  %7974 = vmatpush3.bf16.msra.mxu1 %v8671_v14  ;;  %v8711_v12 = vld [vmem:[%s10838_s1 + $0xe08] sm:$0xff]   ;;  %v8713_v14 = vld [vmem:[%s10838_s1 + $0xe50] sm:$0xff]  }
 0x1a2   :  { %8003 = vmatprep.subr.bf16.mxu1 %v8673_v17  ;;  %v8716_v17 = vld [vmem:[%s10838_s1 + $0xe90] sm:$0xff]  }
 0x1a3   :  { %6166 = vmatmul.mubr.bf16.vlgmr.msra.gmra.mrb[48].mxu0 %v1521_v16  ;;  %v8715_v16 = vld [vmem:[%s10838_s1 + $0xe10] sm:$0xff]  }
 0x1a4   :  { %7982 = vmatpush3.bf16.msra.mxu0 %v8674_v19  ;;  %6206 = vmatmul.mubr.bf16.vlgmr.msra.gmra.mrb[48].mxu1 %v1543_v23  ;;  %v8718_v19 = vld [vmem:[%s10838_s1 + $0xed8] sm:$0xff]   ;;  %v8722_v23 = vld [vmem:[%s10838_s1 + $0xee0] sm:$0xff]  }
 0x1a5   :  { %7983 = vmatprep.subr.bf16.mxu0 %v8676_v24  ;;  %8004 = vmatpush3.bf16.msra.mxu1 %v8675_v21  ;;  %v8720_v21 = vld [vmem:[%s10838_s1 + $0xe98] sm:$0xff]   ;;  %v8723_v24 = vld [vmem:[%s10838_s1 + $0xe20] sm:$0xff]  }
 0x1a6   :  { %6245 = vmatprep.mubr.bf16.mxu0 %v1542_v27  ;;  %8005 = vmatprep.subr.bf16.mxu1 %v8677_v26  ;;  %v8725_v26 = vld [vmem:[%s10838_s1 + $0xe68] sm:$0xff]  }
 0x1a7   :  { %6285 = vmatprep.mubr.bf16.mxu1 %v1546_v30  ;;  %v8726_v27 = vld [vmem:[%s10838_s1 + $0xee8] sm:$0xff]  }
 0x1a8   :  { %7984 = vmatpush3.bf16.msra.mxu0 %v8678_v28 }
 0x1a9   :  { %7985 = vmatprep.subr.bf16.mxu0 %v8680_v31  ;;  %8006 = vmatpush3.bf16.msra.mxu1 %v8679_v29  ;;  %v8727_v29 = vld [vmem:[%s10838_s1 + $0xe28] sm:$0xff]   ;;  %v8729_v31 = vld [vmem:[%s10838_s1 + $0xe70] sm:$0xff]  }
 0x1aa   :  { %8007 = vmatprep.subr.bf16.mxu1 %v8681_v32 }
 0x1ac   :  { %7986 = vmatpush3.bf16.msra.mxu0 %v8682_v33 }
 0x1ad   :  { %7987 = vmatprep.subr.bf16.mxu0 %v8684_v36  ;;  %8008 = vmatpush3.bf16.msra.mxu1 %v8683_v34 }
 0x1ae   :  { %8009 = vmatprep.subr.bf16.mxu1 %v8685_v37  ;;  %v8728_v37 = vld [vmem:[%s10838_s1 + $0xea8] sm:$0xff]  }
 0x1b0   :  { %7988 = vmatpush3.bf16.msra.mxu0 %v8686_v38 }
 0x1b1   :  { %7989 = vmatprep.subr.bf16.mxu0 %v8688_v40  ;;  %8010 = vmatpush3.bf16.msra.mxu1 %v8687_v39  ;;  %v8730_v39 = vld [vmem:[%s10838_s1 + $0xef0] sm:$0xff]  }
 0x1b2   :  { %8011 = vmatprep.subr.bf16.mxu1 %v8689_v41 }
 0x1b4   :  { %7990 = vmatpush3.bf16.msra.mxu0 %v8690_v42 }
 0x1b5   :  { %7991 = vmatprep.subr.bf16.mxu0 %v8692_v44  ;;  %8012 = vmatpush3.bf16.msra.mxu1 %v8691_v43  ;;  %v8731_v43 = vld [vmem:[%s10838_s1 + $0xe30] sm:$0xff]  }
 0x1b6   :  { %v7689_v46 = vpop.f32.mrb[24].mxu0  ;;  %8013 = vmatprep.subr.bf16.mxu1 %v8693_v45  ;;  %v8733_v45 = vld [vmem:[%s10838_s1 + $0xe78] sm:$0xff]  }
 0x1b7   :  { %v7690_v48 = vpop.f32.mrb[25].mxu0  ;;  %v7711_v50 = vpop.f32.mrb[24].mxu1 }
 0x1b8   :  { %v7691_v51 = vadd.f32 %v7690_v48, %v7689_v46  ;;  %v7692_v52 = vpop.f32.mrb[26].mxu0  ;;  %v7712_v55 = vpop.f32.mrb[25].mxu1  ;;  %7992 = vmatpush3.bf16.msra.mxu0 %v8694_v47  ;;  %v8732_v47 = vld [vmem:[%s10838_s1 + $0xeb0] sm:$0xff]   ;;  %v8734_v48 = vld [vmem:[%s10838_s1 + $0xef8] sm:$0xff]  }
 0x1b9   :  { %v7693_v56 = vpop.f32.mrb[27].mxu0  ;;  %v7713_v58 = vadd.f32 %v7712_v55, %v7711_v50  ;;  %v7714_v59 = vpop.f32.mrb[26].mxu1  ;;  %7993 = vmatprep.subr.bf16.mxu0 %v8696_v53  ;;  %8014 = vmatpush3.bf16.msra.mxu1 %v8695_v49  ;;  %v8735_v49 = vld [vmem:[%s10838_s1 + $0xe38] sm:$0xff]   ;;  %v8737_v52 = vld [vmem:[%s10838_s1 + $0xf40] sm:$0xff]  }
 0x1ba   :  { %v5688_v57 = vadd.f32 %v7691_v51, %v10230_v6  ;;  %v7715_v61 = vpop.f32.mrb[27].mxu1  ;;  %8015 = vmatprep.subr.bf16.mxu1 %v8697_v54  ;;  %v8706_v6 = vld [vmem:[%s10838_s1 + $0xec0] sm:$0xff]   ;;  %v34_v50 = vld [vmem:[%s10839_s0 + $0x38] sm:$0xff] }
 0x1bb   :  { %v1554_v51 = vrot.slane %v34_v50, %v8980_v35  ;;  %v1547_v53 = vcombine.high %v34_v50, %v34_v50  ;;  %v8736_v54 = vld [vmem:[%s10838_s1 + $0xeb8] sm:$0xff]   ;;  %v8739_v59 = vld [vmem:[%s10838_s1 + $0xf00] sm:$0xff]   ;;  %v8774_v50 = vld [vmem:[%s10838_s1 + $0x1048] sm:$0xff]  }
 0x1bc   :  { %v10341_v63 = vadd.f32 %v7713_v58, %v5688_v57  ;;  %7994 = vmatpush3.bf16.msra.mxu0 %v8698_v60  ;;  %v8738_v57 = vld [vmem:[%s10838_s1 + $0xfc0] sm:$0xff]  }
 0x1bd   :  { %7995 = vmatprep.subr.bf16.mxu0 %v8700_v0  ;;  %8016 = vmatpush3.bf16.msra.mxu1 %v8699_v62  ;;  %v1562_v55 = vcombine.high %v1554_v51, %v1554_v51  ;;  %v1570_v56 = vrot.slane %v1554_v51, %v8980_v35  ;;  %v10468_v58 = vrot.slane %v1547_v53, %v8980_v35  ;;  %v8740_v61 = vld [vmem:[%s10838_s1 + $0xf80] sm:$0xff]   ;;  %v8741_v0 = vld [vmem:[%s10838_s1 + $0xf48] sm:$0xff]  }
 0x1be   :  { %8017 = vmatprep.subr.bf16.mxu1 %v8701_v1  ;;  %v8775_v51 = vld [vmem:[%s10838_s1 + $0x10c8] sm:$0xff]  }
 0x1bf   :  { %v1584_v60 = vrot.slane %v1562_v55, %v8980_v35  ;;  %v1563_v62 = vcombine.high %v10468_v58, %v10468_v58  ;;  %v8777_v53 = vld [vmem:[%s10838_s1 + $0x1088] sm:$0xff]   ;;  %v8779_v55 = vld [vmem:[%s10838_s1 + $0x10d0] sm:$0xff]  }
 0x1c0   :  { %7996 = vmatpush3.bf16.msra.mxu0 %v8702_v2  ;;  %v8742_v2 = vld [vmem:[%s10838_s1 + $0xfc8] sm:$0xff]  }
 0x1c1   :  { %8025 = vmatprep.subr.bf16.mxu0 %v8705_v5  ;;  %8018 = vmatpush3.bf16.msra.mxu1 %v8703_v3  ;;  %v1594_v1 = vcombine.high %v1584_v60, %v1584_v60  ;;  %v1591_v3 = vrot.slane %v1563_v62, %v8980_v35  ;;  %v8744_v5 = vld [vmem:[%s10838_s1 + $0xf88] sm:$0xff]   ;;  %v8786_v62 = vld [vmem:[%s10838_s1 + $0x1060] sm:$0xff]  }
 0x1c2   :  { %8047 = vmatprep.subr.bf16.mxu1 %v8706_v6 }
 0x1c3   :  { %6246 = vmatmul.mubr.bf16.vlgmr.msra.gmra.mrb[52].mxu0 %v1528_v4  ;;  %v8743_v4 = vld [vmem:[%s10838_s1 + $0xf08] sm:$0xff]   ;;  %v1595_v6 = vcombine.high %v1591_v3, %v1591_v3 }
 0x1c4   :  { %8026 = vmatpush3.bf16.msra.mxu0 %v8707_v7  ;;  %6286 = vmatmul.mubr.bf16.vlgmr.msra.gmra.mrb[52].mxu1 %v1544_v9  ;;  %v8745_v7 = vld [vmem:[%s10838_s1 + $0xf50] sm:$0xff]  }
 0x1c5   :  { %8027 = vmatprep.subr.bf16.mxu0 %v8709_v10  ;;  %8048 = vmatpush3.bf16.msra.mxu1 %v8708_v8  ;;  %v8746_v8 = vld [vmem:[%s10838_s1 + $0xfd0] sm:$0xff]  }
 0x1c6   :  { %8049 = vmatprep.subr.bf16.mxu1 %v8710_v11  ;;  %6325 = vmatprep.mubr.bf16.mxu0 %v1584_v60  ;;  %v8747_v9 = vld [vmem:[%s10838_s1 + $0xf10] sm:$0xff]   ;;  %v8749_v11 = vld [vmem:[%s10838_s1 + $0xf58] sm:$0xff]  }
 0x1c7   :  { %6365 = vmatprep.mubr.bf16.mxu1 %v1594_v1  ;;  %v8748_v10 = vld [vmem:[%s10838_s1 + $0xf90] sm:$0xff]   ;;  %v8784_v60 = vld [vmem:[%s10838_s1 + $0x1018] sm:$0xff]   ;;  %v8789_v1 = vld [vmem:[%s10838_s1 + $0x10a0] sm:$0xff]  }
 0x1c8   :  { %8028 = vmatpush3.bf16.msra.mxu0 %v8711_v12  ;;  %v8750_v12 = vld [vmem:[%s10838_s1 + $0xfd8] sm:$0xff]  }
 0x1c9   :  { %8029 = vmatprep.subr.bf16.mxu0 %v8713_v14  ;;  %8050 = vmatpush3.bf16.msra.mxu1 %v8712_v13  ;;  %v8751_v13 = vld [vmem:[%s10838_s1 + $0xf18] sm:$0xff]  }
 0x1ca   :  { %8051 = vmatprep.subr.bf16.mxu1 %v8714_v15  ;;  %v8752_v14 = vld [vmem:[%s10838_s1 + $0xf98] sm:$0xff]   ;;  %v8753_v15 = vld [vmem:[%s10838_s1 + $0xf60] sm:$0xff]  }
 0x1cc   :  { %8030 = vmatpush3.bf16.msra.mxu0 %v8715_v16  ;;  %v8754_v16 = vld [vmem:[%s10838_s1 + $0xfe0] sm:$0xff]  }
 0x1cd   :  { %8031 = vmatprep.subr.bf16.mxu0 %v8717_v18  ;;  %8052 = vmatpush3.bf16.msra.mxu1 %v8716_v17  ;;  %v8755_v17 = vld [vmem:[%s10838_s1 + $0xf20] sm:$0xff]  }
 0x1ce   :  { %8053 = vmatprep.subr.bf16.mxu1 %v8718_v19  ;;  %v8756_v18 = vld [vmem:[%s10838_s1 + $0xfa0] sm:$0xff]   ;;  %v8757_v19 = vld [vmem:[%s10838_s1 + $0xf68] sm:$0xff]  }
 0x1d0   :  { %8032 = vmatpush3.bf16.msra.mxu0 %v8719_v20  ;;  %v8758_v20 = vld [vmem:[%s10838_s1 + $0xfe8] sm:$0xff]  }
 0x1d1   :  { %8033 = vmatprep.subr.bf16.mxu0 %v8721_v22  ;;  %8054 = vmatpush3.bf16.msra.mxu1 %v8720_v21  ;;  %v8759_v22 = vld [vmem:[%s10838_s1 + $0xf28] sm:$0xff]  }
 0x1d2   :  { %8055 = vmatprep.subr.bf16.mxu1 %v8722_v23 }
 0x1d4   :  { %8034 = vmatpush3.bf16.msra.mxu0 %v8723_v24  ;;  %v8760_v24 = vld [vmem:[%s10838_s1 + $0xfa8] sm:$0xff]  }
 0x1d5   :  { %8035 = vmatprep.subr.bf16.mxu0 %v8725_v26  ;;  %8056 = vmatpush3.bf16.msra.mxu1 %v8724_v25 }
 0x1d6   :  { %v7733_v28 = vpop.f32.mrb[28].mxu0  ;;  %8057 = vmatprep.subr.bf16.mxu1 %v8726_v27 }
 0x1d7   :  { %v7734_v30 = vpop.f32.mrb[29].mxu0  ;;  %v7755_v32 = vpop.f32.mrb[28].mxu1 }
 0x1d8   :  { %v7735_v33 = vadd.f32 %v7734_v30, %v7733_v28  ;;  %v7736_v34 = vpop.f32.mrb[30].mxu0  ;;  %v7756_v36 = vpop.f32.mrb[29].mxu1  ;;  %8036 = vmatpush3.bf16.msra.mxu0 %v8727_v29  ;;  %v8761_v28 = vld [vmem:[%s10838_s1 + $0xf70] sm:$0xff]  }
 0x1d9   :  { %v7737_v38 = vpop.f32.mrb[31].mxu0  ;;  %v7757_v41 = vadd.f32 %v7756_v36, %v7755_v32  ;;  %v7758_v42 = vpop.f32.mrb[30].mxu1  ;;  %8037 = vmatprep.subr.bf16.mxu0 %v8729_v31  ;;  %8058 = vmatpush3.bf16.msra.mxu1 %v8728_v37  ;;  %v8762_v29 = vld [vmem:[%s10838_s1 + $0xff0] sm:$0xff]  }
 0x1da   :  { %v5768_v40 = vadd.f32 %v7735_v33, %v10341_v63  ;;  %v7759_v44 = vpop.f32.mrb[31].mxu1  ;;  %8059 = vmatprep.subr.bf16.mxu1 %v8730_v39  ;;  %v1592_v63 = vcombine.high %v1570_v56, %v1570_v56  ;;  %v8763_v36 = vld [vmem:[%s10838_s1 + $0xf30] sm:$0xff]   ;;  %v8767_v42 = vld [vmem:[%s10838_s1 + $0xf38] sm:$0xff]  }
 0x1db   :  { %v8764_v38 = vld [vmem:[%s10838_s1 + $0xfb0] sm:$0xff]   ;;  %v1577_v44 = vrot.slane %v10468_v58, %v8980_v35  ;;  %v8782_v58 = vld [vmem:[%s10838_s1 + $0x1058] sm:$0xff]  }
 0x1dc   :  { %v10442_v46 = vadd.f32 %v7757_v41, %v5768_v40  ;;  %8038 = vmatpush3.bf16.msra.mxu0 %v8731_v43  ;;  %v8765_v40 = vld [vmem:[%s10838_s1 + $0xf78] sm:$0xff]  }
 0x1dd   :  { %8039 = vmatprep.subr.bf16.mxu0 %v8733_v45  ;;  %8060 = vmatpush3.bf16.msra.mxu1 %v8732_v47  ;;  %v8766_v41 = vld [vmem:[%s10838_s1 + $0xff8] sm:$0xff]   ;;  %v8770_v45 = vld [vmem:[%s10838_s1 + $0x1040] sm:$0xff]  }
 0x1de   :  { %8061 = vmatprep.subr.bf16.mxu1 %v8734_v48  ;;  %v8768_v43 = vld [vmem:[%s10838_s1 + $0xfb8] sm:$0xff]   ;;  %v8772_v47 = vld [vmem:[%s10838_s1 + $0x1000] sm:$0xff]  }
 0x1df   :  { %v8773_v48 = vld [vmem:[%s10838_s1 + $0x1080] sm:$0xff]  }
 0x1e0   :  { %8040 = vmatpush3.bf16.msra.mxu0 %v8735_v49  ;;  %v1593_v49 = vcombine.high %v1577_v44, %v1577_v44 }
 0x1e1   :  { %8069 = vmatprep.subr.bf16.mxu0 %v8737_v52  ;;  %8062 = vmatpush3.bf16.msra.mxu1 %v8736_v54  ;;  %v8776_v52 = vld [vmem:[%s10838_s1 + $0x1008] sm:$0xff]   ;;  %v8778_v54 = vld [vmem:[%s10838_s1 + $0x1050] sm:$0xff]  }
 0x1e2   :  { %8091 = vmatprep.subr.bf16.mxu1 %v8738_v57  ;;  %v8781_v57 = vld [vmem:[%s10838_s1 + $0x1090] sm:$0xff]  }
 0x1e3   :  { %6326 = vmatmul.mubr.bf16.vlgmr.msra.gmra.mrb[56].mxu0 %v1570_v56  ;;  %v8780_v56 = vld [vmem:[%s10838_s1 + $0x1010] sm:$0xff]  }
 0x1e4   :  { %8070 = vmatpush3.bf16.msra.mxu0 %v8739_v59  ;;  %6366 = vmatmul.mubr.bf16.vlgmr.msra.gmra.mrb[56].mxu1 %v1592_v63  ;;  %v8783_v59 = vld [vmem:[%s10838_s1 + $0x10d8] sm:$0xff]   ;;  %v8787_v63 = vld [vmem:[%s10838_s1 + $0x10e0] sm:$0xff]  }
 0x1e5   :  { %8071 = vmatprep.subr.bf16.mxu0 %v8741_v0  ;;  %8092 = vmatpush3.bf16.msra.mxu1 %v8740_v61  ;;  %v8785_v61 = vld [vmem:[%s10838_s1 + $0x1098] sm:$0xff]   ;;  %v8788_v0 = vld [vmem:[%s10838_s1 + $0x1020] sm:$0xff]  }
 0x1e6   :  { %6405 = vmatprep.mubr.bf16.mxu0 %v1591_v3  ;;  %8093 = vmatprep.subr.bf16.mxu1 %v8742_v2  ;;  %v8790_v2 = vld [vmem:[%s10838_s1 + $0x1068] sm:$0xff]  }
 0x1e7   :  { %6445 = vmatprep.mubr.bf16.mxu1 %v1595_v6  ;;  %v8791_v3 = vld [vmem:[%s10838_s1 + $0x10e8] sm:$0xff]  }
 0x1e8   :  { %8072 = vmatpush3.bf16.msra.mxu0 %v8743_v4 }
 0x1e9   :  { %8073 = vmatprep.subr.bf16.mxu0 %v8745_v7  ;;  %8094 = vmatpush3.bf16.msra.mxu1 %v8744_v5  ;;  %v8792_v5 = vld [vmem:[%s10838_s1 + $0x1028] sm:$0xff]   ;;  %v8794_v7 = vld [vmem:[%s10838_s1 + $0x1070] sm:$0xff]  }
 0x1ea   :  { %8095 = vmatprep.subr.bf16.mxu1 %v8746_v8 }
 0x1ec   :  { %8074 = vmatpush3.bf16.msra.mxu0 %v8747_v9 }
 0x1ed   :  { %8075 = vmatprep.subr.bf16.mxu0 %v8749_v11  ;;  %8096 = vmatpush3.bf16.msra.mxu1 %v8748_v10 }
 0x1ee   :  { %8097 = vmatprep.subr.bf16.mxu1 %v8750_v12  ;;  %v8793_v12 = vld [vmem:[%s10838_s1 + $0x10a8] sm:$0xff]  }
 0x1f0   :  { %8076 = vmatpush3.bf16.msra.mxu0 %v8751_v13 }
 0x1f1   :  { %8077 = vmatprep.subr.bf16.mxu0 %v8753_v15  ;;  %8098 = vmatpush3.bf16.msra.mxu1 %v8752_v14  ;;  %v8795_v14 = vld [vmem:[%s10838_s1 + $0x10f0] sm:$0xff]  }
 0x1f2   :  { %8099 = vmatprep.subr.bf16.mxu1 %v8754_v16 }
 0x1f4   :  { %8078 = vmatpush3.bf16.msra.mxu0 %v8755_v17 }
 0x1f5   :  { %8079 = vmatprep.subr.bf16.mxu0 %v8757_v19  ;;  %8100 = vmatpush3.bf16.msra.mxu1 %v8756_v18  ;;  %v8796_v18 = vld [vmem:[%s10838_s1 + $0x1030] sm:$0xff]  }
 0x1f6   :  { %v7777_v21 = vpop.f32.mrb[32].mxu0  ;;  %8101 = vmatprep.subr.bf16.mxu1 %v8758_v20  ;;  %v8798_v20 = vld [vmem:[%s10838_s1 + $0x1078] sm:$0xff]  }
 0x1f7   :  { %v7778_v23 = vpop.f32.mrb[33].mxu0  ;;  %v7799_v25 = vpop.f32.mrb[32].mxu1 }
 0x1f8   :  { %v7779_v26 = vadd.f32 %v7778_v23, %v7777_v21  ;;  %v7780_v27 = vpop.f32.mrb[34].mxu0  ;;  %v7800_v30 = vpop.f32.mrb[33].mxu1  ;;  %8080 = vmatpush3.bf16.msra.mxu0 %v8759_v22  ;;  %v8797_v22 = vld [vmem:[%s10838_s1 + $0x10b0] sm:$0xff]   ;;  %v8799_v23 = vld [vmem:[%s10838_s1 + $0x10f8] sm:$0xff]  }
 0x1f9   :  { %v7781_v31 = vpop.f32.mrb[35].mxu0  ;;  %v7801_v33 = vadd.f32 %v7800_v30, %v7799_v25  ;;  %v7802_v34 = vpop.f32.mrb[34].mxu1  ;;  %8081 = vmatprep.subr.bf16.mxu0 %v8761_v28  ;;  %8102 = vmatpush3.bf16.msra.mxu1 %v8760_v24  ;;  %v8800_v24 = vld [vmem:[%s10838_s1 + $0x1038] sm:$0xff]   ;;  %v35_v25 = vld [vmem:[%s10839_s0 + $0x40] sm:$0xff] }
 0x1fa   :  { %v5848_v32 = vadd.f32 %v7779_v26, %v10442_v46  ;;  %v7803_v37 = vpop.f32.mrb[35].mxu1  ;;  %8103 = vmatprep.subr.bf16.mxu1 %v8762_v29  ;;  %v8771_v46 = vld [vmem:[%s10838_s1 + $0x10c0] sm:$0xff]   ;;  %v1603_v26 = vrot.slane %v35_v25, %v8980_v35  ;;  %v1596_v28 = vcombine.high %v35_v25, %v35_v25  ;;  %v8801_v29 = vld [vmem:[%s10838_s1 + $0x10b8] sm:$0xff]  }
 0x1fb   :  { %v8802_v27 = vld [vmem:[%s10838_s1 + $0x1140] sm:$0xff]  }
 0x1fc   :  { %v10553_v39 = vadd.f32 %v7801_v33, %v5848_v32  ;;  %8082 = vmatpush3.bf16.msra.mxu0 %v8763_v36  ;;  %v1611_v30 = vcombine.high %v1603_v26, %v1603_v26  ;;  %v1619_v31 = vrot.slane %v1603_v26, %v8980_v35  ;;  %v8803_v32 = vld [vmem:[%s10838_s1 + $0x11c0] sm:$0xff]   ;;  %v10680_v33 = vrot.slane %v1596_v28, %v8980_v35 }
 0x1fd   :  { %8083 = vmatprep.subr.bf16.mxu0 %v8765_v40  ;;  %8104 = vmatpush3.bf16.msra.mxu1 %v8764_v38  ;;  %v8804_v36 = vld [vmem:[%s10838_s1 + $0x1100] sm:$0xff]  }
 0x1fe   :  { %8105 = vmatprep.subr.bf16.mxu1 %v8766_v41  ;;  %v1633_v34 = vrot.slane %v1611_v30, %v8980_v35  ;;  %v1612_v37 = vcombine.high %v10680_v33, %v10680_v33  ;;  %v1641_v38 = vcombine.high %v1619_v31, %v1619_v31  ;;  %v8805_v41 = vld [vmem:[%s10838_s1 + $0x1180] sm:$0xff]  }
 0x200   :  { %8084 = vmatpush3.bf16.msra.mxu0 %v8767_v42  ;;  %v1643_v40 = vcombine.high %v1633_v34, %v1633_v34  ;;  %v1640_v42 = vrot.slane %v1612_v37, %v8980_v35 }
 0x201   :  { %8113 = vmatprep.subr.bf16.mxu0 %v8770_v45  ;;  %8106 = vmatpush3.bf16.msra.mxu1 %v8768_v43  ;;  %v8807_v43 = vld [vmem:[%s10838_s1 + $0x11c8] sm:$0xff]  }
 0x202   :  { %8135 = vmatprep.subr.bf16.mxu1 %v8771_v46  ;;  %v1644_v45 = vcombine.high %v1640_v42, %v1640_v42  ;;  %v8810_v46 = vld [vmem:[%s10838_s1 + $0x1150] sm:$0xff]  }
 0x203   :  { %6406 = vmatmul.mubr.bf16.vlgmr.msra.gmra.mrb[60].mxu0 %v1577_v44  ;;  %v8808_v44 = vld [vmem:[%s10838_s1 + $0x1108] sm:$0xff]  }
 0x204   :  { %8114 = vmatpush3.bf16.msra.mxu0 %v8772_v47  ;;  %6446 = vmatmul.mubr.bf16.vlgmr.msra.gmra.mrb[60].mxu1 %v1593_v49  ;;  %v8809_v47 = vld [vmem:[%s10838_s1 + $0x1188] sm:$0xff]   ;;  %v8812_v49 = vld [vmem:[%s10838_s1 + $0x1110] sm:$0xff]  }
 0x205   :  { %8115 = vmatprep.subr.bf16.mxu0 %v8774_v50  ;;  %8136 = vmatpush3.bf16.msra.mxu1 %v8773_v48  ;;  %v8811_v48 = vld [vmem:[%s10838_s1 + $0x11d0] sm:$0xff]   ;;  %v8814_v50 = vld [vmem:[%s10838_s1 + $0x1158] sm:$0xff]  }
 0x206   :  { %8137 = vmatprep.subr.bf16.mxu1 %v8775_v51  ;;  %6485 = vmatprep.mubr.bf16.mxu0 %v1633_v34  ;;  %v8813_v51 = vld [vmem:[%s10838_s1 + $0x1190] sm:$0xff]  }
 0x207   :  { %6525 = vmatprep.mubr.bf16.mxu1 %v1643_v40 }
 0x208   :  { %8116 = vmatpush3.bf16.msra.mxu0 %v8776_v52  ;;  %v8815_v52 = vld [vmem:[%s10838_s1 + $0x11d8] sm:$0xff]  }
 0x209   :  { %8117 = vmatprep.subr.bf16.mxu0 %v8778_v54  ;;  %8138 = vmatpush3.bf16.msra.mxu1 %v8777_v53  ;;  %v8816_v53 = vld [vmem:[%s10838_s1 + $0x1118] sm:$0xff]   ;;  %v8818_v54 = vld [vmem:[%s10838_s1 + $0x1160] sm:$0xff]  }
 0x20a   :  { %8139 = vmatprep.subr.bf16.mxu1 %v8779_v55  ;;  %v8817_v55 = vld [vmem:[%s10838_s1 + $0x1198] sm:$0xff]  }
 0x20c   :  { %8118 = vmatpush3.bf16.msra.mxu0 %v8780_v56  ;;  %v8819_v56 = vld [vmem:[%s10838_s1 + $0x11e0] sm:$0xff]  }
 0x20d   :  { %8119 = vmatprep.subr.bf16.mxu0 %v8782_v58  ;;  %8140 = vmatpush3.bf16.msra.mxu1 %v8781_v57  ;;  %v8820_v57 = vld [vmem:[%s10838_s1 + $0x1120] sm:$0xff]   ;;  %v8822_v58 = vld [vmem:[%s10838_s1 + $0x1168] sm:$0xff]  }
 0x20e   :  { %8141 = vmatprep.subr.bf16.mxu1 %v8783_v59  ;;  %v8821_v59 = vld [vmem:[%s10838_s1 + $0x11a0] sm:$0xff]  }
 0x210   :  { %8120 = vmatpush3.bf16.msra.mxu0 %v8784_v60 }
 0x211   :  { %8121 = vmatprep.subr.bf16.mxu0 %v8786_v62  ;;  %8142 = vmatpush3.bf16.msra.mxu1 %v8785_v61  ;;  %v8823_v61 = vld [vmem:[%s10838_s1 + $0x11e8] sm:$0xff]  }
 0x212   :  { %8143 = vmatprep.subr.bf16.mxu1 %v8787_v63  ;;  %v8824_v63 = vld [vmem:[%s10838_s1 + $0x1128] sm:$0xff]  }
 0x214   :  { %8122 = vmatpush3.bf16.msra.mxu0 %v8788_v0 }
 0x215   :  { %8123 = vmatprep.subr.bf16.mxu0 %v8790_v2  ;;  %8144 = vmatpush3.bf16.msra.mxu1 %v8789_v1 }
 0x216   :  { %v7821_v4 = vpop.f32.mrb[36].mxu0  ;;  %8145 = vmatprep.subr.bf16.mxu1 %v8791_v3  ;;  %v8825_v3 = vld [vmem:[%s10838_s1 + $0x11a8] sm:$0xff]  }
 0x217   :  { %v7822_v6 = vpop.f32.mrb[37].mxu0  ;;  %v7843_v8 = vpop.f32.mrb[36].mxu1 }
 0x218   :  { %v7823_v9 = vadd.f32 %v7822_v6, %v7821_v4  ;;  %v7824_v10 = vpop.f32.mrb[38].mxu0  ;;  %v7844_v11 = vpop.f32.mrb[37].mxu1  ;;  %8124 = vmatpush3.bf16.msra.mxu0 %v8792_v5  ;;  %v8826_v4 = vld [vmem:[%s10838_s1 + $0x1170] sm:$0xff]  }
 0x219   :  { %v7825_v13 = vpop.f32.mrb[39].mxu0  ;;  %v7845_v16 = vadd.f32 %v7844_v11, %v7843_v8  ;;  %v7846_v17 = vpop.f32.mrb[38].mxu1  ;;  %8125 = vmatprep.subr.bf16.mxu0 %v8794_v7  ;;  %8146 = vmatpush3.bf16.msra.mxu1 %v8793_v12  ;;  %v8827_v10 = vld [vmem:[%s10838_s1 + $0x11f0] sm:$0xff]  }
 0x21a   :  { %v5928_v15 = vadd.f32 %v7823_v9, %v10553_v39  ;;  %v7847_v19 = vpop.f32.mrb[39].mxu1  ;;  %8147 = vmatprep.subr.bf16.mxu1 %v8795_v14  ;;  %v8806_v39 = vld [vmem:[%s10838_s1 + $0x1148] sm:$0xff]   ;;  %v8828_v12 = vld [vmem:[%s10838_s1 + $0x1130] sm:$0xff]   ;;  %v8830_v14 = vld [vmem:[%s10838_s1 + $0x1178] sm:$0xff]  }
 0x21b   :  { %v8832_v17 = vld [vmem:[%s10838_s1 + $0x1138] sm:$0xff]  }
 0x21c   :  { %v10654_v21 = vadd.f32 %v7845_v16, %v5928_v15  ;;  %8126 = vmatpush3.bf16.msra.mxu0 %v8796_v18  ;;  %v8829_v15 = vld [vmem:[%s10838_s1 + $0x11b0] sm:$0xff]   ;;  %v8831_v16 = vld [vmem:[%s10838_s1 + $0x11f8] sm:$0xff]   ;;  %v1626_v18 = vrot.slane %v10680_v33, %v8980_v35 }
 0x21d   :  { %8127 = vmatprep.subr.bf16.mxu0 %v8798_v20  ;;  %8148 = vmatpush3.bf16.msra.mxu1 %v8797_v22  ;;  %v8833_v19 = vld [vmem:[%s10838_s1 + $0x11b8] sm:$0xff]  }
 0x21e   :  { %8149 = vmatprep.subr.bf16.mxu1 %v8799_v23  ;;  %v1642_v20 = vcombine.high %v1626_v18, %v1626_v18 }
 0x220   :  { %8128 = vmatpush3.bf16.msra.mxu0 %v8800_v24 }
 0x221   :  { %8157 = vmatprep.subr.bf16.mxu0 %v8802_v27  ;;  %8150 = vmatpush3.bf16.msra.mxu1 %v8801_v29 }
 0x222   :  { %8179 = vmatprep.subr.bf16.mxu1 %v8803_v32 }
 0x223   :  { %6486 = vmatmul.mubr.bf16.vlgmr.msra.gmra.mrb[64].mxu0 %v1619_v31 }
 0x224   :  { %8158 = vmatpush3.bf16.msra.mxu0 %v8804_v36  ;;  %6526 = vmatmul.mubr.bf16.vlgmr.msra.gmra.mrb[64].mxu1 %v1641_v38 }
 0x225   :  { %8159 = vmatprep.subr.bf16.mxu0 %v8806_v39  ;;  %8180 = vmatpush3.bf16.msra.mxu1 %v8805_v41 }
 0x226   :  { %6565 = vmatprep.mubr.bf16.mxu0 %v1640_v42  ;;  %8181 = vmatprep.subr.bf16.mxu1 %v8807_v43 }
 0x227   :  { %6605 = vmatprep.mubr.bf16.mxu1 %v1644_v45  ;;  %v8848_v45 = vmov 0.0  }
 0x228   :  { %8160 = vmatpush3.bf16.msra.mxu0 %v8808_v44 }
 0x229   :  { %8161 = vmatprep.subr.bf16.mxu0 %v8810_v46  ;;  %8182 = vmatpush3.bf16.msra.mxu1 %v8809_v47  ;;  %v8835_v46 = vld [vmem:[%s10841_s3] sm:$0xff]  }
 0x22a   :  { %8183 = vmatprep.subr.bf16.mxu1 %v8811_v48 }
 0x22c   :  { %8162 = vmatpush3.bf16.msra.mxu0 %v8812_v49 }
 0x22d   :  { %8163 = vmatprep.subr.bf16.mxu0 %v8814_v50  ;;  %8184 = vmatpush3.bf16.msra.mxu1 %v8813_v51 }
 0x22e   :  { %8185 = vmatprep.subr.bf16.mxu1 %v8815_v52 }
 0x230   :  { %8164 = vmatpush3.bf16.msra.mxu0 %v8816_v53 }
 0x231   :  { %8165 = vmatprep.subr.bf16.mxu0 %v8818_v54  ;;  %8186 = vmatpush3.bf16.msra.mxu1 %v8817_v55  ;;  %v8836_v54 = vld [vmem:[%s10841_s3 + $0x8] sm:$0xff]  }
 0x232   :  { %8187 = vmatprep.subr.bf16.mxu1 %v8819_v56 }
 0x234   :  { %8166 = vmatpush3.bf16.msra.mxu0 %v8820_v57 }
 0x235   :  { %8167 = vmatprep.subr.bf16.mxu0 %v8822_v58  ;;  %8188 = vmatpush3.bf16.msra.mxu1 %v8821_v59 }
 0x236   :  { %v7865_v60 = vpop.f32.mrb[40].mxu0  ;;  %8189 = vmatprep.subr.bf16.mxu1 %v8823_v61  ;;  %v8838_v61 = vld [vmem:[%s10841_s3 + $0x18] sm:$0xff]  }
 0x237   :  { %v7866_v62 = vpop.f32.mrb[41].mxu0  ;;  %v7887_v0 = vpop.f32.mrb[40].mxu1 }
 0x238   :  { %v7867_v1 = vadd.f32 %v7866_v62, %v7865_v60  ;;  %v7868_v2 = vpop.f32.mrb[42].mxu0  ;;  %v7888_v5 = vpop.f32.mrb[41].mxu1  ;;  %8168 = vmatpush3.bf16.msra.mxu0 %v8824_v63  ;;  %v8837_v60 = vld [vmem:[%s10841_s3 + $0x10] sm:$0xff]   ;;  %v8839_v62 = vld [vmem:[%s10842_s5] sm:$0xff]   ;;  %v8840_v63 = vld [vmem:[%s10842_s5 + $0x8] sm:$0xff]  }
 0x239   :  { %v7869_v6 = vpop.f32.mrb[43].mxu0  ;;  %v7889_v8 = vadd.f32 %v7888_v5, %v7887_v0  ;;  %v7890_v9 = vpop.f32.mrb[42].mxu1  ;;  %8169 = vmatprep.subr.bf16.mxu0 %v8826_v4  ;;  %8190 = vmatpush3.bf16.msra.mxu1 %v8825_v3  ;;  %v8841_v0 = vld [vmem:[%s10842_s5 + $0x10] sm:$0xff]   ;;  %v8843_v2 = vld [vmem:[%s10842_s5 + $0x20] sm:$0xff]   ;;  %v8844_v4 = vld [vmem:[%s10842_s5 + $0x28] sm:$0xff]  }
 0x23a   :  { %v6008_v7 = vadd.f32 %v7867_v1, %v10654_v21  ;;  %v7891_v11 = vpop.f32.mrb[43].mxu1  ;;  %8191 = vmatprep.subr.bf16.mxu1 %v8827_v10  ;;  %v8842_v1 = vld [vmem:[%s10842_s5 + $0x18] sm:$0xff]  }
 0x23c   :  { %v6048_v13 = vadd.f32 %v7889_v8, %v6008_v7  ;;  %8170 = vmatpush3.bf16.msra.mxu0 %v8828_v12 }
 0x23d   :  { %8171 = vmatprep.subr.bf16.mxu0 %v8830_v14  ;;  %8192 = vmatpush3.bf16.msra.mxu1 %v8829_v15 }
 0x23e   :  { %8193 = vmatprep.subr.bf16.mxu1 %v8831_v16 }
 0x240   :  { %8172 = vmatpush3.bf16.msra.mxu0 %v8832_v17 }
 0x241   :  { %8194 = vmatpush3.bf16.msra.mxu1 %v8833_v19  ;;  %8215 = vmatprep.subr.bf16.mxu0 %v8848_v45 }
 0x242   :  { %8227 = vmatprep.subr.bf16.mxu1 %v8848_v45 }
 0x243   :  { %6566 = vmatmul.mubr.bf16.vlgmr.msra.gmra.mrb[68].mxu0 %v1626_v18 }
 0x244   :  { %6606 = vmatmul.mubr.bf16.vlgmr.msra.gmra.mrb[68].mxu1 %v1642_v20  ;;  %8216 = vmatpush3.bf16.msra.mxu0 %v8835_v46 }
 0x245   :  { %8217 = vmatprep.subr.bf16.mxu0 %v8848_v45  ;;  %8223 = vmatprep.mubr.msk.bf16.mxu0 %vm8849_vm0, %v8848_v45 }
 0x246   :  { %8243 = vmatprep.mubr.msk.bf16.mxu1 %vm8849_vm0, %v8848_v45  ;;  %8228 = vmatpush3.bf16.msra.mxu1 %v8839_v62 }
 0x247   :  { %8229 = vmatprep.subr.bf16.mxu1 %v8848_v45 }
 0x248   :  { %8218 = vmatpush3.bf16.msra.mxu0 %v8836_v54 }
 0x249   :  { %8219 = vmatprep.subr.bf16.mxu0 %v8848_v45 }
 0x24a   :  { %8230 = vmatpush3.bf16.msra.mxu1 %v8840_v63 }
 0x24b   :  { %8231 = vmatprep.subr.bf16.mxu1 %v8848_v45 }
 0x24c   :  { %8220 = vmatpush3.bf16.msra.mxu0 %v8837_v60 }
 0x24d   :  { %8221 = vmatprep.subr.bf16.mxu0 %v8848_v45 }
 0x24e   :  { %8232 = vmatpush3.bf16.msra.mxu1 %v8841_v0 }
 0x24f   :  { %8233 = vmatprep.subr.bf16.mxu1 %v8848_v45 }
 0x250   :  { %8222 = vmatpush3.bf16.msra.mxu0 %v8838_v61 }
 0x252   :  { %8234 = vmatpush3.bf16.msra.mxu1 %v8842_v1 }
 0x253   :  { %8235 = vmatprep.subr.bf16.mxu1 %v8848_v45 }
 0x256   :  { %v7909_v21 = vpop.f32.mrb[44].mxu0  ;;  %8236 = vmatpush3.bf16.msra.mxu1 %v8843_v2 }
 0x257   :  { %v7910_v22 = vpop.f32.mrb[45].mxu0  ;;  %v7931_v23 = vpop.f32.mrb[44].mxu1  ;;  %8237 = vmatprep.subr.bf16.mxu1 %v8848_v45 }
 0x258   :  { %v7911_v24 = vadd.f32 %v7910_v22, %v7909_v21  ;;  %v7912_v25 = vpop.f32.mrb[46].mxu0  ;;  %v7932_v26 = vpop.f32.mrb[45].mxu1 }
 0x259   :  { %v7913_v27 = vpop.f32.mrb[47].mxu0  ;;  %v7933_v35 = vadd.f32 %v7932_v26, %v7931_v23  ;;  %v7934_v29 = vpop.f32.mrb[46].mxu1 }
 0x25a   :  { %v6088_v28 = vadd.f32 %v7911_v24, %v6048_v13  ;;  %v7935_v30 = vpop.f32.mrb[47].mxu1  ;;  %8238 = vmatpush3.bf16.msra.mxu1 %v8844_v4 }
 0x25b   :  { %8239 = vmatprep.subr.bf16.mxu1 %v8848_v45 }
 0x25c   :  { %v6128_v31 = vadd.f32 %v7933_v35, %v6088_v28 }
 0x276   :  { %v7953_v32 = vpop.f32.mrb[48].mxu0 }
 0x277   :  { %v7954_v33 = vpop.f32.mrb[49].mxu0  ;;  %v7975_v34 = vpop.f32.mrb[48].mxu1 }
 0x278   :  { %v7955_v36 = vadd.f32 %v7954_v33, %v7953_v32  ;;  %v7956_v37 = vpop.f32.mrb[50].mxu0  ;;  %v7976_v38 = vpop.f32.mrb[49].mxu1 }
 0x279   :  { %v7957_v39 = vpop.f32.mrb[51].mxu0  ;;  %v7977_v41 = vadd.f32 %v7976_v38, %v7975_v34  ;;  %v7978_v42 = vpop.f32.mrb[50].mxu1 }
 0x27a   :  { %v6168_v40 = vadd.f32 %v7955_v36, %v6128_v31  ;;  %v7979_v43 = vpop.f32.mrb[51].mxu1 }
 0x27c   :  { %v6208_v44 = vadd.f32 %v7977_v41, %v6168_v40 }
 0x296   :  { %v7997_v47 = vpop.f32.mrb[52].mxu0 }
 0x297   :  { %v7998_v48 = vpop.f32.mrb[53].mxu0  ;;  %v8019_v49 = vpop.f32.mrb[52].mxu1 }
 0x298   :  { %v7999_v50 = vadd.f32 %v7998_v48, %v7997_v47  ;;  %v8000_v51 = vpop.f32.mrb[54].mxu0  ;;  %v8020_v52 = vpop.f32.mrb[53].mxu1 }
 0x299   :  { %v8001_v53 = vpop.f32.mrb[55].mxu0  ;;  %v8021_v56 = vadd.f32 %v8020_v52, %v8019_v49  ;;  %v8022_v57 = vpop.f32.mrb[54].mxu1 }
 0x29a   :  { %v6248_v55 = vadd.f32 %v7999_v50, %v6208_v44  ;;  %v8023_v58 = vpop.f32.mrb[55].mxu1  ;;  %v7394_v57 = vld [vmem:[%s10843_s4] ss:$0 sm:$0xff] }
 0x29c   :  { %v6288_v59 = vadd.f32 %v8021_v56, %v6248_v55  ;;  %v8845_v55 = vld [vmem:[%s10842_s5 + $0x30] sm:$0xff]   ;;  %v8846_v56 = vld [vmem:[%s10842_s5 + $0x38] sm:$0xff]  }
 0x29d   :  { %8240 = vmatpush3.bf16.msra.mxu1 %v8845_v55 }
 0x29e   :  { %8241 = vmatprep.subr.bf16.mxu1 %v8848_v45  ;;  %v7400_v45 = vld [vmem:[%s10844_s6] ss:$0 sm:$0xff] }
 0x2a1   :  { %8242 = vmatpush3.bf16.msra.mxu1 %v8846_v56 }
 0x2b6   :  { %v8041_v3 = vpop.f32.mrb[56].mxu0 }
 0x2b7   :  { %v8042_v5 = vpop.f32.mrb[57].mxu0  ;;  %v8063_v6 = vpop.f32.mrb[56].mxu1 }
 0x2b8   :  { %v8043_v7 = vadd.f32 %v8042_v5, %v8041_v3  ;;  %v8044_v8 = vpop.f32.mrb[58].mxu0  ;;  %v8064_v9 = vpop.f32.mrb[57].mxu1 }
 0x2b9   :  { %v8045_v10 = vpop.f32.mrb[59].mxu0  ;;  %v8065_v12 = vadd.f32 %v8064_v9, %v8063_v6  ;;  %v8066_v13 = vpop.f32.mrb[58].mxu1 }
 0x2ba   :  { %v6328_v11 = vadd.f32 %v8043_v7, %v6288_v59  ;;  %v8067_v14 = vpop.f32.mrb[59].mxu1 }
 0x2bc   :  { %v6368_v15 = vadd.f32 %v8065_v12, %v6328_v11 }
 0x2d6   :  { %v8085_v16 = vpop.f32.mrb[60].mxu0 }
 0x2d7   :  { %v8086_v17 = vpop.f32.mrb[61].mxu0  ;;  %v8107_v18 = vpop.f32.mrb[60].mxu1 }
 0x2d8   :  { %v8087_v19 = vadd.f32 %v8086_v17, %v8085_v16  ;;  %v8088_v20 = vpop.f32.mrb[62].mxu0  ;;  %v8108_v21 = vpop.f32.mrb[61].mxu1 }
 0x2d9   :  { %v8089_v22 = vpop.f32.mrb[63].mxu0  ;;  %v8109_v24 = vadd.f32 %v8108_v21, %v8107_v18  ;;  %v8110_v25 = vpop.f32.mrb[62].mxu1 }
 0x2da   :  { %v6408_v23 = vadd.f32 %v8087_v19, %v6368_v15  ;;  %v8111_v26 = vpop.f32.mrb[63].mxu1 }
 0x2dc   :  { %v6448_v27 = vadd.f32 %v8109_v24, %v6408_v23 }
 0x2f6   :  { %v8129_v28 = vpop.f32.mrb[64].mxu0 }
 0x2f7   :  { %v8130_v35 = vpop.f32.mrb[65].mxu0  ;;  %v8151_v29 = vpop.f32.mrb[64].mxu1 }
 0x2f8   :  { %v8131_v30 = vadd.f32 %v8130_v35, %v8129_v28  ;;  %v8132_v31 = vpop.f32.mrb[66].mxu0  ;;  %v8152_v32 = vpop.f32.mrb[65].mxu1 }
 0x2f9   :  { %v8133_v33 = vpop.f32.mrb[67].mxu0  ;;  %v8153_v36 = vadd.f32 %v8152_v32, %v8151_v29  ;;  %v8154_v37 = vpop.f32.mrb[66].mxu1 }
 0x2fa   :  { %v6488_v34 = vadd.f32 %v8131_v30, %v6448_v27  ;;  %v8155_v38 = vpop.f32.mrb[67].mxu1 }
 0x2fc   :  { %v6528_v39 = vadd.f32 %v8153_v36, %v6488_v34 }
 0x316   :  { %v8173_v40 = vpop.f32.mrb[68].mxu0 }
 0x317   :  { %v8174_v41 = vpop.f32.mrb[69].mxu0  ;;  %v8195_v42 = vpop.f32.mrb[68].mxu1 }
 0x318   :  { %v8175_v43 = vadd.f32 %v8174_v41, %v8173_v40  ;;  %v8176_v44 = vpop.f32.mrb[70].mxu0  ;;  %v8196_v46 = vpop.f32.mrb[69].mxu1 }
 0x319   :  { %v8177_v47 = vpop.f32.mrb[71].mxu0  ;;  %v8197_v49 = vadd.f32 %v8196_v46, %v8195_v42  ;;  %v8198_v50 = vpop.f32.mrb[70].mxu1 }
 0x31a   :  { %v6568_v48 = vadd.f32 %v8175_v43, %v6528_v39  ;;  %v8199_v51 = vpop.f32.mrb[71].mxu1 }
 0x31c   :  { %v6608_v52 = vadd.f32 %v8197_v49, %v6568_v48 }
 0x31e   :  { %v6613_v53 = vmax.f32 %v6608_v52, 0.0 }
 0x320   :  { %v6614_v54 = vpack.c.bf16 %v6613_v53, %v6613_v53 }
 0x322   :  { %8224 = vmatmul.mubr.msk.bf16.vlgmr.msra.gmra.mrb[72].mxu0 %vm6654_vm1, %v6614_v54 }
 0x3f5   :  { %v6692_v58 = vpop.f32.mrb[72].mxu0 }
 0x3f6   :  { %v6693_v59 = vadd.f32 %v7394_v57, %v6692_v58  ;;  %v8225_v60 = vpop.f32.mrb[73].mxu0 }
 0x3f7   :  { %v6695_v61 = vpop.f32.mrb[74].mxu0 }
 0x3f8   :  { %v6698_v62 = vmax.f32 %v6693_v59, 0.0  ;;  %v8226_v63 = vpop.f32.mrb[75].mxu0 }
 0x3fa   :  { %v6699_v0 = vpack.c.bf16 %v6698_v62, %v6698_v62 }
 0x3fc   :  { %8244 = vmatmul.mubr.bf16.vlgmr.msra.gmra.mrb[72].mxu1 %v6699_v0 }
 0x4cf   :  { %v6805_v1 = vpop.f32.mrb[72].mxu1 }
 0x4d0   :  { %v6806_v2 = vadd.f32 %v7400_v45, %v6805_v1  ;;  %v8245_v3 = vpop.f32.mrb[73].mxu1 }
 0x4d1   :  { %v6808_v4 = vpop.f32.mrb[74].mxu1 }
 0x4d2   :  { %6812 = vst.msk [vmem:[%s10845_s7] sm:$0x3] %vm6811_vm2, %v6806_v2  ;;  %v8246_v5 = vpop.f32.mrb[75].mxu1 }

</bundles_post_ra>
